<compile_context>
chip_gen: v6e
topology: v6e:2x2x1
jax: 0.10.0
libtpu: 0.0.40
codegen_flags: <defaults>
</compile_context>

<pallas_src>
import jax
import jax.numpy as jnp
import numpy as np
from jax import lax
from jax.experimental import pallas as pl
from jax.experimental.pallas import tpu as pltpu

EPS = 1e-5  # PyTorch BatchNorm2d default


def _conv3x3_bn_relu(pad_ref, inp, w_ref, g_ref, bt_ref):
    """3x3 'same' conv (9 per-tap MXU dots, no im2col) + training-mode BN + ReLU.

    pad_ref: VMEM scratch (N, Hp+2, Wp+2, cin), bf16
    inp:     (N, Hp, Wp, cin) f32 value
    w_ref:   (9, cin, cout) bf16 per-tap weights (HWIO taps along axis 0)
    g_ref, bt_ref: (1, cout) f32 BN gamma / beta
    returns  (N*Hp*Wp, cout) f32
    """
    N, Hp, Wp, cin = inp.shape
    cout = w_ref.shape[-1]
    M = N * Hp * Wp

    # Zero only the 1-pixel halo (top/bottom rows incl. corners + left/right
    # columns), then write the interior once (cast to bf16 here, once).
    zrow = jnp.zeros((N, 1, Wp + 2, cin), pad_ref.dtype)
    zcol = jnp.zeros((N, Hp, 1, cin), pad_ref.dtype)
    pad_ref[:, 0:1, :, :] = zrow
    pad_ref[:, Hp + 1:Hp + 2, :, :] = zrow
    pad_ref[:, 1:Hp + 1, 0:1, :] = zcol
    pad_ref[:, 1:Hp + 1, Wp + 1:Wp + 2, :] = zcol
    pad_ref[:, 1:Hp + 1, 1:Wp + 1, :] = inp.astype(pad_ref.dtype)

    # Per-tap accumulation: 9 bf16 MXU dots into an f32 accumulator.
    acc = None
    for t in range(9):
        kh, kw = divmod(t, 3)
        tap = pad_ref[:, kh:kh + Hp, kw:kw + Wp, :].reshape(M, cin)   # bf16
        part = jnp.dot(tap, w_ref[t], preferred_element_type=jnp.float32)
        acc = part if acc is None else acc + part                     # (M, cout) f32

    # Training-mode BatchNorm2d with centered (two-pass) variance; conv bias is
    # omitted (exactly cancelled by the mean subtraction below).
    mean = jnp.mean(acc, axis=0, keepdims=True)                       # (1, cout)
    yc = acc - mean
    var = jnp.mean(yc * yc, axis=0, keepdims=True)
    scale = lax.rsqrt(var + EPS) * g_ref[...]
    return jnp.maximum(yc * scale + bt_ref[...], 0.0)                 # (M, cout)


def down_kernel(x2_ref, w1_ref, g1_ref, bt1_ref, w2_ref, g2_ref, bt2_ref,
                out_ref, pad1_ref, pad2_ref):
    N, H, Wp, two_cin = x2_ref.shape
    cin = two_cin // 2
    Hp = H // 2
    cout = w1_ref.shape[-1]

    # MaxPool2d(2): the W-pair of every 2x2 window is adjacent in the lane dim
    # (2*cin wide); the H-pair becomes a unit-size major dim after a reshape.
    x2 = x2_ref[...]                                                  # (N, H, Wp, 2*cin)
    wmax = jnp.maximum(x2[..., :cin], x2[..., cin:])                  # (N, H, Wp, cin)
    wmax = wmax.reshape(N, Hp, 2, Wp, cin)
    pooled = jnp.maximum(wmax[:, :, 0, :, :], wmax[:, :, 1, :, :])    # (N, Hp, Wp, cin)

    h1 = _conv3x3_bn_relu(pad1_ref, pooled, w1_ref, g1_ref, bt1_ref)  # (M, cout)
    h1 = h1.reshape(N, Hp, Wp, cout)                                  # contiguous, no transpose
    h2 = _conv3x3_bn_relu(pad2_ref, h1, w2_ref, g2_ref, bt2_ref)      # (M, cout)
    out_ref[...] = h2.reshape(N, Hp, Wp, cout)                        # NHWC store, no transpose


def down_forward(x, params):
    """x: (N, H, W, Cin) float32, NHWC. Returns (N, H//2, W//2, Cout) NHWC."""
    w1, b1, g1, bt1, w2, b2, g2, bt2 = params  # b1/b2 unused: no-op under training BN
    N, H, W, Cin = x.shape
    Hp, Wp = H // 2, W // 2
    Cout = w1.shape[-1]

    # Contiguous reshape only (W pairs folded into the channel/lane dim).
    x2 = x.reshape(N, H, Wp, 2 * Cin)

    # Per-tap weights (9, cin, cout), bf16 for the MXU; BN vectors as (1, C) f32.
    w1t = w1.reshape(9, Cin, Cout).astype(jnp.bfloat16)
    w2t = w2.reshape(9, Cout, Cout).astype(jnp.bfloat16)
    g1r, bt1r, g2r, bt2r = (v.reshape(1, -1).astype(jnp.float32)
                            for v in (g1, bt1, g2, bt2))

    vspec = pl.BlockSpec(memory_space=pltpu.MemorySpace.VMEM)
    return pl.pallas_call(
        down_kernel,
        out_shape=jax.ShapeDtypeStruct((N, Hp, Wp, Cout), jnp.float32),
        in_specs=[vspec] * 7,
        out_specs=vspec,
        scratch_shapes=[
            pltpu.VMEM((N, Hp + 2, Wp + 2, Cin), jnp.bfloat16),   # padded conv1 input
            pltpu.VMEM((N, Hp + 2, Wp + 2, Cout), jnp.bfloat16),  # padded conv2 input
        ],
        compiler_params=pltpu.CompilerParams(vmem_limit_bytes=48 * 1024 * 1024),
    )(x2, w1t, g1r, bt1r, w2t, g2r, bt2r)


def down_ref(x, params):
    """Pure-JAX f32 reference of the same forward (NHWC), conv bias included."""
    w1, b1, g1, bt1, w2, b2, g2, bt2 = params
    pooled = lax.reduce_window(x, -jnp.inf, lax.max,
                               (1, 2, 2, 1), (1, 2, 2, 1), 'VALID')

    def block(h, w, b, g, bt):
        y = lax.conv_general_dilated(h, w, (1, 1), 'SAME',
                                     dimension_numbers=('NHWC', 'HWIO', 'NHWC'),
                                     precision=lax.Precision.HIGHEST) + b
        mean = y.mean(axis=(0, 1, 2), keepdims=True)
        var = ((y - mean) ** 2).mean(axis=(0, 1, 2), keepdims=True)
        y = (y - mean) / jnp.sqrt(var + EPS) * g + bt
        return jnp.maximum(y, 0.0)

    return block(block(pooled, w1, b1, g1, bt1), w2, b2, g2, bt2)


if __name__ == "__main__":
    N, Cin, Cout, H, W = 2, 4, 8, 16, 16   # NCHW-equivalent input: (2, 4, 16, 16)
    key = jax.random.PRNGKey(0)
    ks = jax.random.split(key, 9)
    x = jax.random.normal(ks[0], (N, H, W, Cin), jnp.float32)

    # Deterministic parameter init (shapes follow double_conv(in_ch=4, out_ch=8)).
    w1 = 0.1 * jax.random.normal(ks[1], (3, 3, Cin, Cout), jnp.float32)
    b1 = 0.05 * jax.random.normal(ks[2], (Cout,), jnp.float32)
    g1 = 1.0 + 0.1 * jax.random.normal(ks[3], (Cout,), jnp.float32)
    bt1 = 0.05 * jax.random.normal(ks[4], (Cout,), jnp.float32)
    w2 = 0.1 * jax.random.normal(ks[5], (3, 3, Cout, Cout), jnp.float32)
    b2 = 0.05 * jax.random.normal(ks[6], (Cout,), jnp.float32)
    g2 = 1.0 + 0.1 * jax.random.normal(ks[7], (Cout,), jnp.float32)
    bt2 = 0.05 * jax.random.normal(ks[8], (Cout,), jnp.float32)
    params = (w1, b1, g1, bt1, w2, b2, g2, bt2)

    out = jax.block_until_ready(down_forward(x, params))
    ref = jax.block_until_ready(down_ref(x, params))
    assert out.shape == (N, H // 2, W // 2, Cout)
    err = float(np.max(np.abs(np.asarray(out) - np.asarray(ref))))
    # bf16 MXU operands (per perf feedback) vs an f32 HIGHEST-precision reference:
    # expected max-abs deviation is O(1e-2) on BN-normalized outputs.
    assert np.allclose(np.asarray(out), np.asarray(ref), atol=6e-2, rtol=6e-2), err
    print("KERNEL_OK")
</pallas_src>

<mosaic_0001>
module attributes {stable_mosaic.version = 11 : i64} {
  func.func @down_kernel(%arg0: memref<2x16x8x8xf32, #tpu.memory_space<vmem>>, %arg1: memref<9x4x8xbf16, #tpu.memory_space<vmem>>, %arg2: memref<1x8xf32, #tpu.memory_space<vmem>>, %arg3: memref<1x8xf32, #tpu.memory_space<vmem>>, %arg4: memref<9x8x8xbf16, #tpu.memory_space<vmem>>, %arg5: memref<1x8xf32, #tpu.memory_space<vmem>>, %arg6: memref<1x8xf32, #tpu.memory_space<vmem>>, %arg7: memref<2x8x8x8xf32, #tpu.memory_space<vmem>>, %arg8: memref<2x10x10x4xbf16, #tpu.memory_space<vmem>>, %arg9: memref<2x10x10x8xbf16, #tpu.memory_space<vmem>>) attributes {dimension_semantics = [], scalar_prefetch = 0 : i64, scratch_operands = 2 : i64, tpu.core_type = #tpu.core_type<tc>} {
    %c0 = arith.constant 0 : index
    %c0_0 = arith.constant 0 : index
    %c0_1 = arith.constant 0 : index
    %c0_2 = arith.constant 0 : index
    %0 = vector.load %arg0[%c0, %c0_0, %c0_1, %c0_2] : memref<2x16x8x8xf32, #tpu.memory_space<vmem>>, vector<2x16x8x8xf32>
    %1 = vector.extract_strided_slice %0 {offsets = [0, 0, 0, 0], sizes = [2, 16, 8, 4], strides = [1, 1, 1, 1]} : vector<2x16x8x8xf32> to vector<2x16x8x4xf32>
    %2 = vector.extract_strided_slice %0 {offsets = [0, 0, 0, 4], sizes = [2, 16, 8, 4], strides = [1, 1, 1, 1]} : vector<2x16x8x8xf32> to vector<2x16x8x4xf32>
    %3 = arith.maximumf %1, %2 : vector<2x16x8x4xf32>
    %4 = vector.shape_cast %3 : vector<2x16x8x4xf32> to vector<2x8x2x8x4xf32>
    %5 = vector.extract_strided_slice %4 {offsets = [0, 0, 0, 0, 0], sizes = [2, 8, 1, 8, 4], strides = [1, 1, 1, 1, 1]} : vector<2x8x2x8x4xf32> to vector<2x8x1x8x4xf32>
    %6 = vector.shape_cast %5 : vector<2x8x1x8x4xf32> to vector<2x8x8x4xf32>
    %7 = vector.extract_strided_slice %4 {offsets = [0, 0, 1, 0, 0], sizes = [2, 8, 1, 8, 4], strides = [1, 1, 1, 1, 1]} : vector<2x8x2x8x4xf32> to vector<2x8x1x8x4xf32>
    %8 = vector.shape_cast %7 : vector<2x8x1x8x4xf32> to vector<2x8x8x4xf32>
    %9 = arith.maximumf %6, %8 : vector<2x8x8x4xf32>
    %cst = arith.constant 0.000000e+00 : bf16
    %10 = vector.broadcast %cst : bf16 to vector<2x1x10x4xbf16>
    %cst_3 = arith.constant 0.000000e+00 : bf16
    %11 = vector.broadcast %cst_3 : bf16 to vector<2x8x1x4xbf16>
    %c0_4 = arith.constant 0 : index
    %c0_5 = arith.constant 0 : index
    %c0_6 = arith.constant 0 : index
    %c0_7 = arith.constant 0 : index
    %12 = vector.load %arg8[%c0_4, %c0_5, %c0_6, %c0_7] : memref<2x10x10x4xbf16, #tpu.memory_space<vmem>>, vector<2x1x10x4xbf16>
    tpu.vector_store %arg8[%c0_4, %c0_5, %c0_6, %c0_7], %10 {strides = array<i32>} : memref<2x10x10x4xbf16, #tpu.memory_space<vmem>>, vector<2x1x10x4xbf16>,
    %c0_8 = arith.constant 0 : index
    %c9 = arith.constant 9 : index
    %c0_9 = arith.constant 0 : index
    %c0_10 = arith.constant 0 : index
    %13 = vector.load %arg8[%c0_8, %c9, %c0_9, %c0_10] : memref<2x10x10x4xbf16, #tpu.memory_space<vmem>>, vector<2x1x10x4xbf16>
    tpu.vector_store %arg8[%c0_8, %c9, %c0_9, %c0_10], %10 {strides = array<i32>} : memref<2x10x10x4xbf16, #tpu.memory_space<vmem>>, vector<2x1x10x4xbf16>,
    %c0_11 = arith.constant 0 : index
    %c1 = arith.constant 1 : index
    %c0_12 = arith.constant 0 : index
    %c0_13 = arith.constant 0 : index
    %14 = vector.load %arg8[%c0_11, %c1, %c0_12, %c0_13] : memref<2x10x10x4xbf16, #tpu.memory_space<vmem>>, vector<2x8x1x4xbf16>
    tpu.vector_store %arg8[%c0_11, %c1, %c0_12, %c0_13], %11 {strides = array<i32>} : memref<2x10x10x4xbf16, #tpu.memory_space<vmem>>, vector<2x8x1x4xbf16>,
    %c0_14 = arith.constant 0 : index
    %c1_15 = arith.constant 1 : index
    %c9_16 = arith.constant 9 : index
    %c0_17 = arith.constant 0 : index
    %15 = vector.load %arg8[%c0_14, %c1_15, %c9_16, %c0_17] : memref<2x10x10x4xbf16, #tpu.memory_space<vmem>>, vector<2x8x1x4xbf16>
    tpu.vector_store %arg8[%c0_14, %c1_15, %c9_16, %c0_17], %11 {strides = array<i32>} : memref<2x10x10x4xbf16, #tpu.memory_space<vmem>>, vector<2x8x1x4xbf16>,
    %16 = arith.truncf %9 : vector<2x8x8x4xf32> to vector<2x8x8x4xbf16>
    %c0_18 = arith.constant 0 : index
    %c1_19 = arith.constant 1 : index
    %c1_20 = arith.constant 1 : index
    %c0_21 = arith.constant 0 : index
    %17 = vector.load %arg8[%c0_18, %c1_19, %c1_20, %c0_21] : memref<2x10x10x4xbf16, #tpu.memory_space<vmem>>, vector<2x8x8x4xbf16>
    tpu.vector_store %arg8[%c0_18, %c1_19, %c1_20, %c0_21], %16 {strides = array<i32>} : memref<2x10x10x4xbf16, #tpu.memory_space<vmem>>, vector<2x8x8x4xbf16>,
    %c0_22 = arith.constant 0 : index
    %c0_23 = arith.constant 0 : index
    %c0_24 = arith.constant 0 : index
    %c0_25 = arith.constant 0 : index
    %18 = vector.load %arg8[%c0_22, %c0_23, %c0_24, %c0_25] : memref<2x10x10x4xbf16, #tpu.memory_space<vmem>>, vector<2x8x8x4xbf16>
    %19 = vector.shape_cast %18 : vector<2x8x8x4xbf16> to vector<128x4xbf16>
    %c0_26 = arith.constant 0 : index
    %c0_27 = arith.constant 0 : index
    %c0_28 = arith.constant 0 : index
    %20 = vector.load %arg1[%c0_26, %c0_27, %c0_28] : memref<9x4x8xbf16, #tpu.memory_space<vmem>>, vector<1x4x8xbf16>
    %21 = vector.shape_cast %20 : vector<1x4x8xbf16> to vector<4x8xbf16>
    %cst_29 = arith.constant dense<0.000000e+00> : vector<128x8xf32>
    %22 = tpu.matmul %19, %21, %cst_29 {dimension_numbers = #tpu.dot_dimension_numbers<[1], [0], [0], [1], [0, 0, 1, 1], [], []>} : vector<128x4xbf16>, vector<4x8xbf16>, vector<128x8xf32> -> vector<128x8xf32>
    %c0_30 = arith.constant 0 : index
    %c0_31 = arith.constant 0 : index
    %c1_32 = arith.constant 1 : index
    %c0_33 = arith.constant 0 : index
    %23 = vector.load %arg8[%c0_30, %c0_31, %c1_32, %c0_33] : memref<2x10x10x4xbf16, #tpu.memory_space<vmem>>, vector<2x8x8x4xbf16>
    %24 = vector.shape_cast %23 : vector<2x8x8x4xbf16> to vector<128x4xbf16>
    %c1_34 = arith.constant 1 : index
    %c0_35 = arith.constant 0 : index
    %c0_36 = arith.constant 0 : index
    %25 = vector.load %arg1[%c1_34, %c0_35, %c0_36] : memref<9x4x8xbf16, #tpu.memory_space<vmem>>, vector<1x4x8xbf16>
    %26 = vector.shape_cast %25 : vector<1x4x8xbf16> to vector<4x8xbf16>
    %cst_37 = arith.constant dense<0.000000e+00> : vector<128x8xf32>
    %27 = tpu.matmul %24, %26, %cst_37 {dimension_numbers = #tpu.dot_dimension_numbers<[1], [0], [0], [1], [0, 0, 1, 1], [], []>} : vector<128x4xbf16>, vector<4x8xbf16>, vector<128x8xf32> -> vector<128x8xf32>
    %28 = arith.addf %22, %27 : vector<128x8xf32>
    %c0_38 = arith.constant 0 : index
    %c0_39 = arith.constant 0 : index
    %c2 = arith.constant 2 : index
    %c0_40 = arith.constant 0 : index
    %29 = vector.load %arg8[%c0_38, %c0_39, %c2, %c0_40] : memref<2x10x10x4xbf16, #tpu.memory_space<vmem>>, vector<2x8x8x4xbf16>
    %30 = vector.shape_cast %29 : vector<2x8x8x4xbf16> to vector<128x4xbf16>
    %c2_41 = arith.constant 2 : index
    %c0_42 = arith.constant 0 : index
    %c0_43 = arith.constant 0 : index
    %31 = vector.load %arg1[%c2_41, %c0_42, %c0_43] : memref<9x4x8xbf16, #tpu.memory_space<vmem>>, vector<1x4x8xbf16>
    %32 = vector.shape_cast %31 : vector<1x4x8xbf16> to vector<4x8xbf16>
    %cst_44 = arith.constant dense<0.000000e+00> : vector<128x8xf32>
    %33 = tpu.matmul %30, %32, %cst_44 {dimension_numbers = #tpu.dot_dimension_numbers<[1], [0], [0], [1], [0, 0, 1, 1], [], []>} : vector<128x4xbf16>, vector<4x8xbf16>, vector<128x8xf32> -> vector<128x8xf32>
    %34 = arith.addf %28, %33 : vector<128x8xf32>
    %c0_45 = arith.constant 0 : index
    %c1_46 = arith.constant 1 : index
    %c0_47 = arith.constant 0 : index
    %c0_48 = arith.constant 0 : index
    %35 = vector.load %arg8[%c0_45, %c1_46, %c0_47, %c0_48] : memref<2x10x10x4xbf16, #tpu.memory_space<vmem>>, vector<2x8x8x4xbf16>
    %36 = vector.shape_cast %35 : vector<2x8x8x4xbf16> to vector<128x4xbf16>
    %c3 = arith.constant 3 : index
    %c0_49 = arith.constant 0 : index
    %c0_50 = arith.constant 0 : index
    %37 = vector.load %arg1[%c3, %c0_49, %c0_50] : memref<9x4x8xbf16, #tpu.memory_space<vmem>>, vector<1x4x8xbf16>
    %38 = vector.shape_cast %37 : vector<1x4x8xbf16> to vector<4x8xbf16>
    %cst_51 = arith.constant dense<0.000000e+00> : vector<128x8xf32>
    %39 = tpu.matmul %36, %38, %cst_51 {dimension_numbers = #tpu.dot_dimension_numbers<[1], [0], [0], [1], [0, 0, 1, 1], [], []>} : vector<128x4xbf16>, vector<4x8xbf16>, vector<128x8xf32> -> vector<128x8xf32>
    %40 = arith.addf %34, %39 : vector<128x8xf32>
    %c0_52 = arith.constant 0 : index
    %c1_53 = arith.constant 1 : index
    %c1_54 = arith.constant 1 : index
    %c0_55 = arith.constant 0 : index
    %41 = vector.load %arg8[%c0_52, %c1_53, %c1_54, %c0_55] : memref<2x10x10x4xbf16, #tpu.memory_space<vmem>>, vector<2x8x8x4xbf16>
    %42 = vector.shape_cast %41 : vector<2x8x8x4xbf16> to vector<128x4xbf16>
    %c4 = arith.constant 4 : index
    %c0_56 = arith.constant 0 : index
    %c0_57 = arith.constant 0 : index
    %43 = vector.load %arg1[%c4, %c0_56, %c0_57] : memref<9x4x8xbf16, #tpu.memory_space<vmem>>, vector<1x4x8xbf16>
    %44 = vector.shape_cast %43 : vector<1x4x8xbf16> to vector<4x8xbf16>
    %cst_58 = arith.constant dense<0.000000e+00> : vector<128x8xf32>
    %45 = tpu.matmul %42, %44, %cst_58 {dimension_numbers = #tpu.dot_dimension_numbers<[1], [0], [0], [1], [0, 0, 1, 1], [], []>} : vector<128x4xbf16>, vector<4x8xbf16>, vector<128x8xf32> -> vector<128x8xf32>
    %46 = arith.addf %40, %45 : vector<128x8xf32>
    %c0_59 = arith.constant 0 : index
    %c1_60 = arith.constant 1 : index
    %c2_61 = arith.constant 2 : index
    %c0_62 = arith.constant 0 : index
    %47 = vector.load %arg8[%c0_59, %c1_60, %c2_61, %c0_62] : memref<2x10x10x4xbf16, #tpu.memory_space<vmem>>, vector<2x8x8x4xbf16>
    %48 = vector.shape_cast %47 : vector<2x8x8x4xbf16> to vector<128x4xbf16>
    %c5 = arith.constant 5 : index
    %c0_63 = arith.constant 0 : index
    %c0_64 = arith.constant 0 : index
    %49 = vector.load %arg1[%c5, %c0_63, %c0_64] : memref<9x4x8xbf16, #tpu.memory_space<vmem>>, vector<1x4x8xbf16>
    %50 = vector.shape_cast %49 : vector<1x4x8xbf16> to vector<4x8xbf16>
    %cst_65 = arith.constant dense<0.000000e+00> : vector<128x8xf32>
    %51 = tpu.matmul %48, %50, %cst_65 {dimension_numbers = #tpu.dot_dimension_numbers<[1], [0], [0], [1], [0, 0, 1, 1], [], []>} : vector<128x4xbf16>, vector<4x8xbf16>, vector<128x8xf32> -> vector<128x8xf32>
    %52 = arith.addf %46, %51 : vector<128x8xf32>
    %c0_66 = arith.constant 0 : index
    %c2_67 = arith.constant 2 : index
    %c0_68 = arith.constant 0 : index
    %c0_69 = arith.constant 0 : index
    %53 = vector.load %arg8[%c0_66, %c2_67, %c0_68, %c0_69] : memref<2x10x10x4xbf16, #tpu.memory_space<vmem>>, vector<2x8x8x4xbf16>
    %54 = vector.shape_cast %53 : vector<2x8x8x4xbf16> to vector<128x4xbf16>
    %c6 = arith.constant 6 : index
    %c0_70 = arith.constant 0 : index
    %c0_71 = arith.constant 0 : index
    %55 = vector.load %arg1[%c6, %c0_70, %c0_71] : memref<9x4x8xbf16, #tpu.memory_space<vmem>>, vector<1x4x8xbf16>
    %56 = vector.shape_cast %55 : vector<1x4x8xbf16> to vector<4x8xbf16>
    %cst_72 = arith.constant dense<0.000000e+00> : vector<128x8xf32>
    %57 = tpu.matmul %54, %56, %cst_72 {dimension_numbers = #tpu.dot_dimension_numbers<[1], [0], [0], [1], [0, 0, 1, 1], [], []>} : vector<128x4xbf16>, vector<4x8xbf16>, vector<128x8xf32> -> vector<128x8xf32>
    %58 = arith.addf %52, %57 : vector<128x8xf32>
    %c0_73 = arith.constant 0 : index
    %c2_74 = arith.constant 2 : index
    %c1_75 = arith.constant 1 : index
    %c0_76 = arith.constant 0 : index
    %59 = vector.load %arg8[%c0_73, %c2_74, %c1_75, %c0_76] : memref<2x10x10x4xbf16, #tpu.memory_space<vmem>>, vector<2x8x8x4xbf16>
    %60 = vector.shape_cast %59 : vector<2x8x8x4xbf16> to vector<128x4xbf16>
    %c7 = arith.constant 7 : index
    %c0_77 = arith.constant 0 : index
    %c0_78 = arith.constant 0 : index
    %61 = vector.load %arg1[%c7, %c0_77, %c0_78] : memref<9x4x8xbf16, #tpu.memory_space<vmem>>, vector<1x4x8xbf16>
    %62 = vector.shape_cast %61 : vector<1x4x8xbf16> to vector<4x8xbf16>
    %cst_79 = arith.constant dense<0.000000e+00> : vector<128x8xf32>
    %63 = tpu.matmul %60, %62, %cst_79 {dimension_numbers = #tpu.dot_dimension_numbers<[1], [0], [0], [1], [0, 0, 1, 1], [], []>} : vector<128x4xbf16>, vector<4x8xbf16>, vector<128x8xf32> -> vector<128x8xf32>
    %64 = arith.addf %58, %63 : vector<128x8xf32>
    %c0_80 = arith.constant 0 : index
    %c2_81 = arith.constant 2 : index
    %c2_82 = arith.constant 2 : index
    %c0_83 = arith.constant 0 : index
    %65 = vector.load %arg8[%c0_80, %c2_81, %c2_82, %c0_83] : memref<2x10x10x4xbf16, #tpu.memory_space<vmem>>, vector<2x8x8x4xbf16>
    %66 = vector.shape_cast %65 : vector<2x8x8x4xbf16> to vector<128x4xbf16>
    %c8 = arith.constant 8 : index
    %c0_84 = arith.constant 0 : index
    %c0_85 = arith.constant 0 : index
    %67 = vector.load %arg1[%c8, %c0_84, %c0_85] : memref<9x4x8xbf16, #tpu.memory_space<vmem>>, vector<1x4x8xbf16>
    %68 = vector.shape_cast %67 : vector<1x4x8xbf16> to vector<4x8xbf16>
    %cst_86 = arith.constant dense<0.000000e+00> : vector<128x8xf32>
    %69 = tpu.matmul %66, %68, %cst_86 {dimension_numbers = #tpu.dot_dimension_numbers<[1], [0], [0], [1], [0, 0, 1, 1], [], []>} : vector<128x4xbf16>, vector<4x8xbf16>, vector<128x8xf32> -> vector<128x8xf32>
    %70 = arith.addf %64, %69 : vector<128x8xf32>
    %cst_87 = arith.constant dense<0.000000e+00> : vector<8xf32>
    %71 = vector.multi_reduction <add>, %70, %cst_87 [0] : vector<128x8xf32> to vector<8xf32>
    %72 = vector.shape_cast %71 : vector<8xf32> to vector<1x8xf32>
    %cst_88 = arith.constant 1.280000e+02 : f32
    %73 = vector.broadcast %cst_88 : f32 to vector<1x8xf32>
    %74 = arith.divf %72, %73 : vector<1x8xf32>
    %75 = vector.broadcast %74 : vector<1x8xf32> to vector<128x8xf32>
    %76 = arith.subf %70, %75 : vector<128x8xf32>
    %77 = arith.mulf %76, %76 : vector<128x8xf32>
    %cst_89 = arith.constant dense<0.000000e+00> : vector<8xf32>
    %78 = vector.multi_reduction <add>, %77, %cst_89 [0] : vector<128x8xf32> to vector<8xf32>
    %79 = vector.shape_cast %78 : vector<8xf32> to vector<1x8xf32>
    %cst_90 = arith.constant 1.280000e+02 : f32
    %80 = vector.broadcast %cst_90 : f32 to vector<1x8xf32>
    %81 = arith.divf %79, %80 : vector<1x8xf32>
    %cst_91 = arith.constant 9.99999974E-6 : f32
    %82 = vector.broadcast %cst_91 : f32 to vector<1x8xf32>
    %83 = arith.addf %81, %82 : vector<1x8xf32>
    %84 = math.rsqrt %83 : vector<1x8xf32>
    %c0_92 = arith.constant 0 : index
    %c0_93 = arith.constant 0 : index
    %85 = vector.load %arg2[%c0_92, %c0_93] : memref<1x8xf32, #tpu.memory_space<vmem>>, vector<1x8xf32>
    %86 = arith.mulf %84, %85 : vector<1x8xf32>
    %87 = vector.broadcast %86 : vector<1x8xf32> to vector<128x8xf32>
    %88 = arith.mulf %76, %87 : vector<128x8xf32>
    %c0_94 = arith.constant 0 : index
    %c0_95 = arith.constant 0 : index
    %89 = vector.load %arg3[%c0_94, %c0_95] : memref<1x8xf32, #tpu.memory_space<vmem>>, vector<1x8xf32>
    %90 = vector.broadcast %89 : vector<1x8xf32> to vector<128x8xf32>
    %91 = arith.addf %88, %90 : vector<128x8xf32>
    %cst_96 = arith.constant 0.000000e+00 : f32
    %92 = vector.broadcast %cst_96 : f32 to vector<128x8xf32>
    %93 = arith.maximumf %91, %92 : vector<128x8xf32>
    %94 = vector.shape_cast %93 : vector<128x8xf32> to vector<2x8x8x8xf32>
    %cst_97 = arith.constant 0.000000e+00 : bf16
    %95 = vector.broadcast %cst_97 : bf16 to vector<2x1x10x8xbf16>
    %cst_98 = arith.constant 0.000000e+00 : bf16
    %96 = vector.broadcast %cst_98 : bf16 to vector<2x8x1x8xbf16>
    %c0_99 = arith.constant 0 : index
    %c0_100 = arith.constant 0 : index
    %c0_101 = arith.constant 0 : index
    %c0_102 = arith.constant 0 : index
    %97 = vector.load %arg9[%c0_99, %c0_100, %c0_101, %c0_102] : memref<2x10x10x8xbf16, #tpu.memory_space<vmem>>, vector<2x1x10x8xbf16>
    tpu.vector_store %arg9[%c0_99, %c0_100, %c0_101, %c0_102], %95 {strides = array<i32>} : memref<2x10x10x8xbf16, #tpu.memory_space<vmem>>, vector<2x1x10x8xbf16>,
    %c0_103 = arith.constant 0 : index
    %c9_104 = arith.constant 9 : index
    %c0_105 = arith.constant 0 : index
    %c0_106 = arith.constant 0 : index
    %98 = vector.load %arg9[%c0_103, %c9_104, %c0_105, %c0_106] : memref<2x10x10x8xbf16, #tpu.memory_space<vmem>>, vector<2x1x10x8xbf16>
    tpu.vector_store %arg9[%c0_103, %c9_104, %c0_105, %c0_106], %95 {strides = array<i32>} : memref<2x10x10x8xbf16, #tpu.memory_space<vmem>>, vector<2x1x10x8xbf16>,
    %c0_107 = arith.constant 0 : index
    %c1_108 = arith.constant 1 : index
    %c0_109 = arith.constant 0 : index
    %c0_110 = arith.constant 0 : index
    %99 = vector.load %arg9[%c0_107, %c1_108, %c0_109, %c0_110] : memref<2x10x10x8xbf16, #tpu.memory_space<vmem>>, vector<2x8x1x8xbf16>
    tpu.vector_store %arg9[%c0_107, %c1_108, %c0_109, %c0_110], %96 {strides = array<i32>} : memref<2x10x10x8xbf16, #tpu.memory_space<vmem>>, vector<2x8x1x8xbf16>,
    %c0_111 = arith.constant 0 : index
    %c1_112 = arith.constant 1 : index
    %c9_113 = arith.constant 9 : index
    %c0_114 = arith.constant 0 : index
    %100 = vector.load %arg9[%c0_111, %c1_112, %c9_113, %c0_114] : memref<2x10x10x8xbf16, #tpu.memory_space<vmem>>, vector<2x8x1x8xbf16>
    tpu.vector_store %arg9[%c0_111, %c1_112, %c9_113, %c0_114], %96 {strides = array<i32>} : memref<2x10x10x8xbf16, #tpu.memory_space<vmem>>, vector<2x8x1x8xbf16>,
    %101 = arith.truncf %94 : vector<2x8x8x8xf32> to vector<2x8x8x8xbf16>
    %c0_115 = arith.constant 0 : index
    %c1_116 = arith.constant 1 : index
    %c1_117 = arith.constant 1 : index
    %c0_118 = arith.constant 0 : index
    %102 = vector.load %arg9[%c0_115, %c1_116, %c1_117, %c0_118] : memref<2x10x10x8xbf16, #tpu.memory_space<vmem>>, vector<2x8x8x8xbf16>
    tpu.vector_store %arg9[%c0_115, %c1_116, %c1_117, %c0_118], %101 {strides = array<i32>} : memref<2x10x10x8xbf16, #tpu.memory_space<vmem>>, vector<2x8x8x8xbf16>,
    %c0_119 = arith.constant 0 : index
    %c0_120 = arith.constant 0 : index
    %c0_121 = arith.constant 0 : index
    %c0_122 = arith.constant 0 : index
    %103 = vector.load %arg9[%c0_119, %c0_120, %c0_121, %c0_122] : memref<2x10x10x8xbf16, #tpu.memory_space<vmem>>, vector<2x8x8x8xbf16>
    %104 = vector.shape_cast %103 : vector<2x8x8x8xbf16> to vector<128x8xbf16>
    %c0_123 = arith.constant 0 : index
    %c0_124 = arith.constant 0 : index
    %c0_125 = arith.constant 0 : index
    %105 = vector.load %arg4[%c0_123, %c0_124, %c0_125] : memref<9x8x8xbf16, #tpu.memory_space<vmem>>, vector<1x8x8xbf16>
    %106 = vector.shape_cast %105 : vector<1x8x8xbf16> to vector<8x8xbf16>
    %cst_126 = arith.constant dense<0.000000e+00> : vector<128x8xf32>
    %107 = tpu.matmul %104, %106, %cst_126 {dimension_numbers = #tpu.dot_dimension_numbers<[1], [0], [0], [1], [0, 0, 1, 1], [], []>} : vector<128x8xbf16>, vector<8x8xbf16>, vector<128x8xf32> -> vector<128x8xf32>
    %c0_127 = arith.constant 0 : index
    %c0_128 = arith.constant 0 : index
    %c1_129 = arith.constant 1 : index
    %c0_130 = arith.constant 0 : index
    %108 = vector.load %arg9[%c0_127, %c0_128, %c1_129, %c0_130] : memref<2x10x10x8xbf16, #tpu.memory_space<vmem>>, vector<2x8x8x8xbf16>
    %109 = vector.shape_cast %108 : vector<2x8x8x8xbf16> to vector<128x8xbf16>
    %c1_131 = arith.constant 1 : index
    %c0_132 = arith.constant 0 : index
    %c0_133 = arith.constant 0 : index
    %110 = vector.load %arg4[%c1_131, %c0_132, %c0_133] : memref<9x8x8xbf16, #tpu.memory_space<vmem>>, vector<1x8x8xbf16>
    %111 = vector.shape_cast %110 : vector<1x8x8xbf16> to vector<8x8xbf16>
    %cst_134 = arith.constant dense<0.000000e+00> : vector<128x8xf32>
    %112 = tpu.matmul %109, %111, %cst_134 {dimension_numbers = #tpu.dot_dimension_numbers<[1], [0], [0], [1], [0, 0, 1, 1], [], []>} : vector<128x8xbf16>, vector<8x8xbf16>, vector<128x8xf32> -> vector<128x8xf32>
    %113 = arith.addf %107, %112 : vector<128x8xf32>
    %c0_135 = arith.constant 0 : index
    %c0_136 = arith.constant 0 : index
    %c2_137 = arith.constant 2 : index
    %c0_138 = arith.constant 0 : index
    %114 = vector.load %arg9[%c0_135, %c0_136, %c2_137, %c0_138] : memref<2x10x10x8xbf16, #tpu.memory_space<vmem>>, vector<2x8x8x8xbf16>
    %115 = vector.shape_cast %114 : vector<2x8x8x8xbf16> to vector<128x8xbf16>
    %c2_139 = arith.constant 2 : index
    %c0_140 = arith.constant 0 : index
    %c0_141 = arith.constant 0 : index
    %116 = vector.load %arg4[%c2_139, %c0_140, %c0_141] : memref<9x8x8xbf16, #tpu.memory_space<vmem>>, vector<1x8x8xbf16>
    %117 = vector.shape_cast %116 : vector<1x8x8xbf16> to vector<8x8xbf16>
    %cst_142 = arith.constant dense<0.000000e+00> : vector<128x8xf32>
    %118 = tpu.matmul %115, %117, %cst_142 {dimension_numbers = #tpu.dot_dimension_numbers<[1], [0], [0], [1], [0, 0, 1, 1], [], []>} : vector<128x8xbf16>, vector<8x8xbf16>, vector<128x8xf32> -> vector<128x8xf32>
    %119 = arith.addf %113, %118 : vector<128x8xf32>
    %c0_143 = arith.constant 0 : index
    %c1_144 = arith.constant 1 : index
    %c0_145 = arith.constant 0 : index
    %c0_146 = arith.constant 0 : index
    %120 = vector.load %arg9[%c0_143, %c1_144, %c0_145, %c0_146] : memref<2x10x10x8xbf16, #tpu.memory_space<vmem>>, vector<2x8x8x8xbf16>
    %121 = vector.shape_cast %120 : vector<2x8x8x8xbf16> to vector<128x8xbf16>
    %c3_147 = arith.constant 3 : index
    %c0_148 = arith.constant 0 : index
    %c0_149 = arith.constant 0 : index
    %122 = vector.load %arg4[%c3_147, %c0_148, %c0_149] : memref<9x8x8xbf16, #tpu.memory_space<vmem>>, vector<1x8x8xbf16>
    %123 = vector.shape_cast %122 : vector<1x8x8xbf16> to vector<8x8xbf16>
    %cst_150 = arith.constant dense<0.000000e+00> : vector<128x8xf32>
    %124 = tpu.matmul %121, %123, %cst_150 {dimension_numbers = #tpu.dot_dimension_numbers<[1], [0], [0], [1], [0, 0, 1, 1], [], []>} : vector<128x8xbf16>, vector<8x8xbf16>, vector<128x8xf32> -> vector<128x8xf32>
    %125 = arith.addf %119, %124 : vector<128x8xf32>
    %c0_151 = arith.constant 0 : index
    %c1_152 = arith.constant 1 : index
    %c1_153 = arith.constant 1 : index
    %c0_154 = arith.constant 0 : index
    %126 = vector.load %arg9[%c0_151, %c1_152, %c1_153, %c0_154] : memref<2x10x10x8xbf16, #tpu.memory_space<vmem>>, vector<2x8x8x8xbf16>
    %127 = vector.shape_cast %126 : vector<2x8x8x8xbf16> to vector<128x8xbf16>
    %c4_155 = arith.constant 4 : index
    %c0_156 = arith.constant 0 : index
    %c0_157 = arith.constant 0 : index
    %128 = vector.load %arg4[%c4_155, %c0_156, %c0_157] : memref<9x8x8xbf16, #tpu.memory_space<vmem>>, vector<1x8x8xbf16>
    %129 = vector.shape_cast %128 : vector<1x8x8xbf16> to vector<8x8xbf16>
    %cst_158 = arith.constant dense<0.000000e+00> : vector<128x8xf32>
    %130 = tpu.matmul %127, %129, %cst_158 {dimension_numbers = #tpu.dot_dimension_numbers<[1], [0], [0], [1], [0, 0, 1, 1], [], []>} : vector<128x8xbf16>, vector<8x8xbf16>, vector<128x8xf32> -> vector<128x8xf32>
    %131 = arith.addf %125, %130 : vector<128x8xf32>
    %c0_159 = arith.constant 0 : index
    %c1_160 = arith.constant 1 : index
    %c2_161 = arith.constant 2 : index
    %c0_162 = arith.constant 0 : index
    %132 = vector.load %arg9[%c0_159, %c1_160, %c2_161, %c0_162] : memref<2x10x10x8xbf16, #tpu.memory_space<vmem>>, vector<2x8x8x8xbf16>
    %133 = vector.shape_cast %132 : vector<2x8x8x8xbf16> to vector<128x8xbf16>
    %c5_163 = arith.constant 5 : index
    %c0_164 = arith.constant 0 : index
    %c0_165 = arith.constant 0 : index
    %134 = vector.load %arg4[%c5_163, %c0_164, %c0_165] : memref<9x8x8xbf16, #tpu.memory_space<vmem>>, vector<1x8x8xbf16>
    %135 = vector.shape_cast %134 : vector<1x8x8xbf16> to vector<8x8xbf16>
    %cst_166 = arith.constant dense<0.000000e+00> : vector<128x8xf32>
    %136 = tpu.matmul %133, %135, %cst_166 {dimension_numbers = #tpu.dot_dimension_numbers<[1], [0], [0], [1], [0, 0, 1, 1], [], []>} : vector<128x8xbf16>, vector<8x8xbf16>, vector<128x8xf32> -> vector<128x8xf32>
    %137 = arith.addf %131, %136 : vector<128x8xf32>
    %c0_167 = arith.constant 0 : index
    %c2_168 = arith.constant 2 : index
    %c0_169 = arith.constant 0 : index
    %c0_170 = arith.constant 0 : index
    %138 = vector.load %arg9[%c0_167, %c2_168, %c0_169, %c0_170] : memref<2x10x10x8xbf16, #tpu.memory_space<vmem>>, vector<2x8x8x8xbf16>
    %139 = vector.shape_cast %138 : vector<2x8x8x8xbf16> to vector<128x8xbf16>
    %c6_171 = arith.constant 6 : index
    %c0_172 = arith.constant 0 : index
    %c0_173 = arith.constant 0 : index
    %140 = vector.load %arg4[%c6_171, %c0_172, %c0_173] : memref<9x8x8xbf16, #tpu.memory_space<vmem>>, vector<1x8x8xbf16>
    %141 = vector.shape_cast %140 : vector<1x8x8xbf16> to vector<8x8xbf16>
    %cst_174 = arith.constant dense<0.000000e+00> : vector<128x8xf32>
    %142 = tpu.matmul %139, %141, %cst_174 {dimension_numbers = #tpu.dot_dimension_numbers<[1], [0], [0], [1], [0, 0, 1, 1], [], []>} : vector<128x8xbf16>, vector<8x8xbf16>, vector<128x8xf32> -> vector<128x8xf32>
    %143 = arith.addf %137, %142 : vector<128x8xf32>
    %c0_175 = arith.constant 0 : index
    %c2_176 = arith.constant 2 : index
    %c1_177 = arith.constant 1 : index
    %c0_178 = arith.constant 0 : index
    %144 = vector.load %arg9[%c0_175, %c2_176, %c1_177, %c0_178] : memref<2x10x10x8xbf16, #tpu.memory_space<vmem>>, vector<2x8x8x8xbf16>
    %145 = vector.shape_cast %144 : vector<2x8x8x8xbf16> to vector<128x8xbf16>
    %c7_179 = arith.constant 7 : index
    %c0_180 = arith.constant 0 : index
    %c0_181 = arith.constant 0 : index
    %146 = vector.load %arg4[%c7_179, %c0_180, %c0_181] : memref<9x8x8xbf16, #tpu.memory_space<vmem>>, vector<1x8x8xbf16>
    %147 = vector.shape_cast %146 : vector<1x8x8xbf16> to vector<8x8xbf16>
    %cst_182 = arith.constant dense<0.000000e+00> : vector<128x8xf32>
    %148 = tpu.matmul %145, %147, %cst_182 {dimension_numbers = #tpu.dot_dimension_numbers<[1], [0], [0], [1], [0, 0, 1, 1], [], []>} : vector<128x8xbf16>, vector<8x8xbf16>, vector<128x8xf32> -> vector<128x8xf32>
    %149 = arith.addf %143, %148 : vector<128x8xf32>
    %c0_183 = arith.constant 0 : index
    %c2_184 = arith.constant 2 : index
    %c2_185 = arith.constant 2 : index
    %c0_186 = arith.constant 0 : index
    %150 = vector.load %arg9[%c0_183, %c2_184, %c2_185, %c0_186] : memref<2x10x10x8xbf16, #tpu.memory_space<vmem>>, vector<2x8x8x8xbf16>
    %151 = vector.shape_cast %150 : vector<2x8x8x8xbf16> to vector<128x8xbf16>
    %c8_187 = arith.constant 8 : index
    %c0_188 = arith.constant 0 : index
    %c0_189 = arith.constant 0 : index
    %152 = vector.load %arg4[%c8_187, %c0_188, %c0_189] : memref<9x8x8xbf16, #tpu.memory_space<vmem>>, vector<1x8x8xbf16>
    %153 = vector.shape_cast %152 : vector<1x8x8xbf16> to vector<8x8xbf16>
    %cst_190 = arith.constant dense<0.000000e+00> : vector<128x8xf32>
    %154 = tpu.matmul %151, %153, %cst_190 {dimension_numbers = #tpu.dot_dimension_numbers<[1], [0], [0], [1], [0, 0, 1, 1], [], []>} : vector<128x8xbf16>, vector<8x8xbf16>, vector<128x8xf32> -> vector<128x8xf32>
    %155 = arith.addf %149, %154 : vector<128x8xf32>
    %cst_191 = arith.constant dense<0.000000e+00> : vector<8xf32>
    %156 = vector.multi_reduction <add>, %155, %cst_191 [0] : vector<128x8xf32> to vector<8xf32>
    %157 = vector.shape_cast %156 : vector<8xf32> to vector<1x8xf32>
    %cst_192 = arith.constant 1.280000e+02 : f32
    %158 = vector.broadcast %cst_192 : f32 to vector<1x8xf32>
    %159 = arith.divf %157, %158 : vector<1x8xf32>
    %160 = vector.broadcast %159 : vector<1x8xf32> to vector<128x8xf32>
    %161 = arith.subf %155, %160 : vector<128x8xf32>
    %162 = arith.mulf %161, %161 : vector<128x8xf32>
    %cst_193 = arith.constant dense<0.000000e+00> : vector<8xf32>
    %163 = vector.multi_reduction <add>, %162, %cst_193 [0] : vector<128x8xf32> to vector<8xf32>
    %164 = vector.shape_cast %163 : vector<8xf32> to vector<1x8xf32>
    %cst_194 = arith.constant 1.280000e+02 : f32
    %165 = vector.broadcast %cst_194 : f32 to vector<1x8xf32>
    %166 = arith.divf %164, %165 : vector<1x8xf32>
    %cst_195 = arith.constant 9.99999974E-6 : f32
    %167 = vector.broadcast %cst_195 : f32 to vector<1x8xf32>
    %168 = arith.addf %166, %167 : vector<1x8xf32>
    %169 = math.rsqrt %168 : vector<1x8xf32>
    %c0_196 = arith.constant 0 : index
    %c0_197 = arith.constant 0 : index
    %170 = vector.load %arg5[%c0_196, %c0_197] : memref<1x8xf32, #tpu.memory_space<vmem>>, vector<1x8xf32>
    %171 = arith.mulf %169, %170 : vector<1x8xf32>
    %172 = vector.broadcast %171 : vector<1x8xf32> to vector<128x8xf32>
    %173 = arith.mulf %161, %172 : vector<128x8xf32>
    %c0_198 = arith.constant 0 : index
    %c0_199 = arith.constant 0 : index
    %174 = vector.load %arg6[%c0_198, %c0_199] : memref<1x8xf32, #tpu.memory_space<vmem>>, vector<1x8xf32>
    %175 = vector.broadcast %174 : vector<1x8xf32> to vector<128x8xf32>
    %176 = arith.addf %173, %175 : vector<128x8xf32>
    %cst_200 = arith.constant 0.000000e+00 : f32
    %177 = vector.broadcast %cst_200 : f32 to vector<128x8xf32>
    %178 = arith.maximumf %176, %177 : vector<128x8xf32>
    %179 = vector.shape_cast %178 : vector<128x8xf32> to vector<2x8x8x8xf32>
    %c0_201 = arith.constant 0 : index
    %c0_202 = arith.constant 0 : index
    %c0_203 = arith.constant 0 : index
    %c0_204 = arith.constant 0 : index
    %180 = vector.load %arg7[%c0_201, %c0_202, %c0_203, %c0_204] : memref<2x8x8x8xf32, #tpu.memory_space<vmem>>, vector<2x8x8x8xf32>
    tpu.vector_store %arg7[%c0_201, %c0_202, %c0_203, %c0_204], %179 {strides = array<i32>} : memref<2x8x8x8xf32, #tpu.memory_space<vmem>>, vector<2x8x8x8xf32>,
    return
  }
}

</mosaic_0001>

<bundles_post_ra>
// kernel: tpu_custom_call.1
= control target key start
LH: loop header
LB: loop body
LE: loop exit
PB: predicated region body
PF: predicated region fallthrough
CT: control target
= control target key end

     0   :  { %s7910_s17 = smov 124   ;;  %vm238_vm0 = vcmask 24576   ;;  %vm249_vm1 = vsmask.f32 256  ;;  %vm299_vm2 = vsmask.f32 7938  ;;  %s11051_s0 = inlined_call_operand.vmem [shape: f32[2,16,8,8], index: 0, kind: input, shape index: {}]   ;;  %s11052_s1 = inlined_call_operand.vmem [shape: bf16[9,4,8], index: 1, kind: input, shape index: {}]   ;;  %s11053_s2 = inlined_call_operand.vmem [shape: f32[1,8], index: 2, kind: input, shape index: {}]   ;;  %s11054_s3 = inlined_call_operand.vmem [shape: f32[1,8], index: 3, kind: input, shape index: {}]   ;;  %s11055_s4 = inlined_call_operand.vmem [shape: bf16[9,8,8], index: 4, kind: input, shape index: {}]   ;;  %s11056_s5 = inlined_call_operand.vmem [shape: f32[1,8], index: 5, kind: input, shape index: {}]   ;;  %s11057_s6 = inlined_call_operand.vmem [shape: f32[1,8], index: 6, kind: input, shape index: {}]   ;;  %s11058_s7 = inlined_call_operand.hbm [shape: f32[2,8,8,8], index: 7, kind: output, shape index: {}]  }
   0x1   :  { %v7958_v0 = vld [vmem:[%s11051_s0 + $0x20] sm:$0xff]  ;;  %v7963_v1 = vld [vmem:[%s11051_s0 + $0x28] sm:$0xff]  ;;  %v7980_v5 = vld [vmem:[%s11051_s0 + $0x30] sm:$0xff]  ;;  %vm236_vm5 = vcmask 27648   ;;  %vm3500_vm6 = vcmask 57344   ;;  %vm982_vm7 = vcmask 1041408  }
   0x2   :  { %v7968_v2 = vld [vmem:[%s11051_s0] sm:$0xff]  ;;  %v7766_v3 = vpack.i.bf16 %v7963_v1, %v7958_v0  ;;  %v7975_v4 = vld [vmem:[%s11051_s0 + $0x8] sm:$0xff]  ;;  %v7985_v6 = vld [vmem:[%s11051_s0 + $0x38] sm:$0xff] }
   0x3   :  { %v7756_v7 = vpack.i.bf16 %v7975_v4, %v7968_v2  ;;  %v7992_v8 = vld [vmem:[%s11051_s0 + $0x10] sm:$0xff]  ;;  %v7997_v9 = vld [vmem:[%s11051_s0 + $0x18] sm:$0xff]  ;;  %v7771_v10 = vpack.i.bf16 %v7985_v6, %v7980_v5  ;;  %v8018_v14 = vld [vmem:[%s11051_s0 + $0x40] sm:$0xff] }
   0x4   :  { %7767 = vrot.lane.b32.xlu1 %v7766_v3, %s7910_s17  ;;  %v7761_v11 = vpack.i.bf16 %v7997_v9, %v7992_v8  ;;  %v8008_v12 = vld [vmem:[%s11051_s0 + $0x50] sm:$0xff]  ;;  %v8013_v13 = vld [vmem:[%s11051_s0 + $0x58] sm:$0xff]  ;;  %v8023_v15 = vld [vmem:[%s11051_s0 + $0x48] sm:$0xff] }
   0x5   :  { %7757 = vrot.lane.b32.xlu0 %v7756_v7, %s7910_s17  ;;  %v7781_v16 = vpack.i.bf16 %v8013_v13, %v8008_v12  ;;  %v7776_v17 = vpack.i.bf16 %v8023_v15, %v8018_v14  ;;  %v8034_v18 = vld [vmem:[%s11051_s0 + $0x80] sm:$0xff]  ;;  %v8039_v19 = vld [vmem:[%s11051_s0 + $0x88] sm:$0xff]  ;;  %vm8063_vm3 = vmand %vm238_vm0, %vm249_vm1 }
   0x6   :  { %v8044_v20 = vld [vmem:[%s11051_s0 + $0x60] sm:$0xff]  ;;  %v8049_v21 = vld [vmem:[%s11051_s0 + $0x68] sm:$0xff]  ;;  %v7791_v25 = vpack.i.bf16 %v8039_v19, %v8034_v18  ;;  %v8073_v26 = vld [vmem:[%s11051_s0 + $0x90] sm:$0xff] }
   0x7   :  { %v8054_v22 = vld [vmem:[%s11051_s0 + $0xa0] sm:$0xff]  ;;  %v8059_v23 = vld [vmem:[%s11051_s0 + $0xa8] sm:$0xff]  ;;  %v8078_v27 = vld [vmem:[%s11051_s0 + $0x98] sm:$0xff]  ;;  %v7786_v31 = vpack.i.bf16 %v8049_v21, %v8044_v20 }
   0x8   :  { %7772 = vrot.lane.b32.xlu1 %v7771_v10, %s7910_s17  ;;  %v257_v28 = vld [vmem:[#allocation2 + $0x18] sm:$0x1]  ;;  %vm8082_vm4 = vmand %vm238_vm0, %vm299_vm2  ;;  %v307_v30 = vld [vmem:[#allocation2 + $0x1c] sm:$0x1]  ;;  %v7801_v46 = vpack.i.bf16 %v8059_v23, %v8054_v22  ;;  %v7796_v53 = vpack.i.bf16 %v8078_v27, %v8073_v26 }
   0x9   :  { %7762 = vrot.lane.b32.xlu0 %v7761_v11, %s7910_s17  ;;  %v258_v32 = vsel %vm8063_vm3, 0, %v257_v28  ;;  %v308_v33 = vsel %vm8082_vm4, 0, %v307_v30  ;;  %v251_v34 = vld [vmem:[#allocation2 + $0x8] sm:$0x1]  ;;  %v301_v35 = vld [vmem:[#allocation2 + $0xc] sm:$0x1] }
   0xa   :  { %259 = vst [vmem:[#allocation2 + $0x18] sm:$0x1] %v258_v32  ;;  %309 = vst [vmem:[#allocation2 + $0x1c] sm:$0x1] %v308_v33  ;;  %v252_v36 = vsel %vm8063_vm3, 0, %v251_v34  ;;  %v302_v37 = vsel %vm8082_vm4, 0, %v301_v35 }
   0xb   :  { %v260_v38 = vld [vmem:[#allocation2 + $0x20] sm:$0x1]  ;;  %v310_v39 = vld [vmem:[#allocation2 + $0x24] sm:$0x1]  ;;  %v8105_v41 = vld [vmem:[%s11051_s0 + $0xc8] sm:$0xff] }
   0xc   :  { %7782 = vrot.lane.b32.xlu1 %v7781_v16, %s7910_s17  ;;  %v8100_v40 = vld [vmem:[%s11051_s0 + $0xc0] sm:$0xff]  ;;  %253 = vst [vmem:[#allocation2 + $0x8] sm:$0x1] %v252_v36  ;;  %303 = vst [vmem:[#allocation2 + $0xc] sm:$0x1] %v302_v37  ;;  %v261_v42 = vsel %vm8063_vm3, 0, %v260_v38 }
   0xd   :  { %7777 = vrot.lane.b32.xlu0 %v7776_v17, %s7910_s17  ;;  %v311_v43 = vsel %vm8082_vm4, 0, %v310_v39  ;;  %v254_v44 = vld [vmem:[#allocation2 + $0x10] sm:$0x1]  ;;  %v304_v45 = vld [vmem:[#allocation2 + $0x14] sm:$0x1]  ;;  %v8122_v48 = vld [vmem:[%s11051_s0 + $0xb8] sm:$0xff]  ;;  %v7811_v10 = vpack.i.bf16 %v8105_v41, %v8100_v40 }
   0xe   :  { %v8117_v47 = vld [vmem:[%s11051_s0 + $0xb0] sm:$0xff]  ;;  %262 = vst [vmem:[#allocation2 + $0x20] sm:$0x1] %v261_v42  ;;  %312 = vst [vmem:[#allocation2 + $0x24] sm:$0x1] %v311_v43  ;;  %v255_v49 = vsel %vm8063_vm3, 0, %v254_v44 }
   0xf   :  { %v305_v50 = vsel %vm8082_vm4, 0, %v304_v45  ;;  %v266_v51 = vld [vmem:[#allocation2 + $0x30] sm:$0x1]  ;;  %v316_v52 = vld [vmem:[#allocation2 + $0x34] sm:$0x1]  ;;  %v7806_v28 = vpack.i.bf16 %v8122_v48, %v8117_v47  ;;  %v8156_v30 = vld [vmem:[%s11051_s0 + $0xe0] sm:$0xff] }
  0x10   :  { %7792 = vrot.lane.b32.xlu1 %v7791_v25, %s7910_s17  ;;  %256 = vst [vmem:[#allocation2 + $0x10] sm:$0x1] %v255_v49  ;;  %306 = vst [vmem:[#allocation2 + $0x14] sm:$0x1] %v305_v50  ;;  %v267_v54 = vsel %vm8063_vm3, 0, %v266_v51  ;;  %v317_v55 = vsel %vm8082_vm4, 0, %v316_v52 }
  0x11   :  { %7787 = vrot.lane.b32.xlu0 %v7786_v31, %s7910_s17  ;;  %v263_v56 = vld [vmem:[#allocation2 + $0x28] sm:$0x1]  ;;  %v313_v57 = vld [vmem:[#allocation2 + $0x2c] sm:$0x1]  ;;  %268 = vst [vmem:[#allocation2 + $0x30] sm:$0x1] %v267_v54 }
  0x12   :  { %318 = vst [vmem:[#allocation2 + $0x34] sm:$0x1] %v317_v55  ;;  %v264_v58 = vsel %vm8063_vm3, 0, %v263_v56  ;;  %v314_v59 = vsel %vm8082_vm4, 0, %v313_v57  ;;  %v275_v60 = vld [vmem:[#allocation2 + $0x58] sm:$0x1] }
  0x13   :  { %v325_v61 = vld [vmem:[#allocation2 + $0x5c] sm:$0x1]  ;;  %265 = vst [vmem:[#allocation2 + $0x28] sm:$0x1] %v264_v58  ;;  %315 = vst [vmem:[#allocation2 + $0x2c] sm:$0x1] %v314_v59 }
  0x14   :  { %v276_v62 = vsel %vm8063_vm3, 0, %v275_v60  ;;  %v326_v63 = vsel %vm8082_vm4, 0, %v325_v61  ;;  %v269_v3 = vld [vmem:[#allocation2 + $0x38] sm:$0x1]  ;;  %v319_v7 = vld [vmem:[#allocation2 + $0x3c] sm:$0x1]  ;;  %7802 = vrot.lane.b32.xlu1 %v7801_v46, %s7910_s17 }
  0x15   :  { %277 = vst [vmem:[#allocation2 + $0x58] sm:$0x1] %v276_v62  ;;  %327 = vst [vmem:[#allocation2 + $0x5c] sm:$0x1] %v326_v63  ;;  %v270_v11 = vsel %vm8063_vm3, 0, %v269_v3  ;;  %v320_v16 = vsel %vm8082_vm4, 0, %v319_v7  ;;  %7797 = vrot.lane.b32.xlu0 %v7796_v53, %s7910_s17 }
  0x16   :  { %v281_v17 = vld [vmem:[#allocation2 + $0x68] sm:$0x1]  ;;  %v278_v25 = vld [vmem:[#allocation2 + $0x60] sm:$0x1]  ;;  %271 = vst [vmem:[#allocation2 + $0x38] sm:$0x1] %v270_v11 }
  0x17   :  { %v8161_v31 = vld [vmem:[%s11051_s0 + $0xe8] sm:$0xff]  ;;  %321 = vst [vmem:[#allocation2 + $0x3c] sm:$0x1] %v320_v16  ;;  %v282_v32 = vsel %vm8063_vm3, 0, %v281_v17  ;;  %v279_v33 = vsel %vm8063_vm3, 0, %v278_v25  ;;  %v8170_v34 = vld [vmem:[%s11051_s0 + $0xd0] sm:$0xff] }
  0x18   :  { %v8175_v35 = vld [vmem:[%s11051_s0 + $0xd8] sm:$0xff]  ;;  %283 = vst [vmem:[#allocation2 + $0x68] sm:$0x1] %v282_v32  ;;  %v331_v36 = vld [vmem:[#allocation2 + $0x6c] sm:$0x1]  ;;  %7812 = vrot.lane.b32.xlu1 %v7811_v10, %s7910_s17  ;;  %v7821_v38 = vpack.i.bf16 %v8161_v31, %v8156_v30  ;;  %v11059_v42 = vmov 0  }
  0x19   :  { %280 = vst [vmem:[#allocation2 + $0x60] sm:$0x1] %v279_v33  ;;  %v332_v37 = vsel %vm8082_vm4, 0, %v331_v36  ;;  %v328_v39 = vld [vmem:[#allocation2 + $0x64] sm:$0x1]  ;;  %7807 = vrot.lane.b32.xlu0 %v7806_v28, %s7910_s17  ;;  %v7816_v43 = vpack.i.bf16 %v8175_v35, %v8170_v34  ;;  %v8212_v44 = vld [vmem:[%s11051_s0 + $0xf0] sm:$0xff] }
  0x1a   :  { %333 = vst [vmem:[#allocation2 + $0x6c] sm:$0x1] %v332_v37  ;;  %237 = vst.msk [vmem:[#allocation2] sm:$0xf] %vm236_vm5, %v11059_v42  ;;  %v8217_v45 = vld [vmem:[%s11051_s0 + $0xf8] sm:$0xff]  ;;  %v329_v46 = vsel %vm8082_vm4, 0, %v328_v39 }
  0x1b   :  { %239 = vst.msk [vmem:[#allocation2 + $0x4] sm:$0x1] %vm238_vm0, %v11059_v42  ;;  %241 = vst.msk [vmem:[#allocation2 + $0x54] sm:$0x1] %vm238_vm0, %v11059_v42  ;;  %v8224_v49 = vld [vmem:[%s11051_s0 + $0x70] sm:$0xff]  ;;  %v8229_v50 = vld [vmem:[%s11051_s0 + $0x78] sm:$0xff]  ;;  %v7831_v53 = vpack.i.bf16 %v8217_v45, %v8212_v44 }
  0x1c   :  { %240 = vst.msk [vmem:[#allocation2 + $0x50] sm:$0xf] %vm236_vm5, %v11059_v42  ;;  %243 = vst.msk [vmem:[#allocation2 + $0x48] sm:$0xf] %vm236_vm5, %v11059_v42  ;;  %v287_v51 = vld [vmem:[#allocation2 + $0x78] sm:$0x1]  ;;  %7822 = vrot.lane.b32.xlu1 %v7821_v38, %s7910_s17  ;;  %v7826_v55 = vpack.i.bf16 %v8229_v50, %v8224_v49 }
  0x1d   :  { %244 = vst.msk [vmem:[#allocation2 + $0x4c] sm:$0x1] %vm238_vm0, %v11059_v42  ;;  %246 = vst.msk [vmem:[#allocation2 + $0x9c] sm:$0x1] %vm238_vm0, %v11059_v42  ;;  %v288_v52 = vsel %vm8063_vm3, 0, %v287_v51  ;;  %7817 = vrot.lane.b32.xlu0 %v7816_v43, %s7910_s17 }
  0x1e   :  { %245 = vst.msk [vmem:[#allocation2 + $0x98] sm:$0xf] %vm236_vm5, %v11059_v42  ;;  %330 = vst [vmem:[#allocation2 + $0x64] sm:$0x1] %v329_v46  ;;  %v337_v54 = vld [vmem:[#allocation2 + $0x7c] sm:$0x1] }
  0x1f   :  { %3501 = vst.msk [vmem:[#allocation3 + $0x4] sm:$0x1] %vm3500_vm6, %v11059_v42  ;;  %3503 = vst.msk [vmem:[#allocation3 + $0x54] sm:$0x1] %vm3500_vm6, %v11059_v42  ;;  %v338_v56 = vsel %vm8082_vm4, 0, %v337_v54 }
  0x20   :  { %3506 = vst.msk [vmem:[#allocation3 + $0x4c] sm:$0x1] %vm3500_vm6, %v11059_v42  ;;  %3508 = vst.msk [vmem:[#allocation3 + $0x9c] sm:$0x1] %vm3500_vm6, %v11059_v42  ;;  %v284_v57 = vld [vmem:[#allocation2 + $0x70] sm:$0x1]  ;;  %7832 = vrot.lane.b32.xlu1 %v7831_v53, %s7910_s17 }
  0x21   :  { %289 = vst [vmem:[#allocation2 + $0x78] sm:$0x1] %v288_v52  ;;  %339 = vst [vmem:[#allocation2 + $0x7c] sm:$0x1] %v338_v56  ;;  %v334_v58 = vld [vmem:[#allocation2 + $0x74] sm:$0x1]  ;;  %7827 = vrot.lane.b32.xlu0 %v7826_v55, %s7910_s17 }
  0x22   :  { %v687_v59 = vld [vmem:[%s11052_s1] sm:$0x3]  ;;  %v285_v60 = vsel %vm8063_vm3, 0, %v284_v57  ;;  %v335_v61 = vsel %vm8082_vm4, 0, %v334_v58  ;;  %v293_v62 = vld [vmem:[#allocation2 + $0x88] sm:$0x1] }
  0x23   :  { %286 = vst [vmem:[#allocation2 + $0x70] sm:$0x1] %v285_v60  ;;  %336 = vst [vmem:[#allocation2 + $0x74] sm:$0x1] %v335_v61  ;;  %v294_v63 = vsel %vm8063_vm3, 0, %v293_v62  ;;  %7734 = vmatprep.subr.msk.bf16.mxu1 %vm982_vm7, %v687_v59 }
  0x24   :  { %v290_v3 = vld [vmem:[#allocation2 + $0x80] sm:$0x1]  ;;  %v340_v7 = vld [vmem:[#allocation2 + $0x84] sm:$0x1]  ;;  %295 = vst [vmem:[#allocation2 + $0x88] sm:$0x1] %v294_v63 }
  0x25   :  { %v343_v10 = vld [vmem:[#allocation2 + $0x8c] sm:$0x1]  ;;  %v291_v11 = vsel %vm8063_vm3, 0, %v290_v3  ;;  %v341_v16 = vsel %vm8082_vm4, 0, %v340_v7 }
  0x26   :  { %v344_v17 = vsel %vm8082_vm4, 0, %v343_v10  ;;  %292 = vst [vmem:[#allocation2 + $0x80] sm:$0x1] %v291_v11  ;;  %342 = vst [vmem:[#allocation2 + $0x84] sm:$0x1] %v341_v16 }
  0x27   :  { %345 = vst [vmem:[#allocation2 + $0x8c] sm:$0x1] %v344_v17 }
  0x28   :  { %12 = vsyncpa [#allocation5], 0  ;;  %v1148_v25 = vsel %vm982_vm7, %v687_v59, 0  ;;  %v296_v28 = vld [vmem:[#allocation2 + $0x90] sm:$0x1]  ;;  %vm1295_vm10 = vcmask 1042432  }
  0x29   :  { %7428 = vmatpush3.bf16.msra.mxu1 %v1148_v25  ;;  %v346_v32 = vld [vmem:[#allocation2 + $0x94] sm:$0x1]  ;;  %v272_v33 = vld [vmem:[#allocation2 + $0x40] sm:$0x1]  ;;  %v297_v36 = vsel %vm8063_vm3, 0, %v296_v28  ;;  %vm1296_vm11 = vcmask 1046532   ;;  %vm8356_vm14 = vmand %vm236_vm5, %vm299_vm2 }
  0x2a   :  { %v347_v37 = vsel %vm8082_vm4, 0, %v346_v32  ;;  %v273_v38 = vsel %vm8063_vm3, 0, %v272_v33  ;;  %v322_v39 = vld [vmem:[#allocation2 + $0x44] sm:$0x1]  ;;  %298 = vst [vmem:[#allocation2 + $0x90] sm:$0x1] %v297_v36  ;;  %vm8301_vm13 = vmor %vm1295_vm10, %vm1296_vm11 }
  0x2b   :  { %348 = vst [vmem:[#allocation2 + $0x94] sm:$0x1] %v347_v37  ;;  %274 = vst [vmem:[#allocation2 + $0x40] sm:$0x1] %v273_v38  ;;  %v323_v43 = vsel %vm8082_vm4, 0, %v322_v39  ;;  %v11077_v25 = vmov 0 }
  0x2c   :  { %324 = vst [vmem:[#allocation2 + $0x44] sm:$0x1] %v323_v43  ;;  %v6797_v46 = vld [vmem:[%s11052_s1 + $0x2] sm:$0x3]  ;;  %v6846_v52 = vld [vmem:[%s11052_s1 + $0x4] sm:$0x3]  ;;  %vm9370_vm4 = vmand %vm3500_vm6, %vm249_vm1 }
  0x2d   :  { %7733 = vmatprep.subr.msk.bf16.mxu0 %vm982_vm7, %v6797_v46  ;;  %v984_v51 = vsel %vm982_vm7, %v6797_v46, 0  ;;  %v6863_v29 = vld [vmem:[%s11052_s1 + $0x6] sm:$0x3]  ;;  %v8281_v53 = vld [vmem:[#allocation2] sm:$0xf]  ;;  %v11081_v46 = vmov 0  ;;  %vm9425_vm1 = vmand %vm3500_vm6, %vm299_vm2 }
  0x2e   :  { %7410 = vmatpush3.bf16.msra.mxu0 %v984_v51  ;;  %7736 = vmatprep.subr.msk.bf16.mxu1 %vm982_vm7, %v6863_v29  ;;  %v8283_v54 = vld [vmem:[#allocation2 + $0x50] sm:$0xf]  ;;  %v708_v55 = vshrl.u32 %v8281_v53, 16  ;;  %v711_v56 = vshll.u32 %v8281_v53, 16  ;;  %v688_v63 = vld [vmem:[#allocation2 + $0x4] sm:$0x1] }
  0x2f   :  { %7735 = vmatprep.subr.msk.bf16.mxu0 %vm982_vm7, %v6846_v52  ;;  %v820_v57 = vshrl.u32 %v8283_v54, 16  ;;  %v823_v58 = vshll.u32 %v8283_v54, 16  ;;  %vm704_vm8 = vsmask.f32 3328  ;;  %v717_v7 = vshll.u32 %v688_v63, 16 }
  0x30   :  { %v710_v59 = vrot.slane %v708_v55, 4  ;;  %v713_v60 = vrot.slane %v711_v56, 5  ;;  %v696_v10 = vld [vmem:[#allocation2 + $0x54] sm:$0x1]  ;;  %vm705_vm9 = vsmask.f32 7440 }
  0x31   :  { %v822_v61 = vrot.slane %v820_v57, 4  ;;  %v825_v62 = vrot.slane %v823_v58, 5  ;;  %v829_v16 = vshll.u32 %v696_v10, 16  ;;  %v1247_v17 = vld [vmem:[#allocation2] sm:$0xe]  ;;  %vm8289_vm12 = vmor %vm704_vm8, %vm705_vm9  ;;  %v8295_v32 = vrot.slane %v717_v7, 5 }
  0x32   :  { %v714_v3 = vor.u32 %v713_v60, %v710_v59  ;;  %v11078_v25 = vsel %vm8289_vm12, 4294967295, %v11077_v25  ;;  %v1300_v33 = vrot.slane %v688_v63, 5  ;;  %v6830_v36 = vrot.slane %v1247_v17, 9  ;;  %v1255_v37 = vld [vmem:[#allocation2 + $0x50] sm:$0xe] }
  0x33   :  { %v826_v11 = vor.u32 %v825_v62, %v822_v61  ;;  %11079 = vst [vmem:[#allocation7_spill] sm:$0xff] %v11078_v25  ;;  %v8299_v43 = vrot.slane %v829_v16, 5  ;;  %v11082_v46 = vsel %vm8301_vm13, 4294967295, %v11081_v46  ;;  %v6838_v59 = vrot.slane %v1255_v37, 9 }
  0x34   :  { %v8293_v28 = vrot.slane %v714_v3, 4  ;;  %11083 = vst [vmem:[#allocation9_spill] sm:$0xff] %v11082_v46  ;;  %v1332_v60 = vrot.slane %v696_v10, 5  ;;  %v8313_v3 = vsel %vm8301_vm13, %v6830_v36, %v1300_v33  ;;  %v8318_v10 = vsel %vm982_vm7, %v6846_v52, 0  ;;  %v8335_v52 = vld [vmem:[%s11052_s1 + $0xa] sm:$0x3] }
  0x35   :  { %v8297_v39 = vrot.slane %v826_v11, 4  ;;  %11080 = vst [vmem:[#allocation8_spill] sm:$0xff] %v8299_v43  ;;  %11084 = vst [vmem:[#allocation10_spill] sm:$0xff] %v8313_v3  ;;  %vm957_vm15 = vcmask 31744   ;;  %vm3325_vm0 = vcmask 64512   ;;  %vm4238_vm5 = vcmask 1043456  }
  0x76   :  { %v7768_v38 = vpop.permute.xlu1 %7767 }
  0x77   :  { %v7770_v51 = vunpack.i.h.bf16 %v7768_v38  ;;  %v7769_v55 = vunpack.i.l.bf16 %v7768_v38  ;;  %v7758_v56 = vpop.permute.xlu0 %7757 }
  0x78   :  { %v7760_v57 = vunpack.i.h.bf16 %v7758_v56  ;;  %v7759_v58 = vunpack.i.l.bf16 %v7758_v56 }
  0x79   :  { %v193_v61 = vmax.f32 %v7963_v1, %v7770_v51  ;;  %v192_v62 = vmax.f32 %v7958_v0, %v7769_v55  ;;  %v8327_v1 = vld [vmem:[%s11052_s1 + $0x8] sm:$0x3]  ;;  %v8339_v55 = vsel %vm8301_vm13, %v6838_v59, %v1332_v60  ;;  %v587_v0 = vld [vmem:[#allocation2 + $0x18] sm:$0xf] }
  0x7a   :  { %v189_v7 = vmax.f32 %v7975_v4, %v7760_v57  ;;  %v188_v11 = vmax.f32 %v7968_v2, %v7759_v58  ;;  %v7773_v16 = vpop.permute.xlu1 %7772  ;;  %v8330_v2 = vsel %vm982_vm7, %v6863_v29, 0  ;;  %11085 = vst [vmem:[#allocation11_spill] sm:$0xff] %v8339_v55  ;;  %v8345_v29 = vsel %vm982_vm7, %v8327_v1, 0 }
  0x7b   :  { %v222_v17 = vmax.f32 %v192_v62, %v193_v61  ;;  %v7775_v33 = vunpack.i.h.bf16 %v7773_v16  ;;  %v7774_v36 = vunpack.i.l.bf16 %v7773_v16  ;;  %v7763_v4 = vpop.permute.xlu0 %7762  ;;  %11086 = vst [vmem:[#allocation12_spill] sm:$0xff] %v8345_v29  ;;  %v8351_v16 = vsel %vm982_vm7, %v8335_v52, 0 }
  0x7c   :  { %v220_v37 = vmax.f32 %v188_v11, %v189_v7  ;;  %v7765_v38 = vunpack.i.h.bf16 %v7763_v4  ;;  %v7764_v51 = vunpack.i.l.bf16 %v7763_v4  ;;  %11087 = vst [vmem:[#allocation13_spill] sm:$0xff] %v8351_v16 }
  0x7d   :  { %v7217_v56 = vpack.c.bf16 %v222_v17, %v222_v17  ;;  %v195_v57 = vmax.f32 %v7985_v6, %v7775_v33  ;;  %v194_v58 = vmax.f32 %v7980_v5, %v7774_v36 }
  0x7e   :  { %v7215_v61 = vpack.c.bf16 %v220_v37, %v220_v37  ;;  %v191_v62 = vmax.f32 %v7997_v9, %v7765_v38  ;;  %v190_v7 = vmax.f32 %v7992_v8, %v7764_v51  ;;  %v7783_v11 = vpop.permute.xlu1 %7782  ;;  %v590_v51 = vld [vmem:[#allocation2 + $0x1c] sm:$0x1]  ;;  %v11090_v38 = vsel %vm8289_vm12, %v8293_v28, %v8295_v32 }
  0x7f   :  { %v430_v59 = vshrl.u32 %v7217_v56, 16  ;;  %v433_v60 = vshll.u32 %v7217_v56, 16  ;;  %v223_v17 = vmax.f32 %v194_v58, %v195_v57  ;;  %v7785_v6 = vunpack.i.h.bf16 %v7783_v11  ;;  %v7778_v33 = vpop.permute.xlu0 %7777  ;;  %v575_v56 = vld [vmem:[#allocation2 + $0x8] sm:$0xf] }
  0x80   :  { %v414_v5 = vshrl.u32 %v7215_v61, 16  ;;  %v417_v36 = vshll.u32 %v7215_v61, 16  ;;  %v221_v4 = vmax.f32 %v190_v7, %v191_v62  ;;  %v7784_v42 = vunpack.i.l.bf16 %v7783_v11 }
  0x81   :  { %v432_v37 = vrot.slane %v430_v59, 7  ;;  %v7218_v63 = vpack.c.bf16 %v223_v17, %v223_v17  ;;  %v199_v9 = vmax.f32 %v8013_v13, %v7785_v6  ;;  %v7780_v8 = vunpack.i.h.bf16 %v7778_v33  ;;  %v578_v17 = vld [vmem:[#allocation2 + $0xc] sm:$0x1] }
  0x82   :  { %v416_v57 = vrot.slane %v414_v5, 7  ;;  %v7216_v58 = vpack.c.bf16 %v221_v4, %v221_v4  ;;  %v198_v61 = vmax.f32 %v8008_v12, %v7784_v42  ;;  %v7779_v62 = vunpack.i.l.bf16 %v7778_v33  ;;  %v7793_v7 = vpop.permute.xlu1 %7792  ;;  %v596_v33 = vld [vmem:[#allocation2 + $0x24] sm:$0x1] }
  0x83   :  { %v435_v11 = vor.u32 %v433_v60, %v432_v37  ;;  %v436_v59 = vrot.slane %v432_v37, 4  ;;  %v438_v29 = vshrl.u32 %v7218_v63, 16  ;;  %v441_v13 = vshll.u32 %v7218_v63, 16  ;;  %v7788_v6 = vpop.permute.xlu0 %7787  ;;  %v593_v60 = vld [vmem:[#allocation2 + $0x20] sm:$0xf] }
  0x84   :  { %v419_v55 = vor.u32 %v417_v36, %v416_v57  ;;  %v420_v16 = vrot.slane %v416_v57, 4  ;;  %v422_v3 = vshrl.u32 %v7216_v58, 16  ;;  %v425_v46 = vshll.u32 %v7216_v58, 16 }
  0x85   :  { %v588_v43 = vsel %vm8356_vm14, %v435_v11, %v587_v0  ;;  %v591_v5 = vsel %vm8063_vm3, %v436_v59, %v590_v51  ;;  %v440_v4 = vrot.slane %v438_v29, 7  ;;  %v225_v12 = vmax.f32 %v198_v61, %v199_v9  ;;  %v581_v51 = vld [vmem:[#allocation2 + $0x10] sm:$0xf]  ;;  %v584_v29 = vld [vmem:[#allocation2 + $0x14] sm:$0x1] }
  0x86   :  { %589 = vst [vmem:[#allocation2 + $0x18] sm:$0xf] %v588_v43  ;;  %592 = vst [vmem:[#allocation2 + $0x1c] sm:$0x1] %v591_v5  ;;  %v576_v42 = vsel %vm8356_vm14, %v419_v55, %v575_v56  ;;  %v579_v63 = vsel %vm8063_vm3, %v420_v16, %v578_v17  ;;  %v424_v36 = vrot.slane %v422_v3, 7  ;;  %v197_v37 = vmax.f32 %v8023_v15, %v7780_v8  ;;  %v7803_v11 = vpop.permute.xlu1 %7802 }
  0x87   :  { %577 = vst [vmem:[#allocation2 + $0x8] sm:$0xf] %v576_v42  ;;  %580 = vst [vmem:[#allocation2 + $0xc] sm:$0x1] %v579_v63  ;;  %v443_v0 = vor.u32 %v441_v13, %v440_v4  ;;  %v444_v57 = vrot.slane %v440_v4, 4  ;;  %v7220_v9 = vpack.c.bf16 %v225_v12, %v225_v12  ;;  %v196_v43 = vmax.f32 %v8018_v14, %v7779_v62  ;;  %v7798_v59 = vpop.permute.xlu0 %7797 }
  0x88   :  { %v427_v58 = vor.u32 %v425_v46, %v424_v36  ;;  %v428_v61 = vrot.slane %v424_v36, 4  ;;  %v7795_v55 = vunpack.i.h.bf16 %v7793_v7  ;;  %v7794_v56 = vunpack.i.l.bf16 %v7793_v7  ;;  %v605_v12 = vld [vmem:[#allocation2 + $0x30] sm:$0xf]  ;;  %v608_v42 = vld [vmem:[#allocation2 + $0x34] sm:$0x1] }
  0x89   :  { %v594_v16 = vsel %vm8356_vm14, %v443_v0, %v593_v60  ;;  %v597_v15 = vsel %vm8063_vm3, %v444_v57, %v596_v33  ;;  %v454_v3 = vshrl.u32 %v7220_v9, 16  ;;  %v457_v8 = vshll.u32 %v7220_v9, 16 }
  0x8a   :  { %595 = vst [vmem:[#allocation2 + $0x20] sm:$0xf] %v594_v16  ;;  %598 = vst [vmem:[#allocation2 + $0x24] sm:$0x1] %v597_v15  ;;  %v582_v17 = vsel %vm8356_vm14, %v427_v58, %v581_v51  ;;  %v585_v14 = vsel %vm8063_vm3, %v428_v61, %v584_v29  ;;  %v224_v46 = vmax.f32 %v196_v43, %v197_v37  ;;  %v7790_v5 = vunpack.i.h.bf16 %v7788_v6  ;;  %v602_v15 = vld [vmem:[#allocation2 + $0x2c] sm:$0x1] }
  0x8b   :  { %v205_v62 = vmax.f32 %v8039_v19, %v7795_v55  ;;  %583 = vst [vmem:[#allocation2 + $0x10] sm:$0xf] %v582_v17  ;;  %586 = vst [vmem:[#allocation2 + $0x14] sm:$0x1] %v585_v14  ;;  %v456_v7 = vrot.slane %v454_v3, 7  ;;  %v204_v13 = vmax.f32 %v8034_v18, %v7794_v56  ;;  %v7789_v4 = vunpack.i.l.bf16 %v7788_v6  ;;  %v7813_v18 = vpop.permute.xlu1 %7812 }
  0x8c   :  { %v7219_v63 = vpack.c.bf16 %v224_v46, %v224_v46  ;;  %v7805_v60 = vunpack.i.h.bf16 %v7803_v11  ;;  %v7804_v33 = vunpack.i.l.bf16 %v7803_v11  ;;  %v7800_v36 = vunpack.i.h.bf16 %v7798_v59 }
  0x8d   :  { %v459_v0 = vor.u32 %v457_v8, %v456_v7  ;;  %v460_v57 = vrot.slane %v456_v7, 4  ;;  %v228_v51 = vmax.f32 %v204_v13, %v205_v62  ;;  %v201_v37 = vmax.f32 %v8049_v21, %v7790_v5  ;;  %v623_v13 = vld [vmem:[#allocation2 + $0x58] sm:$0xf] }
  0x8e   :  { %v446_v29 = vshrl.u32 %v7219_v63, 16  ;;  %v449_v19 = vshll.u32 %v7219_v63, 16  ;;  %v200_v9 = vmax.f32 %v8044_v20, %v7789_v4  ;;  %v209_v43 = vmax.f32 %v8059_v23, %v7805_v60  ;;  %v599_v20 = vld [vmem:[#allocation2 + $0x28] sm:$0xf]  ;;  %v626_v63 = vld [vmem:[#allocation2 + $0x5c] sm:$0x1] }
  0x8f   :  { %v606_v6 = vsel %vm8356_vm14, %v459_v0, %v605_v12  ;;  %v609_v58 = vsel %vm8063_vm3, %v460_v57, %v608_v42  ;;  %v7223_v61 = vpack.c.bf16 %v228_v51, %v228_v51  ;;  %v208_v55 = vmax.f32 %v8054_v22, %v7804_v33  ;;  %v7808_v42 = vpop.permute.xlu0 %7807  ;;  %v611_v51 = vld [vmem:[#allocation2 + $0x38] sm:$0xf] }
  0x90   :  { %607 = vst [vmem:[#allocation2 + $0x30] sm:$0xf] %v606_v6  ;;  %610 = vst [vmem:[#allocation2 + $0x34] sm:$0x1] %v609_v58  ;;  %v448_v56 = vrot.slane %v446_v29, 7  ;;  %v226_v21 = vmax.f32 %v200_v9, %v201_v37  ;;  %v207_v11 = vmax.f32 %v8078_v27, %v7800_v36  ;;  %v7799_v16 = vunpack.i.l.bf16 %v7798_v59 }
  0x91   :  { %v478_v23 = vshrl.u32 %v7223_v61, 16  ;;  %v481_v3 = vshll.u32 %v7223_v61, 16  ;;  %v230_v8 = vmax.f32 %v208_v55, %v209_v43  ;;  %v7815_v17 = vunpack.i.h.bf16 %v7813_v18  ;;  %v635_v6 = vld [vmem:[#allocation2 + $0x68] sm:$0xf] }
  0x92   :  { %v451_v14 = vor.u32 %v449_v19, %v448_v56  ;;  %v452_v46 = vrot.slane %v448_v56, 4  ;;  %v7221_v62 = vpack.c.bf16 %v226_v21, %v226_v21  ;;  %v206_v7 = vmax.f32 %v8073_v26, %v7799_v16  ;;  %v638_v21 = vld [vmem:[#allocation2 + $0x6c] sm:$0x1] }
  0x93   :  { %v480_v22 = vrot.slane %v478_v23, 7  ;;  %v7225_v5 = vpack.c.bf16 %v230_v8, %v230_v8  ;;  %v213_v4 = vmax.f32 %v8105_v41, %v7815_v17  ;;  %v7814_v12 = vunpack.i.l.bf16 %v7813_v18  ;;  %v614_v18 = vld [vmem:[#allocation2 + $0x3c] sm:$0x1]  ;;  %v7818_v8 = vpop.permute.xlu0 %7817 }
  0x94   :  { %v600_v27 = vsel %vm8356_vm14, %v451_v14, %v599_v20  ;;  %v603_v59 = vsel %vm8063_vm3, %v452_v46, %v602_v15  ;;  %v462_v60 = vshrl.u32 %v7221_v62, 16  ;;  %v465_v33 = vshll.u32 %v7221_v62, 16 }
  0x95   :  { %601 = vst [vmem:[#allocation2 + $0x28] sm:$0xf] %v600_v27  ;;  %604 = vst [vmem:[#allocation2 + $0x2c] sm:$0x1] %v603_v59  ;;  %v483_v36 = vor.u32 %v481_v3, %v480_v22  ;;  %v484_v26 = vrot.slane %v480_v22, 4  ;;  %v494_v0 = vshrl.u32 %v7225_v5, 16  ;;  %v229_v41 = vmax.f32 %v206_v7, %v207_v11  ;;  %v7823_v3 = vpop.permute.xlu1 %7822 }
  0x96   :  { %v497_v57 = vshll.u32 %v7225_v5, 16  ;;  %v464_v37 = vrot.slane %v462_v60, 7  ;;  %v212_v29 = vmax.f32 %v8100_v40, %v7814_v12  ;;  %v7810_v19 = vunpack.i.h.bf16 %v7808_v42  ;;  %v629_v22 = vld [vmem:[#allocation2 + $0x60] sm:$0xf]  ;;  %v632_v27 = vld [vmem:[#allocation2 + $0x64] sm:$0x1] }
  0x97   :  { %v624_v9 = vsel %vm8356_vm14, %v483_v36, %v623_v13  ;;  %v627_v43 = vsel %vm8063_vm3, %v484_v26, %v626_v63  ;;  %v496_v58 = vrot.slane %v494_v0, 7  ;;  %v7809_v61 = vunpack.i.l.bf16 %v7808_v42 }
  0x98   :  { %625 = vst [vmem:[#allocation2 + $0x58] sm:$0xf] %v624_v9  ;;  %628 = vst [vmem:[#allocation2 + $0x5c] sm:$0x1] %v627_v43  ;;  %v467_v55 = vor.u32 %v465_v33, %v464_v37  ;;  %v468_v56 = vrot.slane %v464_v37, 4  ;;  %v7224_v16 = vpack.c.bf16 %v229_v41, %v229_v41  ;;  %v232_v11 = vmax.f32 %v212_v29, %v213_v4 }
  0x99   :  { %v499_v20 = vor.u32 %v497_v57, %v496_v58  ;;  %v500_v40 = vrot.slane %v496_v58, 4  ;;  %v211_v15 = vmax.f32 %v8122_v48, %v7810_v19  ;;  %v210_v23 = vmax.f32 %v8117_v47, %v7809_v61 }
  0x9a   :  { %v612_v17 = vsel %vm8356_vm14, %v467_v55, %v611_v51  ;;  %v615_v14 = vsel %vm8063_vm3, %v468_v56, %v614_v18  ;;  %v486_v46 = vshrl.u32 %v7224_v16, 16  ;;  %v489_v62 = vshll.u32 %v7224_v16, 16  ;;  %v672_v51 = vld [vmem:[#allocation2 + $0x8] sm:$0xf]  ;;  %v647_v18 = vld [vmem:[#allocation2 + $0x78] sm:$0xf] }
  0x9b   :  { %613 = vst [vmem:[#allocation2 + $0x38] sm:$0xf] %v612_v17  ;;  %616 = vst [vmem:[#allocation2 + $0x3c] sm:$0x1] %v615_v14  ;;  %v636_v7 = vsel %vm8356_vm14, %v499_v20, %v635_v6  ;;  %v639_v48 = vsel %vm8063_vm3, %v500_v40, %v638_v21  ;;  %v7227_v47 = vpack.c.bf16 %v232_v11, %v232_v11  ;;  %v7825_v4 = vunpack.i.h.bf16 %v7823_v3  ;;  %v650_v6 = vld [vmem:[#allocation2 + $0x7c] sm:$0x1] }
  0x9c   :  { %v231_v13 = vmax.f32 %v210_v23, %v211_v15  ;;  %637 = vst [vmem:[#allocation2 + $0x68] sm:$0xf] %v636_v7  ;;  %640 = vst [vmem:[#allocation2 + $0x6c] sm:$0x1] %v639_v48  ;;  %v488_v5 = vrot.slane %v486_v46, 7  ;;  %v7824_v12 = vunpack.i.l.bf16 %v7823_v3  ;;  %v7820_v42 = vunpack.i.h.bf16 %v7818_v8  ;;  %v7833_v15 = vpop.permute.xlu1 %7832 }
  0x9d   :  { %v510_v59 = vshrl.u32 %v7227_v47, 16  ;;  %v513_v63 = vshll.u32 %v7227_v47, 16  ;;  %v7819_v33 = vunpack.i.l.bf16 %v7818_v8  ;;  %v217_v0 = vmax.f32 %v8161_v31, %v7825_v4  ;;  %v641_v21 = vld [vmem:[#allocation2 + $0x70] sm:$0xf]  ;;  %v644_v16 = vld [vmem:[#allocation2 + $0x74] sm:$0x1] }
  0x9e   :  { %v7226_v60 = vpack.c.bf16 %v231_v13, %v231_v13  ;;  %v491_v36 = vor.u32 %v489_v62, %v488_v5  ;;  %v492_v26 = vrot.slane %v488_v5, 4  ;;  %v216_v57 = vmax.f32 %v8156_v30, %v7824_v12  ;;  %v673_v17 = vld [vmem:[#allocation2 + $0x10] sm:$0xf] }
  0x9f   :  { %v512_v37 = vrot.slane %v510_v59, 7  ;;  %v215_v19 = vmax.f32 %v8175_v35, %v7820_v42  ;;  %v214_v61 = vmax.f32 %v8170_v34, %v7819_v33  ;;  %v722_v56 = vshrl.u32 %v672_v51, 16  ;;  %v662_v59 = vld [vmem:[#allocation2 + $0x8c] sm:$0x1] }
  0xa0   :  { %v502_v41 = vshrl.u32 %v7226_v60, 16  ;;  %v505_v29 = vshll.u32 %v7226_v60, 16  ;;  %v630_v9 = vsel %vm8356_vm14, %v491_v36, %v629_v22  ;;  %v633_v43 = vsel %vm8063_vm3, %v492_v26, %v632_v27  ;;  %v659_v27 = vld [vmem:[#allocation2 + $0x88] sm:$0xf] }
  0xa1   :  { %v234_v58 = vmax.f32 %v216_v57, %v217_v0  ;;  %631 = vst [vmem:[#allocation2 + $0x60] sm:$0xf] %v630_v9  ;;  %634 = vst [vmem:[#allocation2 + $0x64] sm:$0x1] %v633_v43  ;;  %v515_v30 = vor.u32 %v513_v63, %v512_v37  ;;  %v516_v31 = vrot.slane %v512_v37, 4  ;;  %v233_v11 = vmax.f32 %v214_v61, %v215_v19 }
  0xa2   :  { %v504_v55 = vrot.slane %v502_v41, 7  ;;  %v725_v20 = vshll.u32 %v672_v51, 16  ;;  %v6814_v40 = vcombine.low %v8281_v53, %v672_v51  ;;  %v8424_v7 = vrot.slane %v722_v56, 4  ;;  %v7828_v53 = vpop.permute.xlu0 %7827  ;;  %v653_v57 = vld [vmem:[#allocation2 + $0x80] sm:$0xf] }
  0xa3   :  { %v7229_v35 = vpack.c.bf16 %v234_v58, %v234_v58  ;;  %v648_v23 = vsel %vm8356_vm14, %v515_v30, %v647_v18  ;;  %v651_v34 = vsel %vm8063_vm3, %v516_v31, %v650_v6  ;;  %v7228_v62 = vpack.c.bf16 %v233_v11, %v233_v11  ;;  %v674_v41 = vld [vmem:[#allocation2 + $0x18] sm:$0xf]  ;;  %v675_v30 = vld [vmem:[#allocation2 + $0x20] sm:$0xf] }
  0xa4   :  { %v507_v3 = vor.u32 %v505_v29, %v504_v55  ;;  %v508_v8 = vrot.slane %v504_v55, 4  ;;  %649 = vst [vmem:[#allocation2 + $0x78] sm:$0xf] %v648_v23  ;;  %652 = vst [vmem:[#allocation2 + $0x7c] sm:$0x1] %v651_v34  ;;  %7429 = vmatprep.mubr.msk.bf16.mxu1 %vm957_vm15, %v6814_v40  ;;  %v8431_v13 = vrot.slane %v725_v20, 5  ;;  %v7835_v22 = vunpack.i.h.bf16 %v7833_v15 }
  0xa5   :  { %v526_v14 = vshrl.u32 %v7229_v35, 16  ;;  %v529_v46 = vshll.u32 %v7229_v35, 16  ;;  %v518_v4 = vshrl.u32 %v7228_v62, 16  ;;  %v521_v12 = vshll.u32 %v7228_v62, 16  ;;  %v656_v29 = vld [vmem:[#allocation2 + $0x84] sm:$0x1] }
  0xa6   :  { %v642_v48 = vsel %vm8356_vm14, %v507_v3, %v641_v21  ;;  %v645_v47 = vsel %vm8063_vm3, %v508_v8, %v644_v16  ;;  %v7834_v42 = vunpack.i.l.bf16 %v7833_v15  ;;  %v219_v63 = vmax.f32 %v8217_v45, %v7835_v22  ;;  %v8451_v23 = vld [vmem:[#allocation2 + $0xc] sm:$0x1] }
  0xa7   :  { %643 = vst [vmem:[#allocation2 + $0x70] sm:$0xf] %v642_v48  ;;  %646 = vst [vmem:[#allocation2 + $0x74] sm:$0x1] %v645_v47  ;;  %v528_v5 = vrot.slane %v526_v14, 7  ;;  %v7830_v60 = vunpack.i.h.bf16 %v7828_v53  ;;  %v7829_v33 = vunpack.i.l.bf16 %v7828_v53  ;;  %v736_v36 = vshrl.u32 %v673_v17, 16 }
  0xa8   :  { %v520_v51 = vrot.slane %v518_v4, 7  ;;  %v218_v37 = vmax.f32 %v8212_v44, %v7834_v42  ;;  %v739_v18 = vshll.u32 %v673_v17, 16  ;;  %v753_v16 = vshll.u32 %v674_v41, 16  ;;  %v677_v48 = vld [vmem:[#allocation2 + $0x30] sm:$0xf] }
  0xa9   :  { %v531_v26 = vor.u32 %v529_v46, %v528_v5  ;;  %v532_v0 = vrot.slane %v528_v5, 4  ;;  %v203_v19 = vmax.f32 %v8229_v50, %v7830_v60  ;;  %v202_v9 = vmax.f32 %v8224_v49, %v7829_v33  ;;  %v676_v49 = vld [vmem:[#allocation2 + $0x28] sm:$0xf]  ;;  %v665_v47 = vld [vmem:[#allocation2 + $0x90] sm:$0xf] }
  0xaa   :  { %v8437_v43 = vrot.slane %v736_v36, 4  ;;  %v523_v58 = vor.u32 %v521_v12, %v520_v51  ;;  %v524_v61 = vrot.slane %v520_v51, 4  ;;  %v235_v44 = vmax.f32 %v218_v37, %v219_v63  ;;  %v668_v42 = vld [vmem:[#allocation2 + $0x94] sm:$0x1]  ;;  %v620_v33 = vld [vmem:[#allocation2 + $0x44] sm:$0x1] }
  0xab   :  { %v660_v45 = vsel %vm8356_vm14, %v531_v26, %v659_v27  ;;  %v663_v6 = vsel %vm8063_vm3, %v532_v0, %v662_v59  ;;  %v227_v31 = vmax.f32 %v202_v9, %v203_v19  ;;  %v8443_v55 = vrot.slane %v739_v18, 5  ;;  %v617_v59 = vld [vmem:[#allocation2 + $0x40] sm:$0xf] }
  0xac   :  { %661 = vst [vmem:[#allocation2 + $0x88] sm:$0xf] %v660_v45  ;;  %664 = vst [vmem:[#allocation2 + $0x8c] sm:$0x1] %v663_v6  ;;  %v750_v50 = vshrl.u32 %v674_v41, 16  ;;  %v654_v56 = vsel %vm8356_vm14, %v523_v58, %v653_v57  ;;  %v657_v21 = vsel %vm8063_vm3, %v524_v61, %v656_v29  ;;  %v6815_v35 = vcombine.low %v673_v17, %v674_v41 }
  0xad   :  { %655 = vst [vmem:[#allocation2 + $0x80] sm:$0xf] %v654_v56  ;;  %658 = vst [vmem:[#allocation2 + $0x84] sm:$0x1] %v657_v21  ;;  %v7230_v11 = vpack.c.bf16 %v235_v44, %v235_v44  ;;  %v7222_v20 = vpack.c.bf16 %v227_v31, %v227_v31  ;;  %v764_v15 = vshrl.u32 %v675_v30, 16  ;;  %v8453_v34 = vrot.slane %v753_v16, 5 }
  0xae   :  { %v8449_v40 = vrot.slane %v750_v50, 4  ;;  %7430 = vmatmul.mubr.msk.bf16.vlgmr.msra.gmra.mxu1 %vm957_vm15, %v6815_v35  ;;  %v767_v3 = vshll.u32 %v675_v30, 16  ;;  %v778_v8 = vshrl.u32 %v676_v49, 16  ;;  %v781_v14 = vshll.u32 %v676_v49, 16  ;;  %v680_v35 = vld [vmem:[#allocation2 + $0x58] sm:$0xf] }
  0xaf   :  { %v534_v46 = vshrl.u32 %v7230_v11, 16  ;;  %v537_v62 = vshll.u32 %v7230_v11, 16  ;;  %v470_v53 = vshrl.u32 %v7222_v20, 16  ;;  %v473_v17 = vshll.u32 %v7222_v20, 16  ;;  %7464 = vmatpush3.bf16.msra.mxu1 %v8330_v2 }
  0xb0   :  { %v8457_v22 = vrot.slane %v764_v15, 4  ;;  %v8459_v5 = vrot.slane %v767_v3, 5  ;;  %v8461_v4 = vrot.slane %v778_v8, 4  ;;  %v8463_v12 = vrot.slane %v781_v14, 5  ;;  %7738 = vmatprep.subr.msk.bf16.mxu1 %vm982_vm7, %v8335_v52  ;;  %v678_v52 = vld [vmem:[#allocation2 + $0x38] sm:$0xf] }
  0xb1   :  { %v536_v27 = vrot.slane %v534_v46, 7  ;;  %v472_v63 = vrot.slane %v470_v53, 7  ;;  %v6816_v60 = vcombine.low %v675_v30, %v676_v49  ;;  %v728_v2 = vor.u32 %v8431_v13, %v8424_v7  ;;  %v8476_v7 = vld [vmem:[#allocation2 + $0x14] sm:$0x1]  ;;  %v8488_v49 = vld [vmem:[#allocation2 + $0x1c] sm:$0x1] }
  0xb2   :  { %v731_v36 = vshll.u32 %v8451_v23, 16  ;;  %v1304_v26 = vrot.slane %v8451_v23, 5  ;;  %v792_v0 = vshrl.u32 %v677_v48, 16  ;;  %v795_v57 = vshll.u32 %v677_v48, 16  ;;  %v8509_v8 = vld [vmem:[#allocation2 + $0x2c] sm:$0x1] }
  0xb3   :  { %v539_v51 = vor.u32 %v537_v62, %v536_v27  ;;  %v540_v37 = vrot.slane %v536_v27, 4  ;;  %v475_v41 = vor.u32 %v473_v17, %v472_v63  ;;  %v476_v29 = vrot.slane %v472_v63, 4  ;;  %7433 = vmatprep.mubr.msk.bf16.mxu1 %vm957_vm15, %v6816_v60  ;;  %v8512_v62 = vld [vmem:[#allocation2 + $0x24] sm:$0x1]  ;;  %v682_v27 = vld [vmem:[#allocation2 + $0x68] sm:$0xf] }
  0xb4   :  { %v729_v19 = vrot.slane %v728_v2, 4  ;;  %v733_v9 = vrot.slane %v731_v36, 5  ;;  %v8472_v18 = vrot.slane %v792_v0, 4  ;;  %v8474_v45 = vrot.slane %v795_v57, 5 }
  0xb5   :  { %v666_v13 = vsel %vm8356_vm14, %v539_v51, %v665_v47  ;;  %v669_v6 = vsel %vm8063_vm3, %v540_v37, %v668_v42  ;;  %v618_v58 = vsel %vm8356_vm14, %v475_v41, %v617_v59  ;;  %v621_v61 = vsel %vm8063_vm3, %v476_v29, %v620_v33  ;;  %v681_v42 = vld [vmem:[#allocation2 + $0x60] sm:$0xf] }
  0xb6   :  { %667 = vst [vmem:[#allocation2 + $0x90] sm:$0xf] %v666_v13  ;;  %670 = vst [vmem:[#allocation2 + $0x94] sm:$0x1] %v669_v6  ;;  %v734_v30 = vsel %vm8289_vm12, %v729_v19, %v733_v9  ;;  %v806_v44 = vshrl.u32 %v678_v52, 16  ;;  %v809_v31 = vshll.u32 %v678_v52, 16  ;;  %v6817_v50 = vcombine.low %v677_v48, %v678_v52 }
  0xb7   :  { %619 = vst [vmem:[#allocation2 + $0x40] sm:$0xf] %v618_v58  ;;  %622 = vst [vmem:[#allocation2 + $0x44] sm:$0x1] %v621_v61  ;;  %v6798_v56 = vcombine.low %v11090_v38, %v734_v30  ;;  %v742_v24 = vor.u32 %v8443_v55, %v8437_v43  ;;  %v745_v21 = vshll.u32 %v8476_v7, 16  ;;  %v756_v16 = vor.u32 %v8453_v34, %v8449_v40 }
  0xb8   :  { %v8500_v11 = vrot.slane %v806_v44, 4  ;;  %v8502_v20 = vrot.slane %v809_v31, 5  ;;  %7434 = vmatmul.mubr.msk.bf16.gmra.mxu1 %vm957_vm15, %v6817_v50  ;;  %v759_v15 = vshll.u32 %v8488_v49, 16  ;;  %v1308_v28 = vrot.slane %v8476_v7, 5  ;;  %v684_v19 = vld [vmem:[#allocation2 + $0x78] sm:$0xf] }
  0xb9   :  { %7411 = vmatprep.mubr.msk.bf16.mxu0 %vm957_vm15, %v6798_v56  ;;  %v743_v32 = vrot.slane %v742_v24, 4  ;;  %v747_v43 = vrot.slane %v745_v21, 5  ;;  %v757_v55 = vrot.slane %v756_v16, 4  ;;  %v1312_v3 = vrot.slane %v8488_v49, 5  ;;  %v683_v61 = vld [vmem:[#allocation2 + $0x70] sm:$0xf] }
  0xba   :  { %v761_v40 = vrot.slane %v759_v15, 5  ;;  %v834_v34 = vshrl.u32 %v680_v35, 16  ;;  %v837_v14 = vshll.u32 %v680_v35, 16  ;;  %v6818_v46 = vcombine.low %v8283_v54, %v680_v35  ;;  %v8539_v38 = vld [vmem:[#allocation2 + $0x5c] sm:$0x1] }
  0xbb   :  { %v748_v53 = vsel %vm8289_vm12, %v743_v32, %v747_v43  ;;  %v770_v17 = vor.u32 %v8459_v5, %v8457_v22  ;;  %v773_v48 = vshll.u32 %v8512_v62, 16  ;;  %v784_v47 = vor.u32 %v8463_v12, %v8461_v4  ;;  %v8525_v4 = vld [vmem:[#allocation2 + $0x34] sm:$0x1]  ;;  %v8527_v12 = vld [vmem:[#allocation2 + $0x3c] sm:$0x1] }
  0xbc   :  { %v762_v59 = vsel %vm8289_vm12, %v757_v55, %v761_v40  ;;  %v836_v63 = vrot.slane %v834_v34, 4  ;;  %v839_v54 = vrot.slane %v837_v14, 5  ;;  %7437 = vmatprep.mubr.msk.bf16.mxu1 %vm957_vm15, %v6818_v46  ;;  %v787_v60 = vshll.u32 %v8509_v8, 16  ;;  %v685_v40 = vld [vmem:[#allocation2 + $0x80] sm:$0xf] }
  0xbd   :  { %v6799_v2 = vcombine.low %v748_v53, %v762_v59  ;;  %v771_v33 = vrot.slane %v770_v17, 4  ;;  %v775_v36 = vrot.slane %v773_v48, 5  ;;  %v785_v22 = vrot.slane %v784_v47, 4  ;;  %v686_v14 = vld [vmem:[#allocation2 + $0x88] sm:$0xf] }
  0xbe   :  { %v789_v5 = vrot.slane %v787_v60, 5  ;;  %v848_v0 = vshrl.u32 %v681_v42, 16  ;;  %v851_v57 = vshll.u32 %v681_v42, 16  ;;  %v862_v51 = vshrl.u32 %v682_v27, 16  ;;  %v7844_v60 = vld [vmem:[#allocation2 + $0x8] ss:$8 sps:$4 sm:$0xff]  }
  0xbf   :  { %7412 = vmatmul.mubr.msk.bf16.vlgmr.msra.gmra.mxu0 %vm957_vm15, %v6799_v2  ;;  %v776_v37 = vsel %vm8289_vm12, %v771_v33, %v775_v36  ;;  %v865_v41 = vshll.u32 %v682_v27, 16  ;;  %v6819_v29 = vcombine.low %v681_v42, %v682_v27  ;;  %v798_v52 = vor.u32 %v8474_v45, %v8472_v18  ;;  %v11091_v42 = vld [vmem:[#allocation8_spill] sm:$0xff] }
  0xc0   :  { %7446 = vmatpush3.bf16.msra.mxu0 %v8318_v10  ;;  %v790_v9 = vsel %vm8289_vm12, %v785_v22, %v789_v5  ;;  %v850_v13 = vrot.slane %v848_v0, 4  ;;  %v853_v6 = vrot.slane %v851_v57, 5  ;;  %v864_v58 = vrot.slane %v862_v51, 4  ;;  %v8560_v5 = vld [vmem:[#allocation2 + $0x64] sm:$0x1] }
  0xc1   :  { %v6800_v30 = vcombine.low %v776_v37, %v790_v9  ;;  %v867_v44 = vrot.slane %v865_v41, 5  ;;  %7438 = vmatmul.mubr.msk.bf16.gmra.mxu1 %vm957_vm15, %v6819_v29  ;;  %v799_v31 = vrot.slane %v798_v52, 4  ;;  %v801_v50 = vshll.u32 %v8525_v4, 16  ;;  %7737 = vmatprep.subr.msk.bf16.mxu0 %vm982_vm7, %v8327_v1  ;;  %v8563_v51 = vld [vmem:[#allocation2 + $0x6c] sm:$0x1] }
  0xc2   :  { %v812_v10 = vor.u32 %v8502_v20, %v8500_v11  ;;  %v815_v18 = vshll.u32 %v8527_v12, 16  ;;  %v840_v45 = vor.u32 %v839_v54, %v836_v63  ;;  %v843_v56 = vshll.u32 %v8539_v38, 16  ;;  %v8569_v9 = vld [vmem:[#allocation2 + $0x74] sm:$0x1] }
  0xc3   :  { %7415 = vmatprep.mubr.msk.bf16.mxu0 %vm957_vm15, %v6800_v30  ;;  %v803_v24 = vrot.slane %v801_v50, 5  ;;  %v876_v21 = vshrl.u32 %v683_v61, 16  ;;  %v879_v16 = vshll.u32 %v683_v61, 16  ;;  %v890_v35 = vshrl.u32 %v684_v19, 16 }
  0xc4   :  { %v813_v15 = vrot.slane %v812_v10, 4  ;;  %v817_v32 = vrot.slane %v815_v18, 5  ;;  %v841_v43 = vrot.slane %v840_v45, 4  ;;  %v845_v55 = vrot.slane %v843_v56, 5  ;;  %v1248_v56 = vld [vmem:[#allocation2 + $0x8] sm:$0xe] }
  0xc5   :  { %v804_v1 = vsel %vm8289_vm12, %v799_v31, %v803_v24  ;;  %v878_v11 = vrot.slane %v876_v21, 4  ;;  %v881_v20 = vrot.slane %v879_v16, 5  ;;  %v892_v34 = vrot.slane %v890_v35, 4  ;;  %v8572_v31 = vld [vmem:[#allocation2 + $0x7c] sm:$0x1] }
  0xc6   :  { %v818_v46 = vsel %vm8289_vm12, %v813_v15, %v817_v32  ;;  %v846_v53 = vsel %vm8289_vm12, %v841_v43, %v845_v55  ;;  %v893_v17 = vshll.u32 %v684_v19, 16  ;;  %v6820_v48 = vcombine.low %v683_v61, %v684_v19  ;;  %v8578_v21 = vld [vmem:[#allocation2 + $0x84] sm:$0x1]  ;;  %v1250_v35 = vld [vmem:[#allocation2 + $0x18] sm:$0xe] }
  0xc7   :  { %v6801_v47 = vcombine.low %v804_v1, %v818_v46  ;;  %v11092_v27 = vsel %vm8289_vm12, %v8297_v39, %v11091_v42  ;;  %v904_v63 = vshrl.u32 %v685_v40, 16  ;;  %v907_v54 = vshll.u32 %v685_v40, 16  ;;  %v7845_v55 = vld [vmem:[#allocation2 + $0x18] ss:$8 sps:$4 sm:$0xff]   ;;  %v1249_v1 = vld [vmem:[#allocation2 + $0x10] sm:$0xe] }
  0xc8   :  { %v6802_v59 = vcombine.low %v11092_v27, %v846_v53  ;;  %v895_v2 = vrot.slane %v893_v17, 5  ;;  %7441 = vmatprep.mubr.msk.bf16.mxu1 %vm957_vm15, %v6820_v48  ;;  %v918_v33 = vshrl.u32 %v686_v14, 16  ;;  %v921_v36 = vshll.u32 %v686_v14, 16  ;;  %v1251_v53 = vld [vmem:[#allocation2 + $0x20] sm:$0xe] }
  0xc9   :  { %v6821_v22 = vcombine.low %v685_v40, %v686_v14  ;;  %7416 = vmatmul.mubr.msk.bf16.gmra.mxu0 %vm957_vm15, %v6801_v47  ;;  %v906_v0 = vrot.slane %v904_v63, 4  ;;  %v909_v57 = vrot.slane %v907_v54, 5  ;;  %v854_v37 = vor.u32 %v853_v6, %v850_v13  ;;  %v7846_v42 = vld [vmem:[#allocation2 + $0x28] ss:$8 sps:$4 sm:$0xff]  }
  0xca   :  { %v857_v39 = vshll.u32 %v8560_v5, 16  ;;  %7419 = vmatprep.mubr.msk.bf16.mxu0 %vm957_vm15, %v6802_v59  ;;  %v920_v41 = vrot.slane %v918_v33, 4  ;;  %v923_v29 = vrot.slane %v921_v36, 5  ;;  %v868_v52 = vor.u32 %v867_v44, %v864_v58 }
  0xcb   :  { %7442 = vmatmul.mubr.msk.bf16.gmra.mxu1 %vm957_vm15, %v6821_v22  ;;  %v871_v19 = vshll.u32 %v8563_v51, 16  ;;  %v855_v61 = vrot.slane %v854_v37, 4  ;;  %v882_v13 = vor.u32 %v881_v20, %v878_v11  ;;  %v885_v6 = vshll.u32 %v8569_v9, 16  ;;  %v1253_v37 = vld [vmem:[#allocation2 + $0x30] sm:$0xe] }
  0xcc   :  { %v859_v30 = vrot.slane %v857_v39, 5  ;;  %7465 = vmatprep.mubr.msk.bf16.mxu1 %vm957_vm15, %v7844_v60  ;;  %v869_v50 = vrot.slane %v868_v52, 4  ;;  %v896_v18 = vor.u32 %v895_v2, %v892_v34  ;;  %v899_v45 = vshll.u32 %v8572_v31, 16  ;;  %v8585_v34 = vld [vmem:[#allocation2 + $0x8c] sm:$0x1] }
  0xcd   :  { %v873_v10 = vrot.slane %v871_v19, 5  ;;  %v883_v44 = vrot.slane %v882_v13, 4  ;;  %v887_v24 = vrot.slane %v885_v6, 5  ;;  %v910_v16 = vor.u32 %v909_v57, %v906_v0  ;;  %v1252_v2 = vld [vmem:[#allocation2 + $0x28] sm:$0xe]  ;;  %v11095_v6 = vld [vmem:[#allocation13_spill] sm:$0xff] }
  0xce   :  { %v860_v58 = vsel %vm8289_vm12, %v855_v61, %v859_v30  ;;  %v897_v32 = vrot.slane %v896_v18, 4  ;;  %v901_v43 = vrot.slane %v899_v45, 5  ;;  %v913_v40 = vshll.u32 %v8578_v21, 16  ;;  %v1256_v39 = vld [vmem:[#allocation2 + $0x58] sm:$0xe] }
  0xcf   :  { %v874_v15 = vsel %vm8289_vm12, %v869_v50, %v873_v10  ;;  %v888_v20 = vsel %vm8289_vm12, %v883_v44, %v887_v24  ;;  %v911_v14 = vrot.slane %v910_v16, 4  ;;  %v924_v46 = vor.u32 %v923_v29, %v920_v41  ;;  %v11094_v41 = vld [vmem:[#allocation10_spill] sm:$0xff]  ;;  %v8617_v61 = vld [vmem:[%s11052_s1 + $0xe] sm:$0x3]  ;;  %v1257_v13 = vld [vmem:[#allocation2 + $0x60] sm:$0xe] }
  0xd0   :  { %v6803_v11 = vcombine.low %v860_v58, %v874_v15  ;;  %v902_v17 = vsel %vm8289_vm12, %v897_v32, %v901_v43  ;;  %v915_v48 = vrot.slane %v913_v40, 5  ;;  %v927_v47 = vshll.u32 %v8585_v34, 16  ;;  %v1254_v19 = vld [vmem:[#allocation2 + $0x38] sm:$0xe]  ;;  %v1258_v45 = vld [vmem:[#allocation2 + $0x68] sm:$0xe] }
  0xd1   :  { %v6831_v27 = vrot.slane %v1248_v56, 9  ;;  %v6804_v59 = vcombine.low %v888_v20, %v902_v17  ;;  %v925_v63 = vrot.slane %v924_v46, 4  ;;  %v6832_v54 = vrot.slane %v1249_v1, 9  ;;  %v2148_v56 = vld [vmem:[#allocation2 + $0x8] sm:$0xe] }
  0xd2   :  { %7420 = vmatmul.mubr.msk.bf16.gmra.mxu0 %vm957_vm15, %v6803_v11  ;;  %v6833_v60 = vrot.slane %v1250_v35, 9  ;;  %v916_v33 = vsel %vm8289_vm12, %v911_v14, %v915_v48  ;;  %v929_v36 = vrot.slane %v927_v47, 5  ;;  %v6834_v57 = vrot.slane %v1251_v53, 9  ;;  %v8639_v16 = vld [vmem:[#allocation2 + $0x14] sm:$0x1] }
  0xd3   :  { %7466 = vmatmul.mubr.msk.bf16.vlgmr.msra.gmra.mxu1 %vm957_vm15, %v7845_v55  ;;  %v1305_v0 = vsel %vm8301_vm13, %v6831_v27, %v1304_v26  ;;  %7423 = vmatprep.mubr.msk.bf16.mxu0 %vm957_vm15, %v6804_v59  ;;  %v8605_v52 = vsel %vm8301_vm13, %v6832_v54, %v1308_v28  ;;  %v1316_v26 = vrot.slane %v8512_v62, 5  ;;  %v6835_v30 = vrot.slane %v1252_v2, 9  ;;  %v2149_v35 = vld [vmem:[#allocation2 + $0x10] sm:$0xe]  ;;  %v2150_v40 = vld [vmem:[#allocation2 + $0x18] sm:$0xe] }
  0xd4   :  { %7469 = vmatprep.mubr.msk.bf16.mxu1 %vm957_vm15, %v7846_v42  ;;  %v6847_v29 = vcombine.low %v11094_v41, %v1305_v0  ;;  %v8611_v23 = vsel %vm8301_vm13, %v6833_v60, %v1312_v3  ;;  %v930_v7 = vsel %vm8289_vm12, %v925_v63, %v929_v36  ;;  %v1320_v49 = vrot.slane %v8509_v8, 5  ;;  %v8624_v3 = vld [vmem:[#allocation2 + $0xc] sm:$0x1]  ;;  %7500 = vmatpush3.bf16.msra.mxu1 %v11095_v6  ;;  %v1259_v55 = vld [vmem:[#allocation2 + $0x70] sm:$0xe] }
  0xd5   :  { %v6848_v28 = vcombine.low %v8605_v52, %v8611_v23  ;;  %v6805_v62 = vcombine.low %v916_v33, %v930_v7  ;;  %v8629_v50 = vsel %vm8301_vm13, %v6834_v57, %v1316_v26  ;;  %v6836_v10 = vrot.slane %v1253_v37, 9  ;;  %7740 = vmatprep.subr.msk.bf16.mxu1 %vm982_vm7, %v8617_v61  ;;  %v7847_v1 = vld [vmem:[#allocation2 + $0x38] ss:$8 sps:$4 sm:$0xff]   ;;  %v8654_v46 = vld [vmem:[#allocation2 + $0x1c] sm:$0x1] }
  0xd6   :  { %v1324_v18 = vrot.slane %v8525_v4, 5  ;;  %v8636_v8 = vsel %vm8301_vm13, %v6835_v30, %v1320_v49  ;;  %v6837_v58 = vrot.slane %v1254_v19, 9  ;;  %v1328_v44 = vrot.slane %v8527_v12, 5  ;;  %v8656_v53 = vld [vmem:[#allocation2 + $0x24] sm:$0x1] }
  0xd7   :  { %v6839_v24 = vrot.slane %v1256_v39, 9  ;;  %v6849_v15 = vcombine.low %v8629_v50, %v8636_v8  ;;  %v1336_v32 = vrot.slane %v8539_v38, 5  ;;  %v6840_v43 = vrot.slane %v1257_v13, 9  ;;  %v2151_v17 = vld [vmem:[#allocation2 + $0x20] sm:$0xe] }
  0xd8   :  { %v8645_v4 = vsel %vm8301_vm13, %v6836_v10, %v1324_v18  ;;  %v8650_v12 = vsel %vm8301_vm13, %v6837_v58, %v1328_v44  ;;  %v1340_v11 = vrot.slane %v8560_v5, 5  ;;  %v6841_v20 = vrot.slane %v1258_v45, 9  ;;  %v7848_v38 = vld [vmem:[#allocation2 + $0x58] ss:$8 sps:$4 sm:$0xff]   ;;  %v2152_v37 = vld [vmem:[#allocation2 + $0x28] sm:$0xe] }
  0xd9   :  { %v1344_v14 = vrot.slane %v8563_v51, 5  ;;  %v6850_v48 = vcombine.low %v8645_v4, %v8650_v12  ;;  %v8663_v47 = vsel %vm8301_vm13, %v6839_v24, %v1336_v32  ;;  %v6897_v42 = vrot.slane %v2148_v56, 9  ;;  %v1260_v27 = vld [vmem:[#allocation2 + $0x78] sm:$0xe]  ;;  %v11096_v51 = vld [vmem:[#allocation11_spill] sm:$0xff] }
  0xda   :  { %7424 = vmatmul.mubr.msk.bf16.gmra.mxu0 %vm957_vm15, %v6805_v62  ;;  %v2198_v5 = vrot.slane %v8624_v3, 5  ;;  %v6851_v59 = vcombine.low %v11096_v51, %v8663_v47  ;;  %v8672_v63 = vsel %vm8301_vm13, %v6840_v43, %v1340_v11  ;;  %v6898_v60 = vrot.slane %v2149_v35, 9  ;;  %v1261_v57 = vld [vmem:[#allocation2 + $0x80] sm:$0xe]  ;;  %v8688_v19 = vld [vmem:[#allocation2 + $0x2c] sm:$0x1] }
  0xdb   :  { %7447 = vmatprep.mubr.msk.bf16.mxu0 %vm957_vm15, %v6847_v29  ;;  %7470 = vmatmul.mubr.msk.bf16.gmra.mxu1 %vm957_vm15, %v7847_v1  ;;  %v8676_v54 = vsel %vm8301_vm13, %v6841_v20, %v1344_v14  ;;  %v2202_v36 = vrot.slane %v8639_v16, 5  ;;  %v6842_v0 = vrot.slane %v1259_v55, 9  ;;  %v1348_v39 = vrot.slane %v8569_v9, 5  ;;  %v8690_v7 = vld [vmem:[#allocation2 + $0x34] sm:$0x1] }
  0xdc   :  { %7473 = vmatprep.mubr.msk.bf16.mxu1 %vm957_vm15, %v7848_v38  ;;  %v6852_v2 = vcombine.low %v8672_v63, %v8676_v54  ;;  %v8683_v33 = vsel %vm8301_vm13, %v6897_v42, %v2198_v5  ;;  %v6843_v41 = vrot.slane %v1260_v27, 9  ;;  %v1352_v29 = vrot.slane %v8572_v31, 5  ;;  %v2153_v30 = vld [vmem:[#allocation2 + $0x30] sm:$0xe]  ;;  %v1262_v10 = vld [vmem:[#allocation2 + $0x88] sm:$0xe] }
  0xdd   :  { %v6899_v26 = vrot.slane %v2150_v40, 9  ;;  %v8694_v49 = vsel %vm8301_vm13, %v6898_v60, %v2202_v36  ;;  %v2206_v13 = vrot.slane %v8654_v46, 5  ;;  %v6900_v6 = vrot.slane %v2151_v17, 9  ;;  %v1726_v56 = vld [vmem:[#allocation2 + $0x8] sm:$0xf] }
  0xde   :  { %v2210_v62 = vrot.slane %v8656_v53, 5  ;;  %v6914_v9 = vcombine.low %v8683_v33, %v8694_v49  ;;  %v8702_v31 = vsel %vm8301_vm13, %v6842_v0, %v1348_v39  ;;  %v8706_v18 = vsel %vm8301_vm13, %v6843_v41, %v1352_v29  ;;  %v1728_v58 = vld [vmem:[#allocation2 + $0x10] sm:$0xf]  ;;  %v8711_v44 = vld [vmem:[%s11052_s1 + $0xc] sm:$0x3] }
  0xdf   :  { %v6844_v45 = vrot.slane %v1261_v57, 9  ;;  %v7849_v24 = vld [vmem:[#allocation2 + $0x68] ss:$8 sps:$4 sm:$0xff]   ;;  %v6853_v35 = vcombine.low %v8702_v31, %v8706_v18  ;;  %v8717_v32 = vsel %vm8301_vm13, %v6899_v26, %v2206_v13  ;;  %v1356_v55 = vrot.slane %v8578_v21, 5  ;;  %v2154_v14 = vld [vmem:[#allocation2 + $0x38] sm:$0xe] }
  0xe0   :  { %v8721_v43 = vsel %vm8301_vm13, %v6900_v6, %v2210_v62  ;;  %v6845_v1 = vrot.slane %v1262_v10, 9  ;;  %v1360_v11 = vrot.slane %v8585_v34, 5  ;;  %v6901_v20 = vrot.slane %v2152_v37, 9  ;;  %v7850_v17 = vld [vmem:[#allocation2 + $0x78] ss:$8 sps:$4 sm:$0xff]   ;;  %v11097_v34 = vld [vmem:[#allocation12_spill] sm:$0xff] }
  0xe1   :  { %v6915_v40 = vcombine.low %v8717_v32, %v8721_v43  ;;  %v8733_v38 = vsel %vm8301_vm13, %v6844_v45, %v1356_v55  ;;  %v2214_v21 = vrot.slane %v8688_v19, 5  ;;  %v6902_v42 = vrot.slane %v2153_v30, 9  ;;  %v8737_v27 = vld [vmem:[#allocation2 + $0x3c] sm:$0x1]  ;;  %v1730_v36 = vld [vmem:[#allocation2 + $0x18] sm:$0xf] }
  0xe2   :  { %7448 = vmatmul.mubr.msk.bf16.vlgmr.msra.gmra.mxu0 %vm957_vm15, %v6848_v28  ;;  %v2218_v5 = vrot.slane %v8690_v7, 5  ;;  %v8746_v52 = vsel %vm8301_vm13, %v6845_v1, %v1360_v11  ;;  %v1759_v23 = vshrl.u32 %v1726_v56, 16  ;;  %v1762_v28 = vshll.u32 %v1726_v56, 16  ;;  %v2155_v37 = vld [vmem:[#allocation2 + $0x40] sm:$0xe] }
  0xe3   :  { %7482 = vmatpush3.bf16.msra.mxu0 %v11097_v34  ;;  %7451 = vmatprep.mubr.msk.bf16.mxu0 %vm957_vm15, %v6849_v15  ;;  %v1768_v60 = vshll.u32 %v8624_v3, 16  ;;  %v6854_v0 = vcombine.low %v8733_v38, %v8746_v52  ;;  %v8754_v57 = vsel %vm8301_vm13, %v6901_v20, %v2214_v21  ;;  %v1773_v8 = vshrl.u32 %v1728_v58, 16  ;;  %v8760_v15 = vld [vmem:[#allocation2 + $0x44] sm:$0x1]  ;;  %v7851_v34 = vld [vmem:[#allocation2 + $0x88] ss:$8 sps:$4 sm:$0xff]  }
  0xe4   :  { %7474 = vmatmul.mubr.msk.bf16.gmra.mxu1 %vm957_vm15, %v7849_v24  ;;  %v8758_v50 = vsel %vm8301_vm13, %v6902_v42, %v2218_v5  ;;  %7739 = vmatprep.subr.msk.bf16.mxu0 %vm982_vm7, %v8711_v44  ;;  %v1761_v39 = vrot.slane %v1759_v23, 4  ;;  %v1764_v41 = vrot.slane %v1762_v28, 5  ;;  %v1776_v30 = vshll.u32 %v1728_v58, 16  ;;  %v1732_v24 = vld [vmem:[#allocation2 + $0x20] sm:$0xf] }
  0xe5   :  { %7477 = vmatprep.mubr.msk.bf16.mxu1 %vm957_vm15, %v7850_v17  ;;  %v6916_v3 = vcombine.low %v8754_v57, %v8758_v50  ;;  %v1770_v29 = vrot.slane %v1768_v60, 5  ;;  %v1775_v26 = vrot.slane %v1773_v8, 4  ;;  %v1782_v13 = vshll.u32 %v8639_v16, 16  ;;  %v8770_v17 = vld [vmem:[#allocation2 + $0x5c] sm:$0x1] }
  0xe6   :  { %v6903_v6 = vrot.slane %v2154_v14, 9  ;;  %v1765_v62 = vor.u32 %v1764_v41, %v1761_v39  ;;  %v2222_v10 = vrot.slane %v8737_v27, 5  ;;  %v6904_v45 = vrot.slane %v2155_v37, 9  ;;  %v2156_v42 = vld [vmem:[#allocation2 + $0x58] sm:$0xe] }
  0xe7   :  { %v2226_v56 = vrot.slane %v8760_v15, 5  ;;  %v1778_v55 = vrot.slane %v1776_v30, 5  ;;  %v1784_v1 = vrot.slane %v1782_v13, 5  ;;  %v1787_v11 = vshrl.u32 %v1730_v36, 16  ;;  %v2157_v5 = vld [vmem:[#allocation2 + $0x60] sm:$0xe] }
  0xe8   :  { %v1790_v20 = vshll.u32 %v1730_v36, 16  ;;  %v1766_v21 = vrot.slane %v1765_v62, 4  ;;  %v8774_v58 = vsel %vm8301_vm13, %v6903_v6, %v2222_v10  ;;  %v1796_v14 = vshll.u32 %v8654_v46, 16  ;;  %v8793_v12 = vld [vmem:[#allocation2 + $0x64] sm:$0x1] }
  0xe9   :  { %v8778_v16 = vsel %vm8301_vm13, %v6904_v45, %v2226_v56  ;;  %v1779_v23 = vor.u32 %v1778_v55, %v1775_v26  ;;  %v1789_v60 = vrot.slane %v1787_v11, 4  ;;  %v1801_v37 = vshrl.u32 %v1732_v24, 16  ;;  %v1734_v30 = vld [vmem:[#allocation2 + $0x28] sm:$0xf]  ;;  %v8821_v11 = vld [vmem:[#allocation2 + $0x6c] sm:$0x1] }
  0xea   :  { %7452 = vmatmul.mubr.msk.bf16.gmra.mxu0 %vm957_vm15, %v6850_v48  ;;  %v6917_v28 = vcombine.low %v8774_v58, %v8778_v16  ;;  %v1792_v36 = vrot.slane %v1790_v20, 5  ;;  %v1771_v46 = vsel %vm8289_vm12, %v1766_v21, %v1770_v29  ;;  %v1798_v8 = vrot.slane %v1796_v14, 5  ;;  %v8823_v20 = vld [vmem:[#allocation2 + $0x74] sm:$0x1]  ;;  %v2158_v21 = vld [vmem:[#allocation2 + $0x68] sm:$0xe] }
  0xeb   :  { %7455 = vmatprep.mubr.msk.bf16.mxu0 %vm957_vm15, %v6851_v59  ;;  %v1804_v4 = vshll.u32 %v1732_v24, 16  ;;  %v1780_v48 = vrot.slane %v1779_v23, 4  ;;  %v1810_v41 = vshll.u32 %v8656_v53, 16  ;;  %v6905_v26 = vrot.slane %v2156_v42, 9  ;;  %v1736_v53 = vld [vmem:[#allocation2 + $0x30] sm:$0xf] }
  0xec   :  { %7478 = vmatmul.mubr.msk.bf16.gmra.mxu1 %vm957_vm15, %v7851_v34  ;;  %v1793_v39 = vor.u32 %v1792_v36, %v1789_v60  ;;  %v1803_v47 = vrot.slane %v1801_v37, 4  ;;  %v2230_v59 = vrot.slane %v8770_v17, 5  ;;  %v6906_v29 = vrot.slane %v2157_v5, 9  ;;  %v2159_v34 = vld [vmem:[#allocation2 + $0x70] sm:$0xe] }
  0xed   :  { %7501 = vmatprep.mubr.msk.bf16.mxu1 %vm957_vm15, %v6914_v9  ;;  %v1806_v51 = vrot.slane %v1804_v4, 5  ;;  %v1785_v13 = vsel %vm8289_vm12, %v1780_v48, %v1784_v1  ;;  %v1812_v62 = vrot.slane %v1810_v41, 5  ;;  %v2234_v10 = vrot.slane %v8793_v12, 5  ;;  %v8851_v32 = vld [vmem:[#allocation2 + $0x7c] sm:$0x1] }
  0xee   :  { %v1794_v6 = vrot.slane %v1793_v39, 4  ;;  %v8805_v45 = vcombine.low %v1771_v46, %v1785_v13  ;;  %v8809_v33 = vsel %vm8301_vm13, %v6905_v26, %v2230_v59  ;;  %v8813_v49 = vsel %vm982_vm7, %v8711_v44, 0  ;;  %v1740_v39 = vld [vmem:[#allocation2 + $0x40] sm:$0xf]  ;;  %v2162_v58 = vld [vmem:[#allocation2 + $0x88] sm:$0xe] }
  0xef   :  { %v1807_v56 = vor.u32 %v1806_v51, %v1803_v47  ;;  %v8819_v24 = vsel %vm8301_vm13, %v6906_v29, %v2234_v10  ;;  %v1815_v55 = vshrl.u32 %v1734_v30, 16  ;;  %v1818_v1 = vshll.u32 %v1734_v30, 16  ;;  %v2160_v51 = vld [vmem:[#allocation2 + $0x78] sm:$0xe]  ;;  %v8862_v29 = vld [vmem:[#allocation2 + $0x84] sm:$0x1] }
  0xf0   :  { %v1799_v9 = vsel %vm8289_vm12, %v1794_v6, %v1798_v8  ;;  %v6918_v42 = vcombine.low %v8809_v33, %v8819_v24  ;;  %v1824_v44 = vshll.u32 %v8688_v19, 16  ;;  %v1829_v5 = vshrl.u32 %v1736_v53, 16  ;;  %v1738_v8 = vld [vmem:[#allocation2 + $0x38] sm:$0xf] }
  0xf1   :  { %v1808_v14 = vrot.slane %v1807_v56, 4  ;;  %v1817_v23 = vrot.slane %v1815_v55, 4  ;;  %v1820_v60 = vrot.slane %v1818_v1, 5  ;;  %v1832_v36 = vshll.u32 %v1736_v53, 16  ;;  %v1742_v55 = vld [vmem:[#allocation2 + $0x58] sm:$0xf] }
  0xf2   :  { %7456 = vmatmul.mubr.msk.bf16.gmra.mxu0 %vm957_vm15, %v6852_v2  ;;  %v1838_v46 = vshll.u32 %v8690_v7, 16  ;;  %v1826_v37 = vrot.slane %v1824_v44, 5  ;;  %v1831_v4 = vrot.slane %v1829_v5, 4  ;;  %v6907_v48 = vrot.slane %v2158_v21, 9  ;;  %v1744_v5 = vld [vmem:[#allocation2 + $0x60] sm:$0xf] }
  0xf3   :  { %7459 = vmatprep.mubr.msk.bf16.mxu0 %vm957_vm15, %v6853_v35  ;;  %v1813_v19 = vsel %vm8289_vm12, %v1808_v14, %v1812_v62  ;;  %v1821_v54 = vor.u32 %v1820_v60, %v1817_v23  ;;  %v1834_v2 = vrot.slane %v1832_v36, 5  ;;  %v2238_v31 = vrot.slane %v8821_v11, 5  ;;  %v2161_v62 = vld [vmem:[#allocation2 + $0x80] sm:$0xe] }
  0xf4   :  { %7502 = vmatmul.mubr.msk.bf16.vlgmr.msra.gmra.mxu1 %vm957_vm15, %v6915_v40  ;;  %v8843_v63 = vcombine.low %v1799_v9, %v1813_v19  ;;  %v1840_v7 = vrot.slane %v1838_v46, 5  ;;  %v6908_v18 = vrot.slane %v2159_v34, 9  ;;  %v2242_v35 = vrot.slane %v8823_v20, 5 }
  0xf5   :  { %7505 = vmatprep.mubr.msk.bf16.mxu1 %vm957_vm15, %v6916_v3  ;;  %v1843_v41 = vshrl.u32 %v1738_v8, 16  ;;  %v1822_v43 = vrot.slane %v1821_v54, 4  ;;  %v1835_v40 = vor.u32 %v1834_v2, %v1831_v4  ;;  %v1846_v26 = vshll.u32 %v1738_v8, 16  ;;  %v2163_v54 = vld [vmem:[#allocation2 + $0x90] sm:$0xe] }
  0xf6   :  { %v1852_v47 = vshll.u32 %v8737_v27, 16  ;;  %v8856_v59 = vsel %vm8301_vm13, %v6907_v48, %v2238_v31  ;;  %v8860_v57 = vsel %vm8301_vm13, %v6908_v18, %v2242_v35  ;;  %v1857_v3 = vshrl.u32 %v1740_v39, 16  ;;  %v8894_v48 = vld [vmem:[#allocation2 + $0x8c] sm:$0x1]  ;;  %v1746_v35 = vld [vmem:[#allocation2 + $0x68] sm:$0xf] }
  0xf7   :  { %v1845_v50 = vrot.slane %v1843_v41, 4  ;;  %v1827_v30 = vsel %vm8289_vm12, %v1822_v43, %v1826_v37  ;;  %v1836_v13 = vrot.slane %v1835_v40, 4  ;;  %v6919_v27 = vcombine.low %v8856_v59, %v8860_v57 }
  0xf8   :  { %v1848_v6 = vrot.slane %v1846_v26, 5  ;;  %v1854_v10 = vrot.slane %v1852_v47, 5  ;;  %v1859_v53 = vrot.slane %v1857_v3, 4  ;;  %v1860_v56 = vshll.u32 %v1740_v39, 16  ;;  %v1748_v47 = vld [vmem:[#allocation2 + $0x70] sm:$0xf] }
  0xf9   :  { %v1866_v9 = vshll.u32 %v8760_v15, 16  ;;  %v1841_v1 = vsel %vm8289_vm12, %v1836_v13, %v1840_v7  ;;  %v6909_v14 = vrot.slane %v2160_v51, 9  ;;  %v2246_v44 = vrot.slane %v8851_v32, 5  ;;  %v8896_v7 = vld [vmem:[#allocation2 + $0x94] sm:$0x1] }
  0xfa   :  { %7460 = vmatmul.mubr.msk.bf16.gmra.mxu0 %vm957_vm15, %v6854_v0  ;;  %v1849_v21 = vor.u32 %v1848_v6, %v1845_v50  ;;  %v6883_v34 = vcombine.low %v1827_v30, %v1841_v1  ;;  %v1862_v23 = vrot.slane %v1860_v56, 5  ;;  %v6910_v60 = vrot.slane %v2161_v62, 9  ;;  %v8905_v51 = vld [vmem:[%s11052_s1 + $0x10] sm:$0x3] }
  0xfb   :  { %7483 = vmatprep.mubr.msk.bf16.mxu0 %vm957_vm15, %v8805_v45  ;;  %v1868_v15 = vrot.slane %v1866_v9, 5  ;;  %v2247_v52 = vsel %vm8301_vm13, %v6909_v14, %v2246_v44  ;;  %v2250_v0 = vrot.slane %v8862_v29, 5  ;;  %v1871_v36 = vshrl.u32 %v1742_v55, 16  ;;  %v2625_v9 = vld [vmem:[#allocation2 + $0x10] sm:$0xf] }
  0xfc   :  { %7506 = vmatmul.mubr.msk.bf16.gmra.mxu1 %vm957_vm15, %v6917_v28  ;;  %v1850_v38 = vrot.slane %v1849_v21, 4  ;;  %v1863_v45 = vor.u32 %v1862_v23, %v1859_v53  ;;  %v1874_v46 = vshll.u32 %v1742_v55, 16  ;;  %v1880_v8 = vshll.u32 %v8770_v17, 16  ;;  %v2627_v21 = vld [vmem:[#allocation2 + $0x18] sm:$0xf] }
  0xfd   :  { %7509 = vmatprep.mubr.msk.bf16.mxu1 %vm957_vm15, %v6918_v42  ;;  %v1885_v19 = vshrl.u32 %v1744_v5, 16  ;;  %v2251_v28 = vsel %vm8301_vm13, %v6910_v60, %v2250_v0  ;;  %v1873_v37 = vrot.slane %v1871_v36, 4  ;;  %v1888_v4 = vshll.u32 %v1744_v5, 16 }
  0xfe   :  { %v1855_v16 = vsel %vm8289_vm12, %v1850_v38, %v1854_v10  ;;  %v1864_v33 = vrot.slane %v1863_v45, 4  ;;  %v6920_v24 = vcombine.low %v2247_v52, %v2251_v28  ;;  %v1876_v42 = vrot.slane %v1874_v46, 5  ;;  %v1750_v45 = vld [vmem:[#allocation2 + $0x78] sm:$0xf] }
  0xff   :  { %v1882_v2 = vrot.slane %v1880_v8, 5  ;;  %v1887_v17 = vrot.slane %v1885_v19, 4  ;;  %v1890_v39 = vrot.slane %v1888_v4, 5  ;;  %v1894_v31 = vshll.u32 %v8793_v12, 16  ;;  %v8932_v19 = vld [vmem:[#allocation2 + $0x1c] sm:$0x1] }
 0x100   :  { %v6911_v18 = vrot.slane %v2162_v58, 9  ;;  %v1869_v41 = vsel %vm8289_vm12, %v1864_v33, %v1868_v15  ;;  %v1877_v43 = vor.u32 %v1876_v42, %v1873_v37  ;;  %v2254_v40 = vrot.slane %v8894_v48, 5 }
 0x101   :  { %v6912_v26 = vrot.slane %v2163_v54, 9  ;;  %v6884_v50 = vcombine.low %v1855_v16, %v1869_v41  ;;  %v1891_v12 = vor.u32 %v1890_v39, %v1887_v17  ;;  %v1896_v3 = vrot.slane %v1894_v31, 5 }
 0x102   :  { %7484 = vmatmul.mubr.msk.bf16.vlgmr.msra.gmra.mxu0 %vm957_vm15, %v8843_v63  ;;  %v2258_v30 = vrot.slane %v8896_v7, 5  ;;  %v1878_v13 = vrot.slane %v1877_v43, 4  ;;  %v2255_v6 = vsel %vm8301_vm13, %v6911_v18, %v2254_v40  ;;  %v1899_v62 = vshrl.u32 %v1746_v35, 16 }
 0x103   :  { %7518 = vmatpush3.bf16.msra.mxu0 %v8813_v49  ;;  %7487 = vmatprep.mubr.msk.bf16.mxu0 %vm957_vm15, %v6883_v34  ;;  %v1902_v10 = vshll.u32 %v1746_v35, 16  ;;  %v1892_v63 = vrot.slane %v1891_v12, 4  ;;  %v1908_v56 = vshll.u32 %v8821_v11, 16  ;;  %v1913_v49 = vshrl.u32 %v1748_v47, 16 }
 0x104   :  { %7510 = vmatmul.mubr.msk.bf16.gmra.mxu1 %vm957_vm15, %v6919_v27  ;;  %v2259_v53 = vsel %vm8301_vm13, %v6912_v26, %v2258_v30  ;;  %7741 = vmatprep.subr.msk.bf16.mxu0 %vm982_vm7, %v8905_v51  ;;  %v1883_v55 = vsel %vm8289_vm12, %v1878_v13, %v1882_v2  ;;  %v1901_v59 = vrot.slane %v1899_v62, 4  ;;  %v8926_v27 = vld [vmem:[#allocation2 + $0x14] sm:$0x1]  ;;  %v1916_v5 = vshll.u32 %v1748_v47, 16 }
 0x105   :  { %7513 = vmatprep.mubr.msk.bf16.mxu1 %vm957_vm15, %v6920_v24  ;;  %v6921_v1 = vcombine.low %v2255_v6, %v2259_v53  ;;  %v1904_v57 = vrot.slane %v1902_v10, 5  ;;  %v1897_v14 = vsel %vm8289_vm12, %v1892_v63, %v1896_v3  ;;  %v1910_v11 = vrot.slane %v1908_v56, 5  ;;  %v2629_v3 = vld [vmem:[#allocation2 + $0x20] sm:$0xf]  ;;  %v8948_v56 = vld [vmem:[#allocation2 + $0x24] sm:$0x1] }
 0x106   :  { %v1915_v44 = vrot.slane %v1913_v49, 4  ;;  %v6885_v34 = vcombine.low %v1883_v55, %v1897_v14  ;;  %v1922_v15 = vshll.u32 %v8823_v20, 16  ;;  %v2658_v60 = vshrl.u32 %v2625_v9, 16  ;;  %v1752_v20 = vld [vmem:[#allocation2 + $0x80] sm:$0xf] }
 0x107   :  { %v1905_v23 = vor.u32 %v1904_v57, %v1901_v59  ;;  %v1918_v38 = vrot.slane %v1916_v5, 5  ;;  %v2661_v52 = vshll.u32 %v2625_v9, 16  ;;  %v2667_v0 = vshll.u32 %v8926_v27, 16  ;;  %v2631_v49 = vld [vmem:[#allocation2 + $0x28] sm:$0xf] }
 0x108   :  { %v2672_v36 = vshrl.u32 %v2627_v21, 16  ;;  %v1924_v8 = vrot.slane %v1922_v15, 5  ;;  %v2660_v58 = vrot.slane %v2658_v60, 4  ;;  %v2675_v16 = vshll.u32 %v2627_v21, 16 }
 0x109   :  { %v1906_v46 = vrot.slane %v1905_v23, 4  ;;  %v1919_v28 = vor.u32 %v1918_v38, %v1915_v44  ;;  %v2663_v37 = vrot.slane %v2661_v52, 5  ;;  %v2669_v4 = vrot.slane %v2667_v0, 5  ;;  %v1756_v0 = vld [vmem:[#allocation2 + $0x90] sm:$0xf] }
 0x10a   :  { %7488 = vmatmul.mubr.msk.bf16.gmra.mxu0 %vm957_vm15, %v6884_v50  ;;  %v2674_v54 = vrot.slane %v2672_v36, 4  ;;  %v2677_v24 = vrot.slane %v2675_v16, 5  ;;  %v2681_v42 = vshll.u32 %v8932_v19, 16  ;;  %v1927_v2 = vshrl.u32 %v1750_v45, 16 }
 0x10b   :  { %7491 = vmatprep.mubr.msk.bf16.mxu0 %vm957_vm15, %v6885_v34  ;;  %v1911_v33 = vsel %vm8289_vm12, %v1906_v46, %v1910_v11  ;;  %v1920_v17 = vrot.slane %v1919_v28, 4  ;;  %v2664_v39 = vor.u32 %v2663_v37, %v2660_v58  ;;  %v1930_v31 = vshll.u32 %v1750_v45, 16 }
 0x10c   :  { %7514 = vmatmul.mubr.msk.bf16.gmra.mxu1 %vm957_vm15, %v6921_v1  ;;  %v1936_v18 = vshll.u32 %v8851_v32, 16  ;;  %v2678_v35 = vor.u32 %v2677_v24, %v2674_v54  ;;  %v2683_v41 = vrot.slane %v2681_v42, 5  ;;  %v1929_v43 = vrot.slane %v1927_v2, 4  ;;  %v8952_v1 = vld [vmem:[#allocation2 + $0x2c] sm:$0x1] }
 0x10d   :  { %v1941_v40 = vshrl.u32 %v1752_v20, 16  ;;  %v1925_v26 = vsel %vm8289_vm12, %v1920_v17, %v1924_v8  ;;  %v2665_v47 = vrot.slane %v2664_v39, 4  ;;  %v1932_v50 = vrot.slane %v1930_v31, 5  ;;  %v2633_v24 = vld [vmem:[#allocation2 + $0x30] sm:$0xf] }
 0x10e   :  { %v1938_v12 = vrot.slane %v1936_v18, 5  ;;  %v6886_v30 = vcombine.low %v1911_v33, %v1925_v26  ;;  %v2679_v13 = vrot.slane %v2678_v35, 4  ;;  %v1944_v62 = vshll.u32 %v1752_v20, 16  ;;  %v2635_v31 = vld [vmem:[#allocation2 + $0x38] sm:$0xf] }
 0x10f   :  { %v1943_v6 = vrot.slane %v1941_v40, 4  ;;  %v2670_v10 = vsel %vm8289_vm12, %v2665_v47, %v2669_v4  ;;  %v1933_v63 = vor.u32 %v1932_v50, %v1929_v43  ;;  %v1950_v32 = vshll.u32 %v8862_v29, 16  ;;  %v8967_v26 = vld [vmem:[#allocation2 + $0x34] sm:$0x1] }
 0x110   :  { %v2932_v53 = vsel %vm982_vm7, %v8617_v61, 0  ;;  %v2684_v9 = vsel %vm8289_vm12, %v2679_v13, %v2683_v41  ;;  %v1946_v55 = vrot.slane %v1944_v62, 5  ;;  %v2686_v59 = vshrl.u32 %v2629_v3, 16  ;;  %v1754_v61 = vld [vmem:[#allocation2 + $0x88] sm:$0xf] }
 0x111   :  { %7536 = vmatpush3.bf16.msra.mxu1 %v2932_v53  ;;  %v2689_v57 = vshll.u32 %v2629_v3, 16  ;;  %v6948_v21 = vcombine.low %v2670_v10, %v2684_v9  ;;  %v1934_v14 = vrot.slane %v1933_v63, 4  ;;  %v1952_v29 = vrot.slane %v1950_v32, 5  ;;  %v2637_v32 = vld [vmem:[#allocation2 + $0x40] sm:$0xf] }
 0x112   :  { %7492 = vmatmul.mubr.msk.bf16.gmra.mxu0 %vm957_vm15, %v6886_v30  ;;  %v2695_v11 = vshll.u32 %v8948_v56, 16  ;;  %v1947_v44 = vor.u32 %v1946_v55, %v1943_v6  ;;  %v2688_v5 = vrot.slane %v2686_v59, 4  ;;  %v2700_v23 = vshrl.u32 %v2631_v49, 16  ;;  %v8969_v30 = vld [vmem:[#allocation2 + $0x3c] sm:$0x1] }
 0x113   :  { %v2691_v34 = vrot.slane %v2689_v57, 5  ;;  %7537 = vmatprep.mubr.msk.bf16.mxu1 %vm957_vm15, %v6948_v21  ;;  %v1939_v15 = vsel %vm8289_vm12, %v1934_v14, %v1938_v12  ;;  %v2703_v38 = vshll.u32 %v2631_v49, 16  ;;  %v2709_v52 = vshll.u32 %v8952_v1, 16  ;;  %v2639_v59 = vld [vmem:[#allocation2 + $0x48] sm:$0xf] }
 0x114   :  { %v2697_v60 = vrot.slane %v2695_v11, 5  ;;  %v1948_v36 = vrot.slane %v1947_v44, 4  ;;  %v2702_v46 = vrot.slane %v2700_v23, 4  ;;  %v1955_v8 = vshrl.u32 %v1754_v61, 16  ;;  %v8977_v11 = vld [vmem:[#allocation2 + $0x44] sm:$0x1] }
 0x115   :  { %v2692_v45 = vor.u32 %v2691_v34, %v2688_v5  ;;  %v2705_v58 = vrot.slane %v2703_v38, 5  ;;  %v2711_v16 = vrot.slane %v2709_v52, 5  ;;  %v1958_v28 = vshll.u32 %v1754_v61, 16  ;;  %v2641_v52 = vld [vmem:[#allocation2 + $0x60] sm:$0xf] }
 0x116   :  { %v1964_v37 = vshll.u32 %v8894_v48, 16  ;;  %v1953_v4 = vsel %vm8289_vm12, %v1948_v36, %v1952_v29  ;;  %v1957_v20 = vrot.slane %v1955_v8, 4  ;;  %v1969_v33 = vshrl.u32 %v1756_v0, 16  ;;  %v2643_v8 = vld [vmem:[#allocation2 + $0x68] sm:$0xf] }
 0x117   :  { %v2693_v54 = vrot.slane %v2692_v45, 4  ;;  %v6887_v42 = vcombine.low %v1939_v15, %v1953_v4  ;;  %v2706_v2 = vor.u32 %v2705_v58, %v2702_v46  ;;  %v1960_v17 = vrot.slane %v1958_v28, 5  ;;  %v8985_v4 = vld [vmem:[#allocation2 + $0x4c] sm:$0x1] }
 0x118   :  { %v1966_v39 = vrot.slane %v1964_v37, 5  ;;  %v1971_v35 = vrot.slane %v1969_v33, 4  ;;  %v1972_v41 = vshll.u32 %v1756_v0, 16  ;;  %v1978_v43 = vshll.u32 %v8896_v7, 16  ;;  %v7852_v37 = vld [vmem:[#allocation2 + $0x10] ss:$8 sps:$4 sm:$0xff]  }
 0x119   :  { %v2698_v18 = vsel %vm8289_vm12, %v2693_v54, %v2697_v60  ;;  %7495 = vmatprep.mubr.msk.bf16.mxu0 %vm957_vm15, %v6887_v42  ;;  %v2707_v48 = vrot.slane %v2706_v2, 4  ;;  %v1961_v40 = vor.u32 %v1960_v17, %v1957_v20  ;;  %v2714_v47 = vshrl.u32 %v2633_v24, 16  ;;  %v8988_v42 = vld [vmem:[#allocation2 + $0x64] sm:$0x1] }
 0x11a   :  { %v2717_v50 = vshll.u32 %v2633_v24, 16  ;;  %v1974_v12 = vrot.slane %v1972_v41, 5  ;;  %v1980_v3 = vrot.slane %v1978_v43, 5  ;;  %v2723_v13 = vshll.u32 %v8967_v26, 16 }
 0x11b   :  { %v2728_v6 = vshrl.u32 %v2635_v31, 16  ;;  %v2712_v62 = vsel %vm8289_vm12, %v2707_v48, %v2711_v16  ;;  %v1962_v10 = vrot.slane %v1961_v40, 4  ;;  %v2716_v7 = vrot.slane %v2714_v47, 4  ;;  %v2645_v40 = vld [vmem:[#allocation2 + $0x70] sm:$0xf] }
 0x11c   :  { %v2719_v63 = vrot.slane %v2717_v50, 5  ;;  %v6949_v53 = vcombine.low %v2698_v18, %v2712_v62  ;;  %v1975_v49 = vor.u32 %v1974_v12, %v1971_v35  ;;  %v2725_v9 = vrot.slane %v2723_v13, 5 }
 0x11d   :  { %v2730_v55 = vrot.slane %v2728_v6, 4  ;;  %v1967_v57 = vsel %vm8289_vm12, %v1962_v10, %v1966_v39  ;;  %v2731_v14 = vshll.u32 %v2635_v31, 16  ;;  %v2737_v29 = vshll.u32 %v8969_v30, 16  ;;  %v8997_v10 = vld [vmem:[#allocation2 + $0x6c] sm:$0x1] }
 0x11e   :  { %v2720_v21 = vor.u32 %v2719_v63, %v2716_v7  ;;  %7538 = vmatmul.mubr.msk.bf16.vlgmr.msra.gmra.mxu1 %vm957_vm15, %v6949_v53  ;;  %v1976_v61 = vrot.slane %v1975_v49, 4  ;;  %v2742_v44 = vshrl.u32 %v2637_v32, 16  ;;  %v2745_v5 = vshll.u32 %v2637_v32, 16  ;;  %v2647_v63 = vld [vmem:[#allocation2 + $0x78] sm:$0xf] }
 0x11f   :  { %v2751_v34 = vshll.u32 %v8977_v11, 16  ;;  %v2733_v15 = vrot.slane %v2731_v14, 5  ;;  %v2739_v60 = vrot.slane %v2737_v29, 5  ;;  %v2756_v38 = vshrl.u32 %v2639_v59, 16 }
 0x120   :  { %v2721_v23 = vrot.slane %v2720_v21, 4  ;;  %v1981_v0 = vsel %vm8289_vm12, %v1976_v61, %v1980_v3  ;;  %v2744_v36 = vrot.slane %v2742_v44, 4  ;;  %v2747_v45 = vrot.slane %v2745_v5, 5 }
 0x121   :  { %v2753_v46 = vrot.slane %v2751_v34, 5  ;;  %v6888_v58 = vcombine.low %v1967_v57, %v1981_v0  ;;  %v2734_v28 = vor.u32 %v2733_v15, %v2730_v55  ;;  %v2758_v54 = vrot.slane %v2756_v38, 4  ;;  %v7853_v57 = vld [vmem:[#allocation2 + $0x20] ss:$8 sps:$4 sm:$0xff]  }
 0x122   :  { %v2726_v16 = vsel %vm8289_vm12, %v2721_v23, %v2725_v9  ;;  %v2748_v20 = vor.u32 %v2747_v45, %v2744_v36  ;;  %v2759_v33 = vshll.u32 %v2639_v59, 16  ;;  %v2765_v24 = vshll.u32 %v8985_v4, 16  ;;  %v9002_v9 = vld [vmem:[#allocation2 + $0x74] sm:$0x1]  ;;  %v2649_v23 = vld [vmem:[#allocation2 + $0x80] sm:$0xf] }
 0x123   :  { %v2770_v2 = vshrl.u32 %v2641_v52, 16  ;;  %7496 = vmatmul.mubr.msk.bf16.gmra.mxu0 %vm957_vm15, %v6888_v58  ;;  %v2735_v17 = vrot.slane %v2734_v28, 4  ;;  %v2773_v39 = vshll.u32 %v2641_v52, 16  ;;  %v2779_v31 = vshll.u32 %v8988_v42, 16  ;;  %v2651_v0 = vld [vmem:[#allocation2 + $0x88] sm:$0xf] }
 0x124   :  { %v2784_v18 = vshrl.u32 %v2643_v8, 16  ;;  %7519 = vmatprep.mubr.msk.bf16.mxu0 %vm957_vm15, %v7852_v37  ;;  %v2749_v35 = vrot.slane %v2748_v20, 4  ;;  %v2761_v41 = vrot.slane %v2759_v33, 5  ;;  %v2767_v43 = vrot.slane %v2765_v24, 5  ;;  %v9016_v33 = vld [vmem:[#allocation2 + $0x84] sm:$0x1] }
 0x125   :  { %v2772_v48 = vrot.slane %v2770_v2, 4  ;;  %v2740_v47 = vsel %vm8289_vm12, %v2735_v17, %v2739_v60  ;;  %v2775_v50 = vrot.slane %v2773_v39, 5  ;;  %v2781_v12 = vrot.slane %v2779_v31, 5  ;;  %v7854_v60 = vld [vmem:[#allocation2 + $0x30] ss:$8 sps:$4 sm:$0xff]  }
 0x126   :  { %v2786_v3 = vrot.slane %v2784_v18, 4  ;;  %v6950_v13 = vcombine.low %v2726_v16, %v2740_v47  ;;  %v2754_v6 = vsel %vm8289_vm12, %v2749_v35, %v2753_v46  ;;  %v2762_v62 = vor.u32 %v2761_v41, %v2758_v54  ;;  %v9011_v46 = vld [vmem:[#allocation2 + $0x7c] sm:$0x1]  ;;  %v2653_v35 = vld [vmem:[#allocation2 + $0x90] sm:$0xf] }
 0x127   :  { %v2787_v7 = vshll.u32 %v2643_v8, 16  ;;  %v2776_v32 = vor.u32 %v2775_v50, %v2772_v48  ;;  %v2793_v53 = vshll.u32 %v8997_v10, 16  ;;  %v3210_v49 = vsel %vm982_vm7, %v8905_v51, 0  ;;  %v2655_v50 = vld [vmem:[#allocation2 + $0x98] sm:$0xf] }
 0x128   :  { %v2798_v55 = vshrl.u32 %v2645_v40, 16  ;;  %7541 = vmatprep.mubr.msk.bf16.mxu1 %vm957_vm15, %v6950_v13  ;;  %v2763_v59 = vrot.slane %v2762_v62, 4  ;;  %v2801_v14 = vshll.u32 %v2645_v40, 16  ;;  %v2807_v29 = vshll.u32 %v9002_v9, 16  ;;  %v9021_v40 = vld [vmem:[#allocation2 + $0x8c] sm:$0x1] }
 0x129   :  { %v2789_v21 = vrot.slane %v2787_v7, 5  ;;  %v2777_v61 = vrot.slane %v2776_v32, 4  ;;  %v2795_v44 = vrot.slane %v2793_v53, 5  ;;  %v2812_v34 = vshrl.u32 %v2647_v63, 16  ;;  %v9027_v32 = vld [vmem:[#allocation2 + $0x94] sm:$0x1] }
 0x12a   :  { %v2800_v5 = vrot.slane %v2798_v55, 4  ;;  %v2768_v15 = vsel %vm8289_vm12, %v2763_v59, %v2767_v43  ;;  %v2803_v38 = vrot.slane %v2801_v14, 5  ;;  %v2809_v52 = vrot.slane %v2807_v29, 5 }
 0x12b   :  { %v2790_v51 = vor.u32 %v2789_v21, %v2786_v3  ;;  %v6951_v36 = vcombine.low %v2754_v6, %v2768_v15  ;;  %7520 = vmatmul.mubr.msk.bf16.vlgmr.msra.gmra.mxu0 %vm957_vm15, %v7853_v57  ;;  %v2782_v45 = vsel %vm8289_vm12, %v2777_v61, %v2781_v12  ;;  %v2814_v8 = vrot.slane %v2812_v34, 4  ;;  %v7855_v3 = vld [vmem:[#allocation2 + $0x40] ss:$8 sps:$4 sm:$0xff]  }
 0x12c   :  { %v2815_v58 = vshll.u32 %v2647_v63, 16  ;;  %7554 = vmatpush3.bf16.msra.mxu0 %v3210_v49  ;;  %7523 = vmatprep.mubr.msk.bf16.mxu0 %vm957_vm15, %v7854_v60  ;;  %v2804_v28 = vor.u32 %v2803_v38, %v2800_v5  ;;  %v2821_v37 = vshll.u32 %v9011_v46, 16  ;;  %v2826_v54 = vshrl.u32 %v2649_v23, 16  ;;  %v7856_v57 = vld [vmem:[#allocation2 + $0x60] ss:$8 sps:$4 sm:$0xff]  }
 0x12d   :  { %v2791_v16 = vrot.slane %v2790_v51, 4  ;;  %7542 = vmatmul.mubr.msk.bf16.gmra.mxu1 %vm957_vm15, %v6951_v36  ;;  %v2829_v24 = vshll.u32 %v2649_v23, 16  ;;  %v2840_v2 = vshrl.u32 %v2651_v0, 16  ;;  %v2835_v18 = vshll.u32 %v9016_v33, 16  ;;  %v9034_v51 = vld [vmem:[#allocation2 + $0x9c] sm:$0x1] }
 0x12e   :  { %v2817_v20 = vrot.slane %v2815_v58, 5  ;;  %v2805_v39 = vrot.slane %v2804_v28, 4  ;;  %v2828_v31 = vrot.slane %v2826_v54, 4  ;;  %v2823_v48 = vrot.slane %v2821_v37, 5  ;;  %v3047_v37 = vld [vmem:[#allocation2 + $0x10] sm:$0xe] }
 0x12f   :  { %v2796_v17 = vsel %vm8289_vm12, %v2791_v16, %v2795_v44  ;;  %v2831_v47 = vrot.slane %v2829_v24, 5  ;;  %v2842_v13 = vrot.slane %v2840_v2, 4  ;;  %v2843_v6 = vshll.u32 %v2651_v0, 16  ;;  %v7857_v2 = vld [vmem:[#allocation2 + $0x70] ss:$8 sps:$4 sm:$0xff]  }
 0x130   :  { %v6952_v41 = vcombine.low %v2782_v45, %v2796_v17  ;;  %v2818_v43 = vor.u32 %v2817_v20, %v2814_v8  ;;  %v2810_v12 = vsel %vm8289_vm12, %v2805_v39, %v2809_v52  ;;  %v2849_v62 = vshll.u32 %v9021_v40, 16  ;;  %v7858_v17 = vld [vmem:[#allocation2 + $0x80] ss:$8 sps:$4 sm:$0xff]   ;;  %v3048_v39 = vld [vmem:[#allocation2 + $0x18] sm:$0xe] }
 0x131   :  { %v2832_v63 = vor.u32 %v2831_v47, %v2828_v31  ;;  %v2854_v53 = vshrl.u32 %v2653_v35, 16  ;;  %v2857_v49 = vshll.u32 %v2653_v35, 16  ;;  %v2837_v55 = vrot.slane %v2835_v18, 5 }
 0x132   :  { %7545 = vmatprep.mubr.msk.bf16.mxu1 %vm957_vm15, %v6952_v41  ;;  %v2819_v7 = vrot.slane %v2818_v43, 4  ;;  %v2845_v59 = vrot.slane %v2843_v6, 5  ;;  %v2863_v21 = vshll.u32 %v9027_v32, 16  ;;  %v2868_v14 = vshrl.u32 %v2655_v50, 16  ;;  %v7859_v6 = vld [vmem:[#allocation2 + $0x90] ss:$8 sps:$4 sm:$0xff]  }
 0x133   :  { %7524 = vmatmul.mubr.msk.bf16.gmra.mxu0 %vm957_vm15, %v7855_v3  ;;  %v2833_v61 = vrot.slane %v2832_v63, 4  ;;  %v2856_v44 = vrot.slane %v2854_v53, 4  ;;  %v2859_v5 = vrot.slane %v2857_v49, 5  ;;  %v2851_v15 = vrot.slane %v2849_v62, 5  ;;  %v3050_v3 = vld [vmem:[#allocation2 + $0x28] sm:$0xe] }
 0x134   :  { %v2824_v29 = vsel %vm8289_vm12, %v2819_v7, %v2823_v48  ;;  %v2846_v23 = vor.u32 %v2845_v59, %v2842_v13  ;;  %7527 = vmatprep.mubr.msk.bf16.mxu0 %vm957_vm15, %v7856_v57  ;;  %v2870_v38 = vrot.slane %v2868_v14, 4  ;;  %v2871_v52 = vshll.u32 %v2655_v50, 16  ;;  %v3052_v13 = vld [vmem:[#allocation2 + $0x38] sm:$0xe]  ;;  %v3049_v62 = vld [vmem:[#allocation2 + $0x20] sm:$0xe] }
 0x135   :  { %v6953_v34 = vcombine.low %v2810_v12, %v2824_v29  ;;  %v2860_v60 = vor.u32 %v2859_v5, %v2856_v44  ;;  %v2877_v0 = vshll.u32 %v9034_v51, 16  ;;  %v2838_v36 = vsel %vm8289_vm12, %v2833_v61, %v2837_v55  ;;  %v3051_v49 = vld [vmem:[#allocation2 + $0x30] sm:$0xe]  ;;  %v3053_v61 = vld [vmem:[#allocation2 + $0x40] sm:$0xe] }
 0x136   :  { %v2847_v45 = vrot.slane %v2846_v23, 4  ;;  %v2865_v58 = vrot.slane %v2863_v21, 5  ;;  %v2873_v16 = vrot.slane %v2871_v52, 5  ;;  %v6964_v35 = vrot.slane %v3047_v37, 9  ;;  %v3054_v44 = vld [vmem:[#allocation2 + $0x48] sm:$0xe] }
 0x137   :  { %7546 = vmatmul.mubr.msk.bf16.gmra.mxu1 %vm957_vm15, %v6953_v34  ;;  %v2861_v8 = vrot.slane %v2860_v60, 4  ;;  %v2879_v24 = vrot.slane %v2877_v0, 5  ;;  %v3097_v41 = vrot.slane %v8926_v27, 5  ;;  %v6965_v48 = vrot.slane %v3048_v39, 9  ;;  %v3056_v34 = vld [vmem:[#allocation2 + $0x68] sm:$0xe] }
 0x138   :  { %v2852_v28 = vsel %vm8289_vm12, %v2847_v45, %v2851_v15  ;;  %v2874_v20 = vor.u32 %v2873_v16, %v2870_v38  ;;  %v3101_v47 = vrot.slane %v8932_v19, 5  ;;  %v6967_v63 = vrot.slane %v3050_v3, 9  ;;  %v3058_v37 = vld [vmem:[#allocation2 + $0x78] sm:$0xe] }
 0x139   :  { %v6954_v54 = vcombine.low %v2838_v36, %v2852_v28  ;;  %v2866_v31 = vsel %vm8289_vm12, %v2861_v8, %v2865_v58  ;;  %v3098_v12 = vsel %vm8301_vm13, %v6964_v35, %v3097_v41  ;;  %v3109_v53 = vrot.slane %v8952_v1, 5 }
 0x13a   :  { %v2875_v18 = vrot.slane %v2874_v20, 4  ;;  %v3102_v27 = vsel %vm8301_vm13, %v6965_v48, %v3101_v47  ;;  %v6969_v19 = vrot.slane %v3052_v13, 9  ;;  %v3117_v55 = vrot.slane %v8969_v30, 5  ;;  %v3055_v30 = vld [vmem:[#allocation2 + $0x60] sm:$0xe] }
 0x13b   :  { %7549 = vmatprep.mubr.msk.bf16.mxu1 %vm957_vm15, %v6954_v54  ;;  %7528 = vmatmul.mubr.msk.bf16.gmra.mxu0 %vm957_vm15, %v7857_v2  ;;  %v6981_v7 = vcombine.low %v3098_v12, %v3102_v27  ;;  %v6966_v59 = vrot.slane %v3049_v62, 9  ;;  %v3105_v57 = vrot.slane %v8948_v56, 5  ;;  %v6968_v21 = vrot.slane %v3051_v49, 9  ;;  %v3060_v54 = vld [vmem:[#allocation2 + $0x88] sm:$0xe] }
 0x13c   :  { %7531 = vmatprep.mubr.msk.bf16.mxu0 %vm957_vm15, %v7858_v17  ;;  %v2880_v43 = vsel %vm8289_vm12, %v2875_v18, %v2879_v24  ;;  %v3113_v14 = vrot.slane %v8967_v26, 5  ;;  %v3110_v29 = vsel %vm8301_vm13, %v6967_v63, %v3109_v53  ;;  %v3118_v1 = vsel %vm8301_vm13, %v6969_v19, %v3117_v55 }
 0x13d   :  { %v6955_v50 = vcombine.low %v2866_v31, %v2880_v43  ;;  %v3106_v5 = vsel %vm8301_vm13, %v6966_v59, %v3105_v57  ;;  %v6970_v15 = vrot.slane %v3053_v61, 9  ;;  %v3121_v26 = vrot.slane %v8977_v11, 5  ;;  %v3057_v11 = vld [vmem:[#allocation2 + $0x70] sm:$0xe] }
 0x13e   :  { %v6982_v23 = vcombine.low %v3106_v5, %v3110_v29  ;;  %v3114_v56 = vsel %vm8301_vm13, %v6968_v21, %v3113_v14  ;;  %v6971_v38 = vrot.slane %v3054_v44, 9  ;;  %v3125_v52 = vrot.slane %v8985_v4, 5 }
 0x13f   :  { %7550 = vmatmul.mubr.msk.bf16.gmra.mxu1 %vm957_vm15, %v6955_v50  ;;  %v6983_v60 = vcombine.low %v3114_v56, %v3118_v1  ;;  %v6972_v0 = vrot.slane %v3055_v30, 9  ;;  %v3129_v36 = vrot.slane %v8988_v42, 5  ;;  %v6973_v45 = vrot.slane %v3056_v34, 9  ;;  %v3059_v42 = vld [vmem:[#allocation2 + $0x80] sm:$0xe] }
 0x140   :  { %v3133_v8 = vrot.slane %v8997_v10, 5  ;;  %v3122_v58 = vsel %vm8301_vm13, %v6970_v15, %v3121_v26  ;;  %v3126_v16 = vsel %vm8301_vm13, %v6971_v38, %v3125_v52  ;;  %v6974_v10 = vrot.slane %v3057_v11, 9  ;;  %v3062_v50 = vld [vmem:[#allocation2 + $0x98] sm:$0xe] }
 0x141   :  { %v3130_v4 = vsel %vm8301_vm13, %v6972_v0, %v3129_v36  ;;  %v6984_v20 = vcombine.low %v3122_v58, %v3126_v16  ;;  %v3137_v2 = vrot.slane %v9002_v9, 5  ;;  %v6975_v17 = vrot.slane %v3058_v37, 9  ;;  %v3061_v9 = vld [vmem:[#allocation2 + $0x90] sm:$0xe] }
 0x142   :  { %v3134_v28 = vsel %vm8301_vm13, %v6973_v45, %v3133_v8  ;;  %v3141_v39 = vrot.slane %v9011_v46, 5  ;;  %v6976_v31 = vrot.slane %v3059_v42, 9  ;;  %v3145_v18 = vrot.slane %v9016_v33, 5 }
 0x143   :  { %7532 = vmatmul.mubr.msk.bf16.gmra.mxu0 %vm957_vm15, %v7859_v6  ;;  %v6985_v24 = vcombine.low %v3130_v4, %v3134_v28  ;;  %v6977_v35 = vrot.slane %v3060_v54, 9  ;;  %v3149_v41 = vrot.slane %v9021_v40, 5  ;;  %v3138_v43 = vsel %vm8301_vm13, %v6974_v10, %v3137_v2 }
 0x144   :  { %7555 = vmatprep.mubr.msk.bf16.mxu0 %vm957_vm15, %v6981_v7  ;;  %v3142_v48 = vsel %vm8301_vm13, %v6975_v17, %v3141_v39  ;;  %v3146_v46 = vsel %vm8301_vm13, %v6976_v31, %v3145_v18  ;;  %v6978_v12 = vrot.slane %v3061_v9, 9  ;;  %v3153_v40 = vrot.slane %v9027_v32, 5 }
 0x145   :  { %v3150_v47 = vsel %vm8301_vm13, %v6977_v35, %v3149_v41  ;;  %v6986_v33 = vcombine.low %v3138_v43, %v3142_v48  ;;  %v6979_v13 = vrot.slane %v3062_v50, 9  ;;  %v3157_v6 = vrot.slane %v9034_v51, 5 }
 0x146   :  { %v6987_v3 = vcombine.low %v3146_v46, %v3150_v47  ;;  %v3154_v27 = vsel %vm8301_vm13, %v6978_v12, %v3153_v40  ;;  %vm3498_vm3 = vcmask 60416  }
 0x147   :  { %v3158_v62 = vsel %vm8301_vm13, %v6979_v13, %v3157_v6  ;;  %vm9814_vm6 = vmand %vm3498_vm3, %vm299_vm2 }
 0x148   :  { %v6988_v7 = vcombine.low %v3154_v27, %v3158_v62 }
 0x14b   :  { %7556 = vmatmul.mubr.msk.bf16.vlgmr.msra.gmra.mxu0 %vm957_vm15, %v6982_v23 }
 0x14c   :  { %7559 = vmatprep.mubr.msk.bf16.mxu0 %vm957_vm15, %v6983_v60 }
 0x153   :  { %7560 = vmatmul.mubr.msk.bf16.gmra.mxu0 %vm957_vm15, %v6984_v20 }
 0x154   :  { %7563 = vmatprep.mubr.msk.bf16.mxu0 %vm957_vm15, %v6985_v24 }
 0x15b   :  { %7564 = vmatmul.mubr.msk.bf16.gmra.mxu0 %vm957_vm15, %v6986_v33 }
 0x15c   :  { %7567 = vmatprep.mubr.msk.bf16.mxu0 %vm957_vm15, %v6987_v3 }
 0x163   :  { %7568 = vmatmul.mubr.msk.bf16.gmra.mxu0 %vm957_vm15, %v6988_v7 }
 0x16e   :  { %v7431_v63 = vpop.f32.mrf.mxu1 }
 0x170   :  { %v1184_v53 = vpop.f32.mrf.mxu1 }
 0x172   :  { %v7432_v49 = vpop.f32.mrf.mxu1 }
 0x174   :  { %v9107_v32 = vpop.f32.mrf.mxu1 }
 0x178   :  { %v7435_v19 = vpop.f32.mrf.mxu1 }
 0x17a   :  { %v1200_v51 = vpop.f32.mrf.mxu1 }
 0x17c   :  { %v7436_v55 = vpop.f32.mrf.mxu1 }
 0x17e   :  { %v9109_v59 = vpop.f32.mrf.mxu1 }
 0x17f   :  { %v7413_v57 = vpop.f32.mrf.mxu0 }
 0x180   :  { %v1193_v21 = vadd.f32 %v7431_v63, %v7413_v57 }
 0x181   :  { %v1020_v14 = vpop.f32.mrf.mxu0  ;;  %v7439_v29 = vpop.f32.mrf.mxu1 }
 0x182   :  { %v1185_v61 = vadd.f32 %v1184_v53, %v1020_v14 }
 0x183   :  { %v7414_v1 = vpop.f32.mrf.mxu0  ;;  %v1216_v44 = vpop.f32.mrf.mxu1 }
 0x184   :  { %v1196_v5 = vadd.f32 %v7432_v49, %v7414_v1 }
 0x185   :  { %v9111_v30 = vpop.f32.mrf.mxu0  ;;  %v7440_v34 = vpop.f32.mrf.mxu1 }
 0x187   :  { %v9113_v23 = vpop.f32.mrf.mxu1 }
 0x189   :  { %v7417_v56 = vpop.f32.mrf.mxu0 }
 0x18a   :  { %v1209_v15 = vadd.f32 %v7435_v19, %v7417_v56 }
 0x18b   :  { %v7443_v60 = vpop.f32.mrf.mxu1  ;;  %v1036_v26 = vpop.f32.mrf.mxu0 }
 0x18c   :  { %v1201_v38 = vadd.f32 %v1200_v51, %v1036_v26 }
 0x18d   :  { %v1232_v52 = vpop.f32.mrf.mxu1  ;;  %v7418_v0 = vpop.f32.mrf.mxu0 }
 0x18e   :  { %v1212_v36 = vadd.f32 %v7436_v55, %v7418_v0 }
 0x18f   :  { %v7444_v45 = vpop.f32.mrf.mxu1  ;;  %v9115_v8 = vpop.f32.mrf.mxu0 }
 0x191   :  { %v9117_v58 = vpop.f32.mrf.mxu1 }
 0x192   :  { %v7421_v16 = vpop.f32.mrf.mxu0 }
 0x193   :  { %v1225_v11 = vadd.f32 %v7439_v29, %v7421_v16  ;;  %v7467_v4 = vpop.f32.mrf.mxu1 }
 0x194   :  { %v1052_v28 = vpop.f32.mrf.mxu0 }
 0x195   :  { %v1217_v37 = vadd.f32 %v1216_v44, %v1052_v28  ;;  %v9119_v42 = vpop.f32.mrf.mxu1 }
 0x196   :  { %v7422_v54 = vpop.f32.mrf.mxu0 }
 0x197   :  { %v1228_v20 = vadd.f32 %v7440_v34, %v7422_v54  ;;  %v9121_v10 = vpop.f32.mrf.mxu1 }
 0x198   :  { %v9123_v24 = vpop.f32.mrf.mxu0 }
 0x199   :  { %v9125_v2 = vpop.f32.mrf.mxu1 }
 0x19a   :  { %v7425_v17 = vpop.f32.mrf.mxu0 }
 0x19b   :  { %v1241_v39 = vadd.f32 %v7443_v60, %v7425_v17  ;;  %v7471_v31 = vpop.f32.mrf.mxu1 }
 0x19c   :  { %v1068_v18 = vpop.f32.mrf.mxu0 }
 0x19d   :  { %v1233_v35 = vadd.f32 %v1232_v52, %v1068_v18  ;;  %v9127_v41 = vpop.f32.mrf.mxu1 }
 0x19e   :  { %v7426_v43 = vpop.f32.mrf.mxu0 }
 0x19f   :  { %v1244_v48 = vadd.f32 %v7444_v45, %v7426_v43  ;;  %v9129_v9 = vpop.f32.mrf.mxu1 }
 0x1a0   :  { %v9131_v46 = vpop.f32.mrf.mxu0 }
 0x1a1   :  { %v9133_v47 = vpop.f32.mrf.mxu1 }
 0x1a2   :  { %v7449_v50 = vpop.f32.mrf.mxu0 }
 0x1a3   :  { %v1514_v33 = vadd.f32 %v7449_v50, %v1193_v21 }
 0x1a4   :  { %v1449_v12 = vpop.f32.mrf.mxu0  ;;  %v7475_v3 = vpop.f32.mrf.mxu1 }
 0x1a5   :  { %v9135_v40 = vadd.f32 %v1449_v12, %v1185_v61  ;;  %v1712_v13 = vadd.f32 %v7467_v4, %v1514_v33 }
 0x1a6   :  { %v7450_v6 = vpop.f32.mrf.mxu0  ;;  %v9137_v27 = vpop.f32.mrf.mxu1 }
 0x1a7   :  { %v9139_v62 = vadd.f32 %v7450_v6, %v1196_v5 }
 0x1a8   :  { %v9141_v7 = vpop.f32.mrf.mxu0  ;;  %v9143_v63 = vpop.f32.mrf.mxu1 }
 0x1aa   :  { %v7453_v53 = vpop.f32.mrf.mxu0  ;;  %v9145_v49 = vpop.f32.mrf.mxu1 }
 0x1ab   :  { %v1518_v19 = vadd.f32 %v7453_v53, %v1209_v15 }
 0x1ac   :  { %v1465_v51 = vpop.f32.mrf.mxu0  ;;  %v7479_v55 = vpop.f32.mrf.mxu1 }
 0x1ad   :  { %v9147_v57 = vadd.f32 %v1465_v51, %v1201_v38  ;;  %v1716_v21 = vadd.f32 %v7471_v31, %v1518_v19 }
 0x1ae   :  { %v7454_v14 = vpop.f32.mrf.mxu0  ;;  %v9149_v29 = vpop.f32.mrf.mxu1 }
 0x1af   :  { %v9151_v61 = vadd.f32 %v7454_v14, %v1212_v36 }
 0x1b0   :  { %v9153_v1 = vpop.f32.mrf.mxu0  ;;  %v9155_v44 = vpop.f32.mrf.mxu1 }
 0x1b2   :  { %v7457_v5 = vpop.f32.mrf.mxu0  ;;  %v9157_v34 = vpop.f32.mrf.mxu1 }
 0x1b3   :  { %v1522_v56 = vadd.f32 %v7457_v5, %v1225_v11 }
 0x1b4   :  { %v1481_v60 = vpop.f32.mrf.mxu0  ;;  %v9159_v15 = vpop.f32.mrf.mxu1 }
 0x1b5   :  { %v9161_v26 = vadd.f32 %v1481_v60, %v1217_v37  ;;  %v1720_v38 = vadd.f32 %v7475_v3, %v1522_v56 }
 0x1b6   :  { %v7458_v52 = vpop.f32.mrf.mxu0  ;;  %v9163_v0 = vpop.f32.mrf.mxu1 }
 0x1b7   :  { %v9165_v45 = vadd.f32 %v7458_v52, %v1228_v20 }
 0x1b8   :  { %v9167_v36 = vpop.f32.mrf.mxu0  ;;  %v9169_v16 = vpop.f32.mrf.mxu1 }
 0x1ba   :  { %v7461_v4 = vpop.f32.mrf.mxu0  ;;  %v9171_v28 = vpop.f32.mrf.mxu1 }
 0x1bb   :  { %v1526_v54 = vadd.f32 %v7461_v4, %v1241_v39 }
 0x1bc   :  { %v1497_v11 = vpop.f32.mrf.mxu0  ;;  %v9173_v17 = vpop.f32.mrf.mxu1 }
 0x1bd   :  { %v9175_v31 = vadd.f32 %v1497_v11, %v1233_v35  ;;  %v1724_v37 = vadd.f32 %v7479_v55, %v1526_v54 }
 0x1be   :  { %v7462_v18 = vpop.f32.mrf.mxu0  ;;  %v9181_v20 = vpop.f32.mrf.mxu1 }
 0x1bf   :  { %v9177_v43 = vadd.f32 %v7462_v18, %v1244_v48 }
 0x1c0   :  { %v9179_v50 = vpop.f32.mrf.mxu0  ;;  %v9185_v6 = vpop.f32.mrf.mxu1 }
 0x1c2   :  { %v7485_v33 = vpop.f32.mrf.mxu0  ;;  %v9189_v53 = vpop.f32.mrf.mxu1 }
 0x1c3   :  { %v9183_v12 = vadd.f32 %v7485_v33, %v1712_v13  ;;  %11098 = vst [vmem:[#allocation8_spill] sm:$0xff] %v9189_v53 }
 0x1c4   :  { %v2069_v3 = vpop.f32.mrf.mxu0  ;;  %v9193_v48 = vpop.f32.mrf.mxu1 }
 0x1c5   :  { %11099 = vst [vmem:[#allocation10_spill] sm:$0xff] %v9193_v48 }
 0x1c6   :  { %v9187_v39 = vpop.f32.mrf.mxu0  ;;  %v9197_v5 = vpop.f32.mrf.mxu1 }
 0x1c7   :  { %11100 = vst [vmem:[#allocation13_spill] sm:$0xff] %v9197_v5 }
 0x1c8   :  { %v2072_v35 = vpop.f32.mrf.mxu0  ;;  %v9203_v52 = vpop.f32.mrf.mxu1 }
 0x1c9   :  { %11102 = vst [vmem:[#allocation12_spill] sm:$0xff] %v9203_v52 }
 0x1ca   :  { %v7489_v19 = vpop.f32.mrf.mxu0  ;;  %v9205_v4 = vpop.f32.mrf.mxu1 }
 0x1cb   :  { %v9191_v51 = vadd.f32 %v7489_v19, %v1716_v21  ;;  %11103 = vst [vmem:[#allocation14_spill] sm:$0xff] %v9205_v4 }
 0x1cc   :  { %v2085_v55 = vpop.f32.mrf.mxu0  ;;  %v9209_v21 = vpop.f32.mrf.mxu1 }
 0x1cd   :  { %11104 = vst [vmem:[#allocation15_spill] sm:$0xff] %v9209_v21 }
 0x1ce   :  { %v9195_v14 = vpop.f32.mrf.mxu0  ;;  %v9213_v18 = vpop.f32.mrf.mxu1 }
 0x1cf   :  { %11105 = vst [vmem:[#allocation16_spill] sm:$0xff] %v9213_v18 }
 0x1d0   :  { %v9199_v13 = vpop.f32.mrf.mxu0  ;;  %v9217_v19 = vpop.f32.mrf.mxu1 }
 0x1d1   :  { %11106 = vst [vmem:[#allocation17_spill] sm:$0xff] %v9217_v19 }
 0x1d2   :  { %v7493_v56 = vpop.f32.mrf.mxu0 }
 0x1d3   :  { %v9201_v60 = vadd.f32 %v7493_v56, %v1720_v38  ;;  %v9223_v56 = vpop.f32.mrf.mxu1 }
 0x1d4   :  { %v9207_v54 = vpop.f32.mrf.mxu0  ;;  %11109 = vst [vmem:[#allocation20_spill] sm:$0xff] %v9223_v56 }
 0x1d5   :  { %11101 = vst [vmem:[#allocation11_spill] sm:$0xff] %v9201_v60 }
 0x1d6   :  { %v9211_v11 = vpop.f32.mrf.mxu0 }
 0x1d8   :  { %v9215_v33 = vpop.f32.mrf.mxu0 }
 0x1de   :  { %v9229_v21 = vpop.f32.mrf.mxu1 }
 0x1df   :  { %11112 = vst [vmem:[#allocation23_spill] sm:$0xff] %v9229_v21 }
 0x1e0   :  { %v9231_v18 = vpop.f32.mrf.mxu1 }
 0x1e1   :  { %11113 = vst [vmem:[#allocation24_spill] sm:$0xff] %v9231_v18  ;;  %v1188_v18 = vadd.f32 %v9107_v32, %v9111_v30 }
 0x1e2   :  { %v9233_v19 = vpop.f32.mrf.mxu1 }
 0x1e3   :  { %v7497_v22 = vpop.f32.mrf.mxu0  ;;  %11114 = vst [vmem:[#allocation25_spill] sm:$0xff] %v9233_v19 }
 0x1e4   :  { %v9219_v25 = vadd.f32 %v7497_v22, %v1724_v37 }
 0x1e5   :  { %v9221_v38 = vpop.f32.mrf.mxu0 }
 0x1e6   :  { %11107 = vst [vmem:[#allocation18_spill] sm:$0xff] %v9219_v25  ;;  %11108 = vst [vmem:[#allocation19_spill] sm:$0xff] %v9221_v38  ;;  %v9239_v25 = vpop.f32.mrf.mxu1 }
 0x1e7   :  { %v9225_v4 = vpop.f32.mrf.mxu0  ;;  %11117 = vst [vmem:[#allocation28_spill] sm:$0xff] %v9239_v25 }
 0x1e8   :  { %11110 = vst [vmem:[#allocation21_spill] sm:$0xff] %v9225_v4 }
 0x1e9   :  { %v9227_v52 = vpop.f32.mrf.mxu0 }
 0x1ea   :  { %11111 = vst [vmem:[#allocation22_spill] sm:$0xff] %v9227_v52 }
 0x1eb   :  { %v7521_v5 = vpop.f32.mrf.mxu0 }
 0x1ed   :  { %v2546_v48 = vpop.f32.mrf.mxu0  ;;  %v9245_v52 = vpop.f32.mrf.mxu1 }
 0x1ee   :  { %11119 = vst [vmem:[#allocation30_spill] sm:$0xff] %v9245_v52  ;;  %v1710_v52 = vadd.f32 %v9119_v42, %v9135_v40 }
 0x1ef   :  { %v7522_v60 = vpop.f32.mrf.mxu0  ;;  %v9253_v19 = vpop.f32.mrf.mxu1 }
 0x1f0   :  { %11122 = vst [vmem:[#allocation33_spill] sm:$0xff] %v9253_v19  ;;  %v2132_v30 = vadd.f32 %v2069_v3, %v1710_v52  ;;  %v11126_v52 = vld [vmem:[#allocation19_spill] sm:$0xff] }
 0x1f1   :  { %v2549_v53 = vpop.f32.mrf.mxu0 }
 0x1f3   :  { %v9235_v22 = vpop.f32.mrf.mxu0 }
 0x1f4   :  { %11115 = vst [vmem:[#allocation26_spill] sm:$0xff] %v9235_v22 }
 0x1f5   :  { %v9237_v37 = vpop.f32.mrf.mxu0 }
 0x1f6   :  { %11116 = vst [vmem:[#allocation27_spill] sm:$0xff] %v9237_v37  ;;  %v1513_v37 = vadd.f32 %v9141_v7, %v1188_v18  ;;  %v1220_v7 = vadd.f32 %v9113_v23, %v9123_v24  ;;  %v1236_v18 = vadd.f32 %v9117_v58, %v9131_v46  ;;  %v1717_v58 = vadd.f32 %v9129_v9, %v9151_v61 }
 0x1f7   :  { %v9241_v56 = vpop.f32.mrf.mxu0 }
 0x1f8   :  { %v1711_v19 = vadd.f32 %v9125_v2, %v1513_v37  ;;  %v1521_v42 = vadd.f32 %v9167_v36, %v1220_v7  ;;  %v1525_v40 = vadd.f32 %v9179_v50, %v1236_v18  ;;  %v2139_v50 = vadd.f32 %v9195_v14, %v1717_v58  ;;  %v11131_v37 = vld [vmem:[#allocation13_spill] sm:$0xff]  ;;  %v11133_v7 = vld [vmem:[#allocation28_spill] sm:$0xff] }
 0x1f9   :  { %v9243_v4 = vpop.f32.mrf.mxu0 }
 0x1fa   :  { %11118 = vst [vmem:[#allocation29_spill] sm:$0xff] %v9243_v4  ;;  %v1204_v4 = vadd.f32 %v9109_v59, %v9115_v8  ;;  %v1713_v59 = vadd.f32 %v9121_v10, %v9139_v62  ;;  %v2133_v8 = vadd.f32 %v2072_v35, %v1711_v19  ;;  %v2410_v10 = vadd.f32 %v9163_v0, %v2132_v30  ;;  %v11129_v19 = vld [vmem:[#allocation11_spill] sm:$0xff] }
 0x1fb   :  { %v9247_v21 = vpop.f32.mrf.mxu0  ;;  %v1718_v62 = vadd.f32 %v9137_v27, %v9161_v26  ;;  %v1719_v0 = vadd.f32 %v9145_v49, %v1521_v42  ;;  %v1722_v27 = vadd.f32 %v9149_v29, %v9175_v31  ;;  %v1723_v26 = vadd.f32 %v9157_v34, %v1525_v40  ;;  %v11135_v40 = vld [vmem:[#allocation12_spill] sm:$0xff] }
 0x1fc   :  { %11120 = vst [vmem:[#allocation31_spill] sm:$0xff] %v9247_v21  ;;  %v9264_v21 = vpop.f32.mrf.mxu1  ;;  %v1517_v32 = vadd.f32 %v9153_v1, %v1204_v4  ;;  %v1714_v1 = vadd.f32 %v9127_v41, %v9147_v57  ;;  %v2135_v23 = vadd.f32 %v9187_v39, %v1713_v59  ;;  %v1721_v41 = vadd.f32 %v9143_v63, %v9165_v45  ;;  %v11134_v59 = vld [vmem:[#allocation26_spill] sm:$0xff] }
 0x1fd   :  { %v9249_v38 = vpop.f32.mrf.mxu0  ;;  %v2412_v57 = vadd.f32 %v9159_v15, %v9183_v12  ;;  %v2609_v61 = vadd.f32 %v2546_v48, %v2410_v10  ;;  %v1725_v63 = vadd.f32 %v9155_v44, %v9177_v43  ;;  %v2140_v12 = vadd.f32 %v9207_v54, %v1718_v62  ;;  %v11137_v10 = vld [vmem:[#allocation18_spill] sm:$0xff] }
 0x1fe   :  { %11121 = vst [vmem:[#allocation32_spill] sm:$0xff] %v9249_v38  ;;  %v9282_v2 = vpop.f32.mrf.mxu1  ;;  %v1715_v24 = vadd.f32 %v9133_v47, %v1517_v32  ;;  %v2136_v46 = vadd.f32 %v2085_v55, %v1714_v1  ;;  %v2411_v47 = vadd.f32 %v9171_v28, %v2133_v8  ;;  %v2413_v35 = vadd.f32 %v9169_v16, %v2135_v23  ;;  %v11124_v55 = vld [vmem:[#allocation8_spill] sm:$0xff]  ;;  %v11132_v32 = vld [vmem:[#allocation23_spill] sm:$0xff]  ;;  %v11136_v23 = vld [vmem:[#allocation14_spill] sm:$0xff] }
 0x1ff   :  { %v9255_v22 = vpop.f32.mrf.mxu0  ;;  %v2611_v39 = vadd.f32 %v7521_v5, %v2412_v57  ;;  %v2143_v49 = vadd.f32 %v9211_v11, %v1721_v41  ;;  %v2141_v48 = vadd.f32 %v9215_v33, %v1719_v0  ;;  %v2416_v29 = vadd.f32 %v9173_v17, %v9191_v51  ;;  %v11128_v11 = vld [vmem:[#allocation27_spill] sm:$0xff]  ;;  %v11130_v17 = vld [vmem:[#allocation10_spill] sm:$0xff]  ;;  %v11139_v57 = vld [vmem:[#allocation25_spill] sm:$0xff] }
 0x200   :  { %v2137_v9 = vadd.f32 %v9199_v13, %v1715_v24  ;;  %v9308_v15 = vpop.f32.mrf.mxu1  ;;  %v2610_v28 = vadd.f32 %v2549_v53, %v2411_v47  ;;  %v2414_v44 = vadd.f32 %v9181_v20, %v2136_v46  ;;  %v2612_v31 = vadd.f32 %v7522_v60, %v2413_v35  ;;  %v11125_v13 = vld [vmem:[#allocation24_spill] sm:$0xff]  ;;  %v11127_v53 = vld [vmem:[#allocation21_spill] sm:$0xff]  ;;  %v11138_v46 = vld [vmem:[#allocation15_spill] sm:$0xff] }
 0x201   :  { %v9258_v25 = vpop.f32.mrf.mxu0  ;;  %v2417_v43 = vadd.f32 %v9185_v6, %v2139_v50  ;;  %v3031_v5 = vadd.f32 %v11125_v13, %v2609_v61  ;;  %v2144_v16 = vadd.f32 %v11126_v52, %v1722_v27  ;;  %v2147_v4 = vadd.f32 %v11127_v53, %v1725_v63  ;;  %v11140_v61 = vld [vmem:[#allocation22_spill] sm:$0xff]  ;;  %v11141_v0 = vld [vmem:[#allocation16_spill] sm:$0xff]  ;;  %v11142_v63 = vld [vmem:[#allocation17_spill] sm:$0xff] }
 0x202   :  { %11123 = vst [vmem:[#allocation34_spill] sm:$0xff] %v9258_v25  ;;  %v2415_v14 = vadd.f32 %v11124_v55, %v2137_v9  ;;  %v9322_v54 = vpop.f32.mrf.mxu1  ;;  %v2613_v33 = vadd.f32 %v11128_v11, %v2414_v44  ;;  %v2420_v51 = vadd.f32 %v11130_v17, %v11129_v19  ;;  %v2418_v60 = vadd.f32 %v11131_v37, %v2140_v12  ;;  %v11143_v35 = vld [vmem:[#allocation33_spill] sm:$0xff] }
 0x203   :  { %v9266_v38 = vpop.f32.mrf.mxu0  ;;  %v3033_v6 = vadd.f32 %v11132_v32, %v2611_v39  ;;  %v3032_v18 = vadd.f32 %v11133_v7, %v2610_v28  ;;  %v2615_v8 = vadd.f32 %v11134_v59, %v2416_v29  ;;  %v2616_v42 = vadd.f32 %v9241_v56, %v2417_v43  ;;  %v11149_v19 = vld [vmem:[#allocation31_spill] sm:$0xff]  ;;  %v3530_v59 = vld [vmem:[#allocation3 + $0x38] sm:$0x1] }
 0x204   :  { %v2421_v1 = vadd.f32 %v11135_v40, %v2143_v49  ;;  %v9336_v58 = vadd.f32 %v11136_v23, %v2141_v48  ;;  %v9340_v62 = vadd.f32 %v11138_v46, %v11137_v10  ;;  %v3034_v50 = vadd.f32 %v11139_v57, %v2612_v31  ;;  %v9350_v56 = vpop.f32.mrf.mxu1  ;;  %v3533_v40 = vld [vmem:[#allocation3 + $0x40] sm:$0x1] }
 0x205   :  { %v9274_v25 = vpop.f32.mrf.mxu0  ;;  %v9348_v47 = vadd.f32 %v11140_v61, %v1723_v26  ;;  %v9353_v27 = vadd.f32 %v11141_v0, %v2144_v16  ;;  %v9356_v12 = vadd.f32 %v11142_v63, %v2147_v4  ;;  %v3035_v28 = vadd.f32 %v11143_v35, %v2613_v33  ;;  %v3524_v4 = vld [vmem:[#allocation3 + $0x28] sm:$0x1] }
 0x206   :  { %v3038_v55 = vadd.f32 %v9264_v21, %v2616_v42  ;;  %v11148_v11 = vmov 0   ;;  %v9390_v33 = vpop.f32.mrf.mxu1  ;;  %v2619_v17 = vadd.f32 %v11149_v19, %v2420_v51  ;;  %v3525_v7 = vsel %vm9370_vm4, 0, %v3524_v4  ;;  %v3542_v63 = vld [vmem:[#allocation3 + $0x68] sm:$0x1] }
 0x207   :  { %v9284_v3 = vpop.f32.mrf.mxu0  ;;  %3499 = vst.msk [vmem:[#allocation3] sm:$0xf] %vm3498_vm3, %v11148_v11  ;;  %3502 = vst.msk [vmem:[#allocation3 + $0x50] sm:$0xf] %vm3498_vm3, %v11148_v11  ;;  %v2620_v23 = vadd.f32 %v9255_v22, %v2421_v1  ;;  %v3534_v57 = vsel %vm9370_vm4, 0, %v3533_v40 }
 0x208   :  { %3505 = vst.msk [vmem:[#allocation3 + $0x48] sm:$0xf] %vm3498_vm3, %v11148_v11  ;;  %3507 = vst.msk [vmem:[#allocation3 + $0x98] sm:$0xf] %vm3498_vm3, %v11148_v11  ;;  %v3041_v4 = vadd.f32 %v9308_v15, %v2619_v17  ;;  %v3554_v19 = vld [vmem:[#allocation3 + $0x88] sm:$0x1] }
 0x209   :  { %v9297_v36 = vpop.f32.mrf.mxu0  ;;  %3526 = vst [vmem:[#allocation3 + $0x28] sm:$0x1] %v3525_v7  ;;  %3535 = vst [vmem:[#allocation3 + $0x40] sm:$0x1] %v3534_v57  ;;  %v11151_v35 = vld [vmem:[#allocation34_spill] sm:$0xff]  ;;  %v2621_v7 = vadd.f32 %v9274_v25, %v9353_v27 }
 0x20a   :  { %v3564_v17 = vld [vmem:[#allocation3 + $0x14] sm:$0x1]  ;;  %v3573_v27 = vld [vmem:[#allocation3 + $0x2c] sm:$0x1] }
 0x20b   :  { %v7557_v45 = vpop.f32.mrf.mxu0 }
 0x20c   :  { %v9342_v41 = vadd.f32 %v7557_v45, %v3033_v6  ;;  %v11144_v45 = vld [vmem:[#allocation29_spill] sm:$0xff] }
 0x20d   :  { %v3246_v34 = vpop.f32.mrf.mxu0  ;;  %v2614_v49 = vadd.f32 %v11144_v45, %v2415_v14  ;;  %v3515_v14 = vld [vmem:[#allocation3 + $0x10] sm:$0x1] }
 0x20e   :  { %v9329_v30 = vadd.f32 %v3246_v34, %v3031_v5  ;;  %v11145_v34 = vld [vmem:[#allocation30_spill] sm:$0xff]  ;;  %v3329_v52 = vsel %vm3325_vm0, %v9342_v41, 0.0  ;;  %v3516_v53 = vsel %vm9370_vm4, 0, %v3515_v14 }
 0x20f   :  { %v7558_v20 = vpop.f32.mrf.mxu0  ;;  %v3037_v31 = vadd.f32 %v11145_v34, %v2615_v8  ;;  %v3518_v5 = vld [vmem:[#allocation3 + $0x18] sm:$0x1]  ;;  %3517 = vst [vmem:[#allocation3 + $0x10] sm:$0x1] %v3516_v53  ;;  %v3036_v42 = vadd.f32 %v9282_v2, %v2614_v49 }
 0x210   :  { %v3326_v48 = vsel %vm3325_vm0, %v9329_v30, 0.0  ;;  %v9362_v29 = vadd.f32 %v7558_v20, %v3034_v50  ;;  %v3519_v21 = vsel %vm9370_vm4, 0, %v3518_v5  ;;  %v11150_v20 = vld [vmem:[#allocation32_spill] sm:$0xff]  ;;  %v3536_v2 = vld [vmem:[#allocation3 + $0x58] sm:$0x1] }
 0x211   :  { %v3249_v24 = vpop.f32.mrf.mxu0  ;;  %v2617_v37 = vadd.f32 %v11150_v20, %v2418_v60  ;;  %3520 = vst [vmem:[#allocation3 + $0x18] sm:$0x1] %v3519_v21  ;;  %v3531_v60 = vsel %vm9370_vm4, 0, %v3530_v59  ;;  %v3539_v50 = vld [vmem:[#allocation3 + $0x60] sm:$0x1]  ;;  %v3537_v22 = vsel %vm9370_vm4, 0, %v3536_v2  ;;  %v3042_v59 = vadd.f32 %v9350_v56, %v2620_v23 }
 0x212   :  { %v9345_v9 = vadd.f32 %v3249_v24, %v3032_v18  ;;  %v3527_v18 = vld [vmem:[#allocation3 + $0x30] sm:$0x1]  ;;  %v3331_v8 = vsel %vm3325_vm0, %v9362_v29, 0.0  ;;  %3532 = vst [vmem:[#allocation3 + $0x38] sm:$0x1] %v3531_v60  ;;  %v3540_v1 = vsel %vm9370_vm4, 0, %v3539_v50  ;;  %v2623_v23 = vadd.f32 %v9266_v38, %v9340_v62 }
 0x213   :  { %v7561_v39 = vpop.f32.mrf.mxu0  ;;  %v3528_v51 = vsel %vm9370_vm4, 0, %v3527_v18  ;;  %3538 = vst [vmem:[#allocation3 + $0x58] sm:$0x1] %v3537_v22  ;;  %3541 = vst [vmem:[#allocation3 + $0x60] sm:$0x1] %v3540_v1 }
 0x214   :  { %v3327_v26 = vsel %vm3325_vm0, %v9345_v9, 0.0  ;;  %v9404_v24 = vadd.f32 %v7561_v39, %v3037_v31  ;;  %3529 = vst [vmem:[#allocation3 + $0x30] sm:$0x1] %v3528_v51  ;;  %v9416_v39 = vpop.f32.mrf.mxu1  ;;  %v3548_v34 = vld [vmem:[#allocation3 + $0x78] sm:$0x1] }
 0x215   :  { %v3328_v44 = vadd.f32 %v3327_v26, %v3326_v48  ;;  %v3262_v43 = vpop.f32.mrf.mxu0  ;;  %v3039_v48 = vadd.f32 %v9322_v54, %v2617_v37  ;;  %v3543_v26 = vsel %vm9370_vm4, 0, %v3542_v63  ;;  %v3549_v14 = vsel %vm9370_vm4, 0, %v3548_v34  ;;  %v3551_v5 = vld [vmem:[#allocation3 + $0x80] sm:$0x1]  ;;  %v3557_v20 = vld [vmem:[#allocation3 + $0x90] sm:$0x1] }
 0x216   :  { %v9376_v16 = vadd.f32 %v3262_v43, %v3035_v28  ;;  %v2618_v28 = vadd.f32 %v11151_v35, %v9336_v58  ;;  %3544 = vst [vmem:[#allocation3 + $0x68] sm:$0x1] %v3543_v26  ;;  %3550 = vst [vmem:[#allocation3 + $0x78] sm:$0x1] %v3549_v14  ;;  %v3337_v37 = vsel %vm3325_vm0, %v9404_v24, 0.0  ;;  %v3558_v15 = vsel %vm9370_vm4, 0, %v3557_v20 }
 0x217   :  { %v3330_v32 = vadd.f32 %v3329_v52, %v3328_v44  ;;  %v7562_v6 = vpop.f32.mrf.mxu0  ;;  %v3545_v44 = vld [vmem:[#allocation3 + $0x70] sm:$0x1]  ;;  %v11154_v52 = vld [vmem:[#allocation20_spill] sm:$0xff]  ;;  %3559 = vst [vmem:[#allocation3 + $0x90] sm:$0x1] %v3558_v15 }
 0x218   :  { %v3333_v61 = vsel %vm3325_vm0, %v9376_v16, 0.0  ;;  %v9429_v43 = vadd.f32 %v7562_v6, %v3038_v55  ;;  %v3546_v54 = vsel %vm9370_vm4, 0, %v3545_v44  ;;  %v2423_v53 = vadd.f32 %v11154_v52, %v9348_v47  ;;  %v3016_v6 = vpop.f32.mrf.mxu1  ;;  %v3567_v51 = vld [vmem:[#allocation3 + $0x1c] sm:$0x1]  ;;  %v3570_v60 = vld [vmem:[#allocation3 + $0x24] sm:$0x1] }
 0x219   :  { %v3332_v10 = vadd.f32 %v3331_v8, %v3330_v32  ;;  %v3265_v46 = vpop.f32.mrf.mxu0  ;;  %3547 = vst [vmem:[#allocation3 + $0x70] sm:$0x1] %v3546_v54  ;;  %v3552_v55 = vsel %vm9370_vm4, 0, %v3551_v5  ;;  %v3555_v47 = vsel %vm9370_vm4, 0, %v3554_v19  ;;  %v3568_v25 = vsel %vm9425_vm1, 0, %v3567_v51 }
 0x21a   :  { %v9410_v0 = vadd.f32 %v3265_v46, %v3036_v42  ;;  %3553 = vst [vmem:[#allocation3 + $0x80] sm:$0x1] %v3552_v55  ;;  %3556 = vst [vmem:[#allocation3 + $0x88] sm:$0x1] %v3555_v47  ;;  %v3565_v42 = vsel %vm9425_vm1, 0, %v3564_v17  ;;  %v3339_v40 = vsel %vm3325_vm0, %v9429_v43, 0.0  ;;  %v7552_v35 = vpop.f32.mrf.mxu1  ;;  %v2624_v52 = vadd.f32 %v9284_v3, %v9356_v12 }
 0x21b   :  { %v3334_v45 = vadd.f32 %v3333_v61, %v3332_v10  ;;  %v7565_v49 = vpop.f32.mrf.mxu0  ;;  %v3040_v10 = vadd.f32 %v9390_v33, %v2618_v28  ;;  %3566 = vst [vmem:[#allocation3 + $0x14] sm:$0x1] %v3565_v42  ;;  %v3571_v56 = vsel %vm9425_vm1, 0, %v3570_v60  ;;  %3569 = vst [vmem:[#allocation3 + $0x1c] sm:$0x1] %v3568_v25  ;;  %v3574_v33 = vsel %vm9425_vm1, 0, %v3573_v27 }
 0x21c   :  { %v3335_v58 = vsel %vm3325_vm0, %v9410_v0, 0.0  ;;  %v9464_v46 = vadd.f32 %v7565_v49, %v3041_v4  ;;  %3572 = vst [vmem:[#allocation3 + $0x24] sm:$0x1] %v3571_v56  ;;  %v3576_v50 = vld [vmem:[#allocation3 + $0x34] sm:$0x1]  ;;  %v2622_v28 = vadd.f32 %v9297_v36, %v2423_v53  ;;  %v3019_v47 = vpop.f32.mrf.mxu1  ;;  %v3045_v17 = vadd.f32 %v9416_v39, %v2623_v23 }
 0x21d   :  { %v3336_v21 = vadd.f32 %v3335_v58, %v3334_v45  ;;  %v3278_v11 = vpop.f32.mrf.mxu0  ;;  %v3579_v61 = vld [vmem:[#allocation3 + $0x3c] sm:$0x1]  ;;  %3575 = vst [vmem:[#allocation3 + $0x2c] sm:$0x1] %v3574_v33  ;;  %v3577_v38 = vsel %vm9425_vm1, 0, %v3576_v50  ;;  %v3046_v56 = vadd.f32 %v7552_v35, %v2624_v52 }
 0x21e   :  { %v9444_v32 = vadd.f32 %v3278_v11, %v3039_v48  ;;  %v3580_v62 = vsel %vm9425_vm1, 0, %v3579_v61  ;;  %v3582_v63 = vld [vmem:[#allocation3 + $0x44] sm:$0x1]  ;;  %v3043_v48 = vadd.f32 %v3016_v6, %v2621_v7  ;;  %3578 = vst [vmem:[#allocation3 + $0x34] sm:$0x1] %v3577_v38  ;;  %v3345_v19 = vsel %vm3325_vm0, %v9464_v46, 0.0 }
 0x21f   :  { %v3338_v18 = vadd.f32 %v3337_v37, %v3336_v21  ;;  %v7566_v8 = vpop.f32.mrf.mxu0  ;;  %3581 = vst [vmem:[#allocation3 + $0x3c] sm:$0x1] %v3580_v62  ;;  %v3583_v26 = vsel %vm9425_vm1, 0, %v3582_v63  ;;  %v3585_v44 = vld [vmem:[#allocation3 + $0x5c] sm:$0x1]  ;;  %v3044_v42 = vadd.f32 %v3019_v47, %v2622_v28 }
 0x220   :  { %v3341_v22 = vsel %vm3325_vm0, %v9444_v32, 0.0  ;;  %v3588_v34 = vld [vmem:[#allocation3 + $0x64] sm:$0x1]  ;;  %v9479_v58 = vadd.f32 %v7566_v8, %v3042_v59  ;;  %3584 = vst [vmem:[#allocation3 + $0x44] sm:$0x1] %v3583_v26  ;;  %v3586_v14 = vsel %vm9425_vm1, 0, %v3585_v44 }
 0x221   :  { %v3340_v57 = vadd.f32 %v3339_v40, %v3338_v18  ;;  %v3281_v2 = vpop.f32.mrf.mxu0  ;;  %v3589_v36 = vsel %vm9425_vm1, 0, %v3588_v34  ;;  %v3591_v5 = vld [vmem:[#allocation3 + $0x6c] sm:$0x1]  ;;  %3587 = vst [vmem:[#allocation3 + $0x5c] sm:$0x1] %v3586_v14 }
 0x222   :  { %v9470_v1 = vadd.f32 %v3281_v2, %v3040_v10  ;;  %3590 = vst [vmem:[#allocation3 + $0x64] sm:$0x1] %v3589_v36  ;;  %v3592_v4 = vsel %vm9425_vm1, 0, %v3591_v5  ;;  %v3594_v11 = vld [vmem:[#allocation3 + $0x74] sm:$0x1]  ;;  %v3347_v8 = vsel %vm3325_vm0, %v9479_v58, 0.0 }
 0x223   :  { %v3342_v45 = vadd.f32 %v3341_v22, %v3340_v57  ;;  %v7569_v49 = vpop.f32.mrf.mxu0  ;;  %v3597_v55 = vld [vmem:[#allocation3 + $0x7c] sm:$0x1]  ;;  %3593 = vst [vmem:[#allocation3 + $0x6c] sm:$0x1] %v3592_v4  ;;  %v3595_v37 = vsel %vm9425_vm1, 0, %v3594_v11 }
 0x224   :  { %v3343_v54 = vsel %vm3325_vm0, %v9470_v1, 0.0  ;;  %v3598_v3 = vsel %vm9425_vm1, 0, %v3597_v55  ;;  %v3600_v12 = vld [vmem:[#allocation3 + $0x84] sm:$0x1]  ;;  %3596 = vst [vmem:[#allocation3 + $0x74] sm:$0x1] %v3595_v37  ;;  %v3323_v10 = vadd.f32 %v7569_v49, %v3045_v17 }
 0x225   :  { %v3344_v53 = vadd.f32 %v3343_v54, %v3342_v45  ;;  %v3294_v21 = vpop.f32.mrf.mxu0  ;;  %3599 = vst [vmem:[#allocation3 + $0x7c] sm:$0x1] %v3598_v3  ;;  %v3601_v7 = vsel %vm9425_vm1, 0, %v3600_v12  ;;  %v3603_v18 = vld [vmem:[#allocation3 + $0x8c] sm:$0x1] }
 0x226   :  { %v9493_v20 = vadd.f32 %v3294_v21, %v3043_v48  ;;  %v3606_v59 = vld [vmem:[#allocation3 + $0x94] sm:$0x1]  ;;  %3602 = vst [vmem:[#allocation3 + $0x84] sm:$0x1] %v3601_v7  ;;  %v3604_v51 = vsel %vm9425_vm1, 0, %v3603_v18  ;;  %v3353_v50 = vsel %vm3325_vm0, %v3323_v10, 0.0 }
 0x227   :  { %v3346_v15 = vadd.f32 %v3345_v19, %v3344_v53  ;;  %v7570_v6 = vpop.f32.mrf.mxu0  ;;  %v3607_v60 = vsel %vm9425_vm1, 0, %v3606_v59  ;;  %3605 = vst [vmem:[#allocation3 + $0x8c] sm:$0x1] %v3604_v51  ;;  %v7014_v35 = vld [vmem:[%s11055_s4 + $0x4] sm:$0xf] }
 0x228   :  { %3608 = vst [vmem:[#allocation3 + $0x94] sm:$0x1] %v3607_v60  ;;  %v3349_v25 = vsel %vm3325_vm0, %v9493_v20, 0.0  ;;  %v3324_v57 = vadd.f32 %v7570_v6, %v3046_v56  ;;  %7742 = vmatprep.subr.msk.bf16.mxu1 %vm4238_vm5, %v7014_v35  ;;  %v4240_v49 = vsel %vm4238_vm5, %v7014_v35, 0  ;;  %v3947_v48 = vld [vmem:[%s11055_s4] sm:$0xf] }
 0x229   :  { %v3348_v39 = vadd.f32 %v3347_v8, %v3346_v15  ;;  %v3297_v40 = vpop.f32.mrf.mxu0  ;;  %v3512_v26 = vld [vmem:[#allocation3 + $0x8] sm:$0x1]  ;;  %7572 = vmatpush3.bf16.msra.mxu1 %v4240_v49  ;;  %7743 = vmatprep.subr.msk.bf16.mxu0 %vm4238_vm5, %v3947_v48  ;;  %v4404_v44 = vsel %vm4238_vm5, %v3947_v48, 0  ;;  %v3521_v47 = vld [vmem:[#allocation3 + $0x20] sm:$0x1] }
 0x22a   :  { %v9510_v27 = vadd.f32 %v3297_v40, %v3044_v42  ;;  %v3355_v22 = vsel %vm3325_vm0, %v3324_v57, 0.0  ;;  %v3513_v34 = vsel %vm9370_vm4, 0, %v3512_v26  ;;  %7590 = vmatpush3.bf16.msra.mxu0 %v4404_v44  ;;  %v9581_v3 = vld [vmem:[%s11055_s4 + $0x8] sm:$0xf]  ;;  %v3561_v15 = vld [vmem:[#allocation3 + $0xc] sm:$0x1] }
 0x22b   :  { %v3350_v23 = vadd.f32 %v3349_v25, %v3348_v39  ;;  %3514 = vst [vmem:[#allocation3 + $0x8] sm:$0x1] %v3513_v34  ;;  %7744 = vmatprep.subr.msk.bf16.mxu1 %vm4238_vm5, %v9581_v3  ;;  %v3522_v59 = vsel %vm9370_vm4, 0, %v3521_v47  ;;  %v3562_v8 = vsel %vm9425_vm1, 0, %v3561_v15  ;;  %v7080_v49 = vld [vmem:[%s11055_s4 + $0xc] sm:$0xf] }
 0x22c   :  { %v3351_v2 = vsel %vm3325_vm0, %v9510_v27, 0.0  ;;  %3523 = vst [vmem:[#allocation3 + $0x20] sm:$0x1] %v3522_v59  ;;  %3563 = vst [vmem:[#allocation3 + $0xc] sm:$0x1] %v3562_v8  ;;  %7745 = vmatprep.subr.msk.bf16.mxu0 %vm4238_vm5, %v7080_v49 }
 0x22d   :  { %v3352_v33 = vadd.f32 %v3351_v2, %v3350_v23  ;;  %v9639_v59 = vld [vmem:[#allocation3 + $0x50] sm:$0xf] }
 0x22f   :  { %v3354_v61 = vadd.f32 %v3353_v50, %v3352_v33 }
 0x231   :  { %v3356_v38 = vadd.f32 %v3355_v22, %v3354_v61 }
 0x233   :  { %v3357_v62 = vrot.slane %v3356_v38, 4 }
 0x235   :  { %v3358_v63 = vadd.f32 %v3357_v62, %v3356_v38 }
 0x237   :  { %v3359_v28 = vrot.slane %v3358_v63, 2 }
 0x239   :  { %v3360_v45 = vadd.f32 %v3359_v28, %v3358_v63 }
 0x23b   :  { %v3361_v54 = vrot.slane %v3360_v45, 1 }
 0x23d   :  { %v3362_v14 = vadd.f32 %v3361_v54, %v3360_v45 }
 0x23f   :  { %v3364_v36 = vmul.f32 0.0078125, %v3362_v14 }
 0x241   :  { %v9529_v5 = vsub.f32 %v9329_v30, %v3364_v36  ;;  %v9532_v52 = vsub.f32 %v9345_v9, %v3364_v36  ;;  %v9535_v53 = vsub.f32 %v9342_v41, %v3364_v36  ;;  %v9538_v21 = vsub.f32 %v9362_v29, %v3364_v36 }
 0x242   :  { %v9541_v4 = vsub.f32 %v9376_v16, %v3364_v36  ;;  %v9544_v11 = vsub.f32 %v9404_v24, %v3364_v36  ;;  %v9547_v55 = vsub.f32 %v9429_v43, %v3364_v36  ;;  %v9550_v30 = vsub.f32 %v9444_v32, %v3364_v36 }
 0x243   :  { %v9553_v9 = vsub.f32 %v9464_v46, %v3364_v36  ;;  %v9556_v41 = vsub.f32 %v9479_v58, %v3364_v36  ;;  %v9559_v29 = vsub.f32 %v9493_v20, %v3364_v36  ;;  %v9561_v16 = vsub.f32 %v3323_v10, %v3364_v36 }
 0x244   :  { %v9563_v19 = vsub.f32 %v3324_v57, %v3364_v36  ;;  %v3381_v24 = vmul.f32 %v9529_v5, %v9529_v5  ;;  %v3382_v43 = vmul.f32 %v9532_v52, %v9532_v52  ;;  %v3383_v32 = vmul.f32 %v9535_v53, %v9535_v53 }
 0x245   :  { %v9572_v46 = vsub.f32 %v9410_v0, %v3364_v36  ;;  %v3384_v58 = vmul.f32 %v9538_v21, %v9538_v21  ;;  %v3385_v0 = vmul.f32 %v9541_v4, %v9541_v4  ;;  %v3387_v51 = vmul.f32 %v9544_v11, %v9544_v11 }
 0x246   :  { %v3397_v20 = vsel %vm3325_vm0, %v3381_v24, 0.0  ;;  %v3398_v37 = vsel %vm3325_vm0, %v3382_v43, 0.0  ;;  %v3400_v17 = vsel %vm3325_vm0, %v3383_v32, 0.0  ;;  %v9599_v40 = vsub.f32 %v9470_v1, %v3364_v36 }
 0x247   :  { %v3399_v12 = vadd.f32 %v3398_v37, %v3397_v20  ;;  %v3386_v7 = vmul.f32 %v9572_v46, %v9572_v46  ;;  %v3402_v18 = vsel %vm3325_vm0, %v3384_v58, 0.0  ;;  %v3404_v60 = vsel %vm3325_vm0, %v3385_v0, 0.0 }
 0x248   :  { %v3388_v10 = vmul.f32 %v9547_v55, %v9547_v55  ;;  %v3389_v31 = vmul.f32 %v9550_v30, %v9550_v30  ;;  %v3408_v23 = vsel %vm3325_vm0, %v3387_v51, 0.0  ;;  %v3390_v2 = vmul.f32 %v9599_v40, %v9599_v40 }
 0x249   :  { %v3401_v6 = vadd.f32 %v3400_v17, %v3399_v12  ;;  %v3406_v25 = vsel %vm3325_vm0, %v3386_v7, 0.0  ;;  %v3391_v1 = vmul.f32 %v9553_v9, %v9553_v9  ;;  %v9614_v38 = vsub.f32 %v9510_v27, %v3364_v36 }
 0x24a   :  { %v3410_v33 = vsel %vm3325_vm0, %v3388_v10, 0.0  ;;  %v3412_v61 = vsel %vm3325_vm0, %v3389_v31, 0.0  ;;  %v3392_v62 = vmul.f32 %v9556_v41, %v9556_v41  ;;  %v3414_v63 = vsel %vm3325_vm0, %v3390_v2, 0.0  ;;  %v3948_v2 = vld [vmem:[#allocation3 + $0x4] sm:$0x1] }
 0x24b   :  { %v3403_v42 = vadd.f32 %v3402_v18, %v3401_v6  ;;  %v3393_v35 = vmul.f32 %v9559_v29, %v9559_v29  ;;  %v3416_v45 = vsel %vm3325_vm0, %v3391_v1, 0.0  ;;  %v3394_v27 = vmul.f32 %v9614_v38, %v9614_v38  ;;  %v9637_v18 = vld [vmem:[#allocation3] sm:$0xf] }
 0x24c   :  { %v3418_v26 = vsel %vm3325_vm0, %v3392_v62, 0.0  ;;  %v3395_v34 = vmul.f32 %v9561_v16, %v9561_v16  ;;  %v3396_v36 = vmul.f32 %v9563_v19, %v9563_v19  ;;  %v3968_v51 = vshll.u32 %v9637_v18, 16  ;;  %v4503_v62 = vld [vmem:[#allocation3] sm:$0xe] }
 0x24d   :  { %v3405_v39 = vadd.f32 %v3404_v60, %v3403_v42  ;;  %v3420_v54 = vsel %vm3325_vm0, %v3393_v35, 0.0  ;;  %v3422_v24 = vsel %vm3325_vm0, %v3394_v27, 0.0  ;;  %v3965_v42 = vshrl.u32 %v9637_v18, 16 }
 0x24e   :  { %v3424_v32 = vsel %vm3325_vm0, %v3395_v34, 0.0  ;;  %v3426_v20 = vsel %vm3325_vm0, %v3396_v36, 0.0  ;;  %v4077_v60 = vshrl.u32 %v9639_v59, 16  ;;  %v3439_v10 = vlaneseq  ;;  %v9667_v36 = vld [vmem:[#allocation3 + $0x50] sm:$0xe] }
 0x24f   :  { %v3407_v56 = vadd.f32 %v3406_v25, %v3405_v39  ;;  %v4080_v39 = vshll.u32 %v9639_v59, 16  ;;  %v3967_v25 = vrot.slane %v3965_v42, 4  ;;  %v3974_v1 = vshll.u32 %v3948_v2, 16  ;;  %11158 = vst [vmem:[#allocation21_spill] sm:$0xff] %v9667_v36 }
 0x250   :  { %v4079_v31 = vrot.slane %v4077_v60, 4  ;;  %v4553_v34 = vrot.slane %v3948_v2, 5 }
 0x251   :  { %v3409_v57 = vadd.f32 %v3408_v23, %v3407_v56  ;;  %v3970_v56 = vrot.slane %v3968_v51, 5  ;;  %v4082_v23 = vrot.slane %v4080_v39, 5  ;;  %v6997_v39 = vld [vmem:[%s11054_s3] ss:$0 sm:$0xff] }
 0x253   :  { %v3411_v50 = vadd.f32 %v3410_v33, %v3409_v57  ;;  %v9645_v57 = vshrl.u32 %v3439_v10, 7  ;;  %v9647_v33 = vld [vmem:[#allocation3 + $0x54] sm:$0x1] }
 0x254   :  { %11156 = vst [vmem:[#allocation24_spill] sm:$0xff] %v9647_v33 }
 0x255   :  { %v3413_v22 = vadd.f32 %v3412_v61, %v3411_v50  ;;  %11155 = vst [vmem:[#allocation8_spill] sm:$0xff] %v9645_v57  ;;  %v3971_v50 = vor.u32 %v3970_v56, %v3967_v25  ;;  %v4083_v61 = vor.u32 %v4082_v23, %v4079_v31 }
 0x257   :  { %v3415_v28 = vadd.f32 %v3414_v63, %v3413_v22  ;;  %v4086_v22 = vshll.u32 %v9647_v33, 16  ;;  %v3437_v63 = vld [vmem:[%s11053_s2] sm:$0x1]  ;;  %v9654_v35 = vrot.slane %v3971_v50, 4 }
 0x259   :  { %v3417_v48 = vadd.f32 %v3416_v45, %v3415_v28  ;;  %v11068_v28 = vsub.s32 0, %v9645_v57  ;;  %v9656_v45 = vrot.slane %v3974_v1, 5  ;;  %v9660_v27 = vrot.slane %v4086_v22, 5  ;;  %v3871_v57 = vld [vmem:[#allocation3 + $0x38] sm:$0xf] }
 0x25b   :  { %v3419_v44 = vadd.f32 %v3418_v26, %v3417_v48  ;;  %v9658_v48 = vrot.slane %v4083_v61, 4  ;;  %11157 = vst [vmem:[#allocation19_spill] sm:$0xff] %v9660_v27 }
 0x25d   :  { %v3421_v14 = vadd.f32 %v3420_v54, %v3419_v44  ;;  %v7047_v44 = vrot.slane %v4503_v62, 9 }
 0x25f   :  { %v3423_v43 = vadd.f32 %v3422_v24, %v3421_v14  ;;  %v9665_v14 = vld [vmem:[%s11055_s4 + $0x10] sm:$0xf]  ;;  %v9671_v24 = vsel %vm4238_vm5, %v9581_v3, 0  ;;  %v9688_v3 = vsel %vm8301_vm13, %v7047_v44, %v4553_v34 }
 0x260   :  { %11161 = vst [vmem:[#allocation27_spill] sm:$0xff] %v9688_v3  ;;  %v3877_v3 = vld [vmem:[#allocation3 + $0x40] sm:$0xf] }
 0x261   :  { %v3425_v58 = vadd.f32 %v3424_v32, %v3423_v43 }
 0x263   :  { %v3427_v37 = vadd.f32 %v3426_v20, %v3425_v58 }
 0x265   :  { %v3428_v12 = vrot.slane %v3427_v37, 4 }
 0x267   :  { %v3429_v47 = vadd.f32 %v3428_v12, %v3427_v37  ;;  %v9684_v37 = vsel %vm4238_vm5, %v7080_v49, 0  ;;  %v3883_v12 = vld [vmem:[#allocation3 + $0x58] sm:$0xf] }
 0x269   :  { %v3430_v15 = vrot.slane %v3429_v47, 2 }
 0x26b   :  { %v3431_v0 = vadd.f32 %v3430_v15, %v3429_v47  ;;  %v9692_v47 = vsel %vm4238_vm5, %v9665_v14, 0 }
 0x26c   :  { %11162 = vst [vmem:[#allocation11_spill] sm:$0xff] %v9692_v47  ;;  %v3874_v47 = vld [vmem:[#allocation3 + $0x3c] sm:$0x1] }
 0x26d   :  { %v3432_v17 = vrot.slane %v3431_v0, 1 }
 0x26f   :  { %v3433_v6 = vadd.f32 %v3432_v17, %v3431_v0  ;;  %v3841_v0 = vld [vmem:[#allocation3 + $0x10] sm:$0xf] }
 0x271   :  { %v3434_v7 = vmul.f32 0.0078125, %v3433_v6 }
 0x273   :  { %v3435_v8 = vadd.f32 1e-05, %v3434_v7 }
 0x275   :  { %7884 = vrsqrt.f32 %v3435_v8 }
 0x282   :  { %v7885_v26 = vpop.eup %7884 }
 0x283   :  { %v3438_v54 = vmul.f32 %v7885_v26, %v3437_v63 }
 0x285   :  { %v3442_v43 = vrot.slane %v3438_v54, %v11068_v28 }
 0x287   :  { %v3443_v17 = vmul.f32 %v3442_v43, %v9529_v5  ;;  %v3444_v6 = vmul.f32 %v3442_v43, %v9532_v52  ;;  %v3445_v7 = vmul.f32 %v3442_v43, %v9535_v53  ;;  %v3446_v49 = vmul.f32 %v3442_v43, %v9538_v21 }
 0x288   :  { %v3447_v8 = vmul.f32 %v3442_v43, %v9541_v4  ;;  %v3448_v42 = vmul.f32 %v3442_v43, %v9572_v46  ;;  %v3449_v51 = vmul.f32 %v3442_v43, %v9544_v11  ;;  %v3450_v60 = vmul.f32 %v3442_v43, %v9547_v55 }
 0x289   :  { %v3451_v5 = vmul.f32 %v3442_v43, %v9550_v30  ;;  %v3452_v52 = vmul.f32 %v3442_v43, %v9599_v40  ;;  %v3453_v53 = vmul.f32 %v3442_v43, %v9553_v9  ;;  %v3454_v21 = vmul.f32 %v3442_v43, %v9556_v41 }
 0x28a   :  { %v3455_v4 = vmul.f32 %v3442_v43, %v9559_v29  ;;  %v3456_v46 = vmul.f32 %v3442_v43, %v9614_v38  ;;  %v3457_v11 = vmul.f32 %v3442_v43, %v9561_v16  ;;  %v3458_v55 = vmul.f32 %v3442_v43, %v9563_v19 }
 0x28b   :  { %v3466_v10 = vadd.f32 %v6997_v39, %v3443_v17  ;;  %v3467_v25 = vadd.f32 %v6997_v39, %v3444_v6  ;;  %v3468_v56 = vadd.f32 %v6997_v39, %v3445_v7  ;;  %v3469_v31 = vadd.f32 %v6997_v39, %v3446_v49 }
 0x28c   :  { %v3470_v23 = vadd.f32 %v6997_v39, %v3447_v8  ;;  %v3471_v30 = vadd.f32 %v6997_v39, %v3448_v42  ;;  %v3472_v2 = vadd.f32 %v6997_v39, %v3449_v51  ;;  %v3473_v40 = vadd.f32 %v6997_v39, %v3450_v60 }
 0x28d   :  { %v3474_v50 = vadd.f32 %v6997_v39, %v3451_v5  ;;  %v3475_v9 = vadd.f32 %v6997_v39, %v3452_v52  ;;  %v3476_v1 = vadd.f32 %v6997_v39, %v3453_v53  ;;  %v3477_v41 = vadd.f32 %v6997_v39, %v3454_v21 }
 0x28e   :  { %v3478_v61 = vadd.f32 %v6997_v39, %v3455_v4  ;;  %v3479_v29 = vadd.f32 %v6997_v39, %v3456_v46  ;;  %v3480_v22 = vadd.f32 %v6997_v39, %v3457_v11  ;;  %v3481_v38 = vadd.f32 %v6997_v39, %v3458_v55 }
 0x28f   :  { %v3482_v62 = vmax.f32 %v3466_v10, 0.0  ;;  %v3483_v16 = vmax.f32 %v3467_v25, 0.0  ;;  %v3484_v63 = vmax.f32 %v3468_v56, 0.0  ;;  %v3485_v19 = vmax.f32 %v3469_v31, 0.0 }
 0x290   :  { %v3486_v26 = vmax.f32 %v3470_v23, 0.0  ;;  %v3487_v44 = vmax.f32 %v3471_v30, 0.0  ;;  %v3488_v34 = vmax.f32 %v3472_v2, 0.0  ;;  %v3489_v54 = vmax.f32 %v3473_v40, 0.0 }
 0x291   :  { %v3490_v43 = vmax.f32 %v3474_v50, 0.0  ;;  %v3491_v17 = vmax.f32 %v3475_v9, 0.0  ;;  %v3492_v6 = vmax.f32 %v3476_v1, 0.0  ;;  %v3493_v7 = vmax.f32 %v3477_v41, 0.0 }
 0x292   :  { %v3494_v49 = vmax.f32 %v3478_v61, 0.0  ;;  %v3495_v8 = vmax.f32 %v3479_v29, 0.0  ;;  %v3496_v42 = vmax.f32 %v3480_v22, 0.0  ;;  %v3497_v51 = vmax.f32 %v3481_v38, 0.0 }
 0x293   :  { %v7231_v60 = vpack.c.bf16 %v3482_v62, %v3482_v62  ;;  %v7232_v5 = vpack.c.bf16 %v3483_v16, %v3483_v16  ;;  %v7233_v52 = vpack.c.bf16 %v3484_v63, %v3484_v63  ;;  %v7234_v39 = vpack.c.bf16 %v3485_v19, %v3485_v19 }
 0x294   :  { %v7235_v53 = vpack.c.bf16 %v3486_v26, %v3486_v26  ;;  %v7236_v21 = vpack.c.bf16 %v3487_v44, %v3487_v44  ;;  %v7237_v4 = vpack.c.bf16 %v3488_v34, %v3488_v34  ;;  %v7238_v46 = vpack.c.bf16 %v3489_v54, %v3489_v54 }
 0x295   :  { %v7239_v11 = vpack.c.bf16 %v3490_v43, %v3490_v43  ;;  %v9715_v55 = vpack.c.bf16 %v3491_v17, %v3491_v17  ;;  %v9717_v10 = vpack.c.bf16 %v3492_v6, %v3492_v6  ;;  %v9719_v25 = vpack.c.bf16 %v3493_v7, %v3493_v7 }
 0x296   :  { %v9721_v56 = vpack.c.bf16 %v3494_v49, %v3494_v49  ;;  %v9723_v31 = vpack.c.bf16 %v3495_v8, %v3495_v8  ;;  %v9725_v23 = vpack.c.bf16 %v3496_v42, %v3496_v42  ;;  %v9727_v30 = vpack.c.bf16 %v3497_v51, %v3497_v51  ;;  %v3880_v8 = vld [vmem:[#allocation3 + $0x44] sm:$0x1] }
 0x297   :  { %v3674_v2 = vshrl.u32 %v7231_v60, 16  ;;  %v3677_v40 = vshll.u32 %v7231_v60, 16  ;;  %v3682_v50 = vshrl.u32 %v7232_v5, 16  ;;  %v3685_v9 = vshll.u32 %v7232_v5, 16 }
 0x298   :  { %v3690_v1 = vshrl.u32 %v7233_v52, 16  ;;  %v3693_v41 = vshll.u32 %v7233_v52, 16  ;;  %v3698_v61 = vshrl.u32 %v7234_v39, 16  ;;  %v3701_v29 = vshll.u32 %v7234_v39, 16 }
 0x299   :  { %v9729_v22 = vrot.slane %v3674_v2, 7  ;;  %v9731_v38 = vrot.slane %v3682_v50, 7  ;;  %v3706_v62 = vshrl.u32 %v7235_v53, 16  ;;  %v3709_v16 = vshll.u32 %v7235_v53, 16 }
 0x29a   :  { %v9733_v63 = vrot.slane %v3690_v1, 7  ;;  %v9735_v19 = vrot.slane %v3698_v61, 7  ;;  %v3714_v26 = vshrl.u32 %v7236_v21, 16  ;;  %v3717_v44 = vshll.u32 %v7236_v21, 16 }
 0x29b   :  { %v9738_v34 = vor.u32 %v3677_v40, %v9729_v22  ;;  %v9742_v43 = vor.u32 %v3685_v9, %v9731_v38  ;;  %v9753_v42 = vrot.slane %v3706_v62, 7  ;;  %v3722_v60 = vshrl.u32 %v7237_v4, 16  ;;  %v3865_v9 = vld [vmem:[#allocation3 + $0x30] sm:$0xf] }
 0x29c   :  { %v9746_v6 = vor.u32 %v3693_v41, %v9733_v63  ;;  %v9750_v49 = vor.u32 %v3701_v29, %v9735_v19  ;;  %v9755_v51 = vrot.slane %v3714_v26, 7  ;;  %v3725_v5 = vshll.u32 %v7237_v4, 16  ;;  %v3862_v26 = vld [vmem:[#allocation3 + $0x2c] sm:$0x1] }
 0x29d   :  { %v3730_v52 = vshrl.u32 %v7238_v46, 16  ;;  %v3733_v39 = vshll.u32 %v7238_v46, 16  ;;  %v3738_v53 = vshrl.u32 %v7239_v11, 16  ;;  %v3741_v21 = vshll.u32 %v7239_v11, 16 }
 0x29e   :  { %v9758_v2 = vor.u32 %v3709_v16, %v9753_v42  ;;  %v9762_v50 = vor.u32 %v3717_v44, %v9755_v51  ;;  %v9765_v1 = vrot.slane %v3722_v60, 7  ;;  %v3746_v4 = vshrl.u32 %v9715_v55, 16 }
 0x29f   :  { %v9767_v41 = vrot.slane %v3730_v52, 7  ;;  %v9769_v61 = vrot.slane %v3738_v53, 7  ;;  %v3749_v46 = vshll.u32 %v9715_v55, 16  ;;  %v3754_v11 = vshrl.u32 %v9717_v10, 16 }
 0x2a0   :  { %v3757_v29 = vshll.u32 %v9717_v10, 16  ;;  %v3762_v62 = vshrl.u32 %v9719_v25, 16  ;;  %v9777_v16 = vor.u32 %v3725_v5, %v9765_v1  ;;  %v9788_v53 = vrot.slane %v3746_v4, 7 }
 0x2a1   :  { %v9781_v44 = vor.u32 %v3733_v39, %v9767_v41  ;;  %v9785_v52 = vor.u32 %v3741_v21, %v9769_v61  ;;  %v9790_v10 = vrot.slane %v3754_v11, 7  ;;  %v3765_v5 = vshll.u32 %v9719_v25, 16  ;;  %v3844_v11 = vld [vmem:[#allocation3 + $0x14] sm:$0x1]  ;;  %v3856_v25 = vld [vmem:[#allocation3 + $0x24] sm:$0x1] }
 0x2a2   :  { %v9792_v28 = vrot.slane %v3762_v62, 7  ;;  %v3770_v15 = vshrl.u32 %v9721_v56, 16  ;;  %v3773_v39 = vshll.u32 %v9721_v56, 16  ;;  %v9798_v20 = vor.u32 %v3749_v46, %v9788_v53  ;;  %v3847_v62 = vld [vmem:[#allocation3 + $0x18] sm:$0xf] }
 0x2a3   :  { %v9802_v58 = vor.u32 %v3757_v29, %v9790_v10  ;;  %v3778_v56 = vshrl.u32 %v9723_v31, 16  ;;  %v3850_v29 = vld [vmem:[#allocation3 + $0x1c] sm:$0x1]  ;;  %v3781_v4 = vshll.u32 %v9723_v31, 16  ;;  %v3786_v21 = vshrl.u32 %v9725_v23, 16 }
 0x2a4   :  { %v9806_v54 = vor.u32 %v3765_v5, %v9792_v28  ;;  %v9809_v55 = vrot.slane %v3770_v15, 7  ;;  %v3789_v5 = vshll.u32 %v9725_v23, 16  ;;  %v3794_v60 = vshrl.u32 %v9727_v30, 16  ;;  %v3859_v15 = vld [vmem:[#allocation3 + $0x28] sm:$0xf] }
 0x2a5   :  { %v9826_v7 = vrot.slane %v3778_v56, 7  ;;  %v3797_v17 = vshll.u32 %v9727_v30, 16  ;;  %v3868_v31 = vld [vmem:[#allocation3 + $0x34] sm:$0x1]  ;;  %v9829_v23 = vrot.slane %v3786_v21, 7  ;;  %v3842_v33 = vsel %vm9814_vm6, %v9742_v43, %v3841_v0 }
 0x2a6   :  { %v9823_v40 = vor.u32 %v3773_v39, %v9809_v55  ;;  %v9831_v36 = vrot.slane %v3794_v60, 7  ;;  %v11165_v39 = vrot.slane %v9731_v38, 4  ;;  %v3886_v30 = vld [vmem:[#allocation3 + $0x5c] sm:$0x1]  ;;  %v3848_v60 = vsel %vm9814_vm6, %v9746_v6, %v3847_v62  ;;  %v3889_v43 = vld [vmem:[#allocation3 + $0x60] sm:$0xf] }
 0x2a7   :  { %v9841_v27 = vor.u32 %v3781_v4, %v9826_v7  ;;  %v11166_v0 = vrot.slane %v9733_v63, 4  ;;  %3843 = vst [vmem:[#allocation3 + $0x10] sm:$0xf] %v3842_v33  ;;  %v3792_v4 = vrot.slane %v9829_v23, 4  ;;  %v3895_v6 = vld [vmem:[#allocation3 + $0x68] sm:$0xf]  ;;  %v3860_v33 = vsel %vm9814_vm6, %v9758_v2, %v3859_v15 }
 0x2a8   :  { %v3845_v56 = vsel %vm9370_vm4, %v11165_v39, %v3844_v11  ;;  %v3892_v11 = vld [vmem:[#allocation3 + $0x64] sm:$0x1]  ;;  %v9852_v39 = vor.u32 %v3789_v5, %v9829_v23  ;;  %v9856_v21 = vor.u32 %v3797_v17, %v9831_v36  ;;  %v3898_v62 = vld [vmem:[#allocation3 + $0x6c] sm:$0x1]  ;;  %3849 = vst [vmem:[#allocation3 + $0x18] sm:$0xf] %v3848_v60  ;;  %v3872_v2 = vsel %vm9814_vm6, %v9777_v16, %v3871_v57 }
 0x2a9   :  { %3846 = vst [vmem:[#allocation3 + $0x14] sm:$0x1] %v3845_v56  ;;  %v3851_v38 = vsel %vm9370_vm4, %v11166_v0, %v3850_v29  ;;  %v11167_v63 = vrot.slane %v9735_v19, 4  ;;  %v11168_v5 = vrot.slane %v9753_v42, 4  ;;  %v3866_v0 = vsel %vm9814_vm6, %v9762_v50, %v3865_v9  ;;  %v3904_v60 = vld [vmem:[#allocation3 + $0x74] sm:$0x1] }
 0x2aa   :  { %3852 = vst [vmem:[#allocation3 + $0x1c] sm:$0x1] %v3851_v38  ;;  %v3901_v38 = vld [vmem:[#allocation3 + $0x70] sm:$0xf]  ;;  %v3907_v56 = vld [vmem:[#allocation3 + $0x78] sm:$0xf]  ;;  %v3878_v50 = vsel %vm9814_vm6, %v9781_v44, %v3877_v3  ;;  %v3890_v16 = vsel %vm9814_vm6, %v9798_v20, %v3889_v43 }
 0x2ab   :  { %v3857_v29 = vsel %vm9370_vm4, %v11167_v63, %v3856_v25  ;;  %v3863_v17 = vsel %vm9370_vm4, %v11168_v5, %v3862_v26  ;;  %v11169_v19 = vrot.slane %v9755_v51, 4  ;;  %v11170_v42 = vrot.slane %v9765_v1, 4  ;;  %v3910_v9 = vld [vmem:[#allocation3 + $0x7c] sm:$0x1]  ;;  %v3913_v15 = vld [vmem:[#allocation3 + $0x80] sm:$0xf] }
 0x2ac   :  { %v3916_v63 = vld [vmem:[#allocation3 + $0x84] sm:$0x1]  ;;  %3858 = vst [vmem:[#allocation3 + $0x24] sm:$0x1] %v3857_v29  ;;  %3861 = vst [vmem:[#allocation3 + $0x28] sm:$0xf] %v3860_v33 }
 0x2ad   :  { %v3869_v25 = vsel %vm9370_vm4, %v11169_v19, %v3868_v31  ;;  %v3875_v26 = vsel %vm9370_vm4, %v11170_v42, %v3874_v47  ;;  %3864 = vst [vmem:[#allocation3 + $0x2c] sm:$0x1] %v3863_v17  ;;  %3867 = vst [vmem:[#allocation3 + $0x30] sm:$0xf] %v3866_v0  ;;  %v11171_v51 = vrot.slane %v9767_v41, 4  ;;  %v3884_v47 = vsel %vm9814_vm6, %v9785_v52, %v3883_v12 }
 0x2ae   :  { %3876 = vst [vmem:[#allocation3 + $0x3c] sm:$0x1] %v3875_v26  ;;  %v11172_v1 = vrot.slane %v9769_v61, 4  ;;  %v3919_v44 = vld [vmem:[#allocation3 + $0x88] sm:$0xf]  ;;  %v11173_v12 = vrot.slane %v9788_v53, 4  ;;  %v3896_v41 = vsel %vm9814_vm6, %v9802_v58, %v3895_v6  ;;  %v3902_v52 = vsel %vm9814_vm6, %v9806_v54, %v3901_v38 }
 0x2af   :  { %v3881_v57 = vsel %vm9370_vm4, %v11171_v51, %v3880_v8  ;;  %v3922_v31 = vld [vmem:[#allocation3 + $0x8c] sm:$0x1]  ;;  %v3925_v29 = vld [vmem:[#allocation3 + $0x90] sm:$0xf]  ;;  %3870 = vst [vmem:[#allocation3 + $0x34] sm:$0x1] %v3869_v25  ;;  %v3914_v6 = vsel %vm9814_vm6, %v9841_v27, %v3913_v15 }
 0x2b0   :  { %v3887_v3 = vsel %vm9370_vm4, %v11172_v1, %v3886_v30  ;;  %3873 = vst [vmem:[#allocation3 + $0x38] sm:$0xf] %v3872_v2  ;;  %3879 = vst [vmem:[#allocation3 + $0x40] sm:$0xf] %v3878_v50  ;;  %v3893_v8 = vsel %vm9370_vm4, %v11173_v12, %v3892_v11  ;;  %v11174_v20 = vrot.slane %v9790_v10, 4  ;;  %v11175_v53 = vrot.slane %v9792_v28, 4 }
 0x2b1   :  { %3882 = vst [vmem:[#allocation3 + $0x44] sm:$0x1] %v3881_v57  ;;  %3885 = vst [vmem:[#allocation3 + $0x58] sm:$0xf] %v3884_v47  ;;  %v3928_v30 = vld [vmem:[#allocation3 + $0x94] sm:$0x1]  ;;  %v3908_v10 = vsel %vm9814_vm6, %v9823_v40, %v3907_v56  ;;  %v3920_v56 = vsel %vm9814_vm6, %v9852_v39, %v3919_v44  ;;  %v3923_v27 = vsel %vm9370_vm4, %v3792_v4, %v3922_v31 }
 0x2b2   :  { %3888 = vst [vmem:[#allocation3 + $0x5c] sm:$0x1] %v3887_v3  ;;  %3891 = vst [vmem:[#allocation3 + $0x60] sm:$0xf] %v3890_v16  ;;  %v3899_v61 = vsel %vm9370_vm4, %v11174_v20, %v3898_v62  ;;  %v3835_v43 = vld [vmem:[#allocation3 + $0x8] sm:$0xf]  ;;  %v3905_v58 = vsel %vm9370_vm4, %v11175_v53, %v3904_v60  ;;  %v3926_v33 = vsel %vm9814_vm6, %v9856_v21, %v3925_v29 }
 0x2b3   :  { %3894 = vst [vmem:[#allocation3 + $0x64] sm:$0x1] %v3893_v8  ;;  %3897 = vst [vmem:[#allocation3 + $0x68] sm:$0xf] %v3896_v41  ;;  %v11176_v11 = vrot.slane %v9809_v55, 4  ;;  %v11177_v40 = vrot.slane %v9826_v7, 4  ;;  %v3836_v23 = vsel %vm9814_vm6, %v9738_v34, %v3835_v43 }
 0x2b4   :  { %3900 = vst [vmem:[#allocation3 + $0x6c] sm:$0x1] %v3899_v61  ;;  %3903 = vst [vmem:[#allocation3 + $0x70] sm:$0xf] %v3902_v52  ;;  %v3853_v62 = vld [vmem:[#allocation3 + $0x20] sm:$0xf] }
 0x2b5   :  { %v3911_v54 = vsel %vm9370_vm4, %v11176_v11, %v3910_v9  ;;  %v9932_v28 = vld [vmem:[%s11055_s4 + $0x14] sm:$0xf]  ;;  %3906 = vst [vmem:[#allocation3 + $0x74] sm:$0x1] %v3905_v58  ;;  %3909 = vst [vmem:[#allocation3 + $0x78] sm:$0xf] %v3908_v10  ;;  %v3917_v55 = vsel %vm9370_vm4, %v11177_v40, %v3916_v63 }
 0x2b6   :  { %3912 = vst [vmem:[#allocation3 + $0x7c] sm:$0x1] %v3911_v54  ;;  %3915 = vst [vmem:[#allocation3 + $0x80] sm:$0xf] %v3914_v6  ;;  %v9948_v5 = vld [vmem:[#allocation3 + $0x10] sm:$0xf] }
 0x2b7   :  { %v3838_v17 = vld [vmem:[#allocation3 + $0xc] sm:$0x1]  ;;  %3918 = vst [vmem:[#allocation3 + $0x84] sm:$0x1] %v3917_v55  ;;  %3921 = vst [vmem:[#allocation3 + $0x88] sm:$0xf] %v3920_v56 }
 0x2b8   :  { %3924 = vst [vmem:[#allocation3 + $0x8c] sm:$0x1] %v3923_v27  ;;  %3927 = vst [vmem:[#allocation3 + $0x90] sm:$0xf] %v3926_v33  ;;  %v11178_v7 = vrot.slane %v9831_v36, 4  ;;  %v3993_v21 = vshrl.u32 %v9948_v5, 16  ;;  %v3854_v36 = vsel %vm9814_vm6, %v9750_v49, %v3853_v62 }
 0x2b9   :  { %v9957_v4 = vld [vmem:[#allocation3 + $0x18] sm:$0xf]  ;;  %v3996_v0 = vshll.u32 %v9948_v5, 16  ;;  %3837 = vst [vmem:[#allocation3 + $0x8] sm:$0xf] %v3836_v23  ;;  %v9968_v19 = vsel %vm4238_vm5, %v9932_v28, 0 }
 0x2ba   :  { %v3929_v39 = vsel %vm9370_vm4, %v11178_v7, %v3928_v30  ;;  %v4007_v38 = vshrl.u32 %v9957_v4, 16  ;;  %v4010_v60 = vshll.u32 %v9957_v4, 16  ;;  %v3995_v34 = vrot.slane %v3993_v21, 4  ;;  %3855 = vst [vmem:[#allocation3 + $0x20] sm:$0xf] %v3854_v36 }
 0x2bb   :  { %3930 = vst [vmem:[#allocation3 + $0x94] sm:$0x1] %v3929_v39  ;;  %v3998_v25 = vrot.slane %v3996_v0, 5  ;;  %v7032_v2 = vcombine.low %v9948_v5, %v9957_v4  ;;  %v3936_v42 = vld [vmem:[#allocation3 + $0x28] sm:$0xf]  ;;  %v11179_v26 = vrot.slane %v9729_v22, 4 }
 0x2bc   :  { %v9976_v9 = vld [vmem:[#allocation3 + $0x30] sm:$0xf]  ;;  %v9978_v46 = vld [vmem:[#allocation3 + $0x14] sm:$0x1]  ;;  %v4009_v49 = vrot.slane %v4007_v38, 4  ;;  %v4012_v15 = vrot.slane %v4010_v60, 5 }
 0x2bd   :  { %v3839_v50 = vsel %vm9370_vm4, %v11179_v26, %v3838_v17  ;;  %v4035_v63 = vshrl.u32 %v3936_v42, 16  ;;  %v4038_v51 = vshll.u32 %v3936_v42, 16  ;;  %v9980_v57 = vld [vmem:[#allocation3 + $0x38] sm:$0xf]  ;;  %v4049_v47 = vshrl.u32 %v9976_v9, 16 }
 0x2be   :  { %3840 = vst [vmem:[#allocation3 + $0xc] sm:$0x1] %v3839_v50  ;;  %v4052_v1 = vshll.u32 %v9976_v9, 16  ;;  %v4063_v22 = vshrl.u32 %v9980_v57, 16  ;;  %v4066_v13 = vshll.u32 %v9980_v57, 16  ;;  %v7034_v31 = vcombine.low %v9976_v9, %v9980_v57 }
 0x2bf   :  { %v9986_v3 = vld [vmem:[#allocation3 + $0x1c] sm:$0x1]  ;;  %v4037_v16 = vrot.slane %v4035_v63, 4  ;;  %v4040_v44 = vrot.slane %v4038_v51, 5  ;;  %v3999_v29 = vor.u32 %v3998_v25, %v3995_v34  ;;  %v9990_v12 = vld [vmem:[#allocation3 + $0x58] sm:$0xf]  ;;  %v4013_v53 = vor.u32 %v4012_v15, %v4009_v49 }
 0x2c0   :  { %v9992_v8 = vld [vmem:[#allocation3 + $0x24] sm:$0x1]  ;;  %v9994_v41 = vrot.slane %v4049_v47, 4  ;;  %v9996_v20 = vrot.slane %v4052_v1, 5  ;;  %v9998_v61 = vrot.slane %v4063_v22, 4  ;;  %v10000_v52 = vrot.slane %v4066_v13, 5 }
 0x2c1   :  { %v4000_v30 = vrot.slane %v3999_v29, 4  ;;  %v4002_v43 = vshll.u32 %v9978_v46, 16  ;;  %v4016_v58 = vshll.u32 %v9986_v3, 16  ;;  %v3932_v10 = vld [vmem:[#allocation3 + $0x8] sm:$0xf]  ;;  %v4091_v11 = vshrl.u32 %v9990_v12, 16 }
 0x2c2   :  { %v4094_v54 = vshll.u32 %v9990_v12, 16  ;;  %v7035_v6 = vcombine.low %v9639_v59, %v9990_v12  ;;  %v4030_v62 = vshll.u32 %v9992_v8, 16  ;;  %v3979_v40 = vshrl.u32 %v3932_v10, 16  ;;  %v3935_v27 = vld [vmem:[#allocation3 + $0x20] sm:$0xf] }
 0x2c3   :  { %v3982_v55 = vshll.u32 %v3932_v10, 16  ;;  %v7031_v56 = vcombine.low %v9637_v18, %v3932_v10  ;;  %v4004_v33 = vrot.slane %v4002_v43, 5  ;;  %v4021_v5 = vshrl.u32 %v3935_v27, 16  ;;  %v10016_v60 = vld [vmem:[#allocation3 + $0x2c] sm:$0x1] }
 0x2c4   :  { %v4024_v17 = vshll.u32 %v3935_v27, 16  ;;  %v7033_v7 = vcombine.low %v3935_v27, %v3936_v42  ;;  %v4014_v23 = vrot.slane %v4013_v53, 4  ;;  %v3981_v4 = vrot.slane %v3979_v40, 4  ;;  %v10021_v42 = vld [vmem:[#allocation3 + $0x60] sm:$0xf] }
 0x2c5   :  { %v10010_v39 = vld [vmem:[#allocation3 + $0xc] sm:$0x1]  ;;  %v3984_v21 = vrot.slane %v3982_v55, 5  ;;  %7591 = vmatprep.mubr.msk.bf16.mxu0 %vm3325_vm0, %v7031_v56  ;;  %v4005_v38 = vsel %vm8289_vm12, %v4000_v30, %v4004_v33  ;;  %v4023_v18 = vrot.slane %v4021_v5, 4  ;;  %v4018_v34 = vrot.slane %v4016_v58, 5 }
 0x2c6   :  { %v3988_v0 = vshll.u32 %v10010_v39, 16  ;;  %7592 = vmatmul.mubr.msk.bf16.vlgmr.msra.gmra.mxu0 %vm3325_vm0, %v7032_v2  ;;  %v4026_v36 = vrot.slane %v4024_v17, 5  ;;  %v10019_v25 = vrot.slane %v4091_v11, 4  ;;  %v10024_v49 = vrot.slane %v4094_v54, 5  ;;  %v10026_v63 = vld [vmem:[#allocation3 + $0x68] sm:$0xf] }
 0x2c7   :  { %7595 = vmatprep.mubr.msk.bf16.mxu0 %vm3325_vm0, %v7033_v7  ;;  %v3985_v26 = vor.u32 %v3984_v21, %v3981_v4  ;;  %v4032_v15 = vrot.slane %v4030_v62, 5  ;;  %7626 = vmatpush3.bf16.msra.mxu0 %v9684_v37  ;;  %v4019_v2 = vsel %vm8289_vm12, %v4014_v23, %v4018_v34  ;;  %v4041_v47 = vor.u32 %v4040_v44, %v4037_v16  ;;  %v10036_v43 = vld [vmem:[#allocation3 + $0x34] sm:$0x1]  ;;  %v10039_v11 = vld [vmem:[#allocation3 + $0x3c] sm:$0x1] }
 0x2c8   :  { %v3990_v50 = vrot.slane %v3988_v0, 5  ;;  %v4027_v51 = vor.u32 %v4026_v36, %v4023_v18  ;;  %v4044_v1 = vshll.u32 %v10016_v60, 16  ;;  %7747 = vmatprep.subr.msk.bf16.mxu0 %vm4238_vm5, %v9932_v28  ;;  %v7016_v13 = vcombine.low %v4005_v38, %v4019_v2  ;;  %v10048_v62 = vld [vmem:[#allocation3 + $0x70] sm:$0xf]  ;;  %v3944_v5 = vld [vmem:[#allocation3 + $0x78] sm:$0xf] }
 0x2c9   :  { %v3986_v22 = vrot.slane %v3985_v26, 4  ;;  %v4105_v29 = vshrl.u32 %v10021_v42, 16  ;;  %v4108_v30 = vshll.u32 %v10021_v42, 16  ;;  %v4042_v37 = vrot.slane %v4041_v47, 4  ;;  %v10079_v18 = vld [vmem:[#allocation3 + $0x80] sm:$0xf] }
 0x2ca   :  { %v4028_v53 = vrot.slane %v4027_v51, 4  ;;  %v4046_v58 = vrot.slane %v4044_v1, 5  ;;  %v4119_v10 = vshrl.u32 %v10026_v63, 16  ;;  %v4122_v54 = vshll.u32 %v10026_v63, 16  ;;  %v10089_v34 = vld [vmem:[#allocation3 + $0x88] sm:$0xf] }
 0x2cb   :  { %v3991_v16 = vsel %vm8289_vm12, %v3986_v22, %v3990_v50  ;;  %v10043_v44 = vrot.slane %v4105_v29, 4  ;;  %v10045_v28 = vrot.slane %v4108_v30, 5  ;;  %v11180_v40 = vsel %vm8289_vm12, %v9654_v35, %v9656_v45  ;;  %v10067_v35 = vld [vmem:[#allocation3 + $0x5c] sm:$0x1]  ;;  %v10103_v2 = vld [vmem:[#allocation3 + $0x6c] sm:$0x1] }
 0x2cc   :  { %v7015_v55 = vcombine.low %v11180_v40, %v3991_v16  ;;  %v4033_v56 = vsel %vm8289_vm12, %v4028_v53, %v4032_v15  ;;  %v4047_v27 = vsel %vm8289_vm12, %v4042_v37, %v4046_v58  ;;  %v10059_v33 = vrot.slane %v4119_v10, 4  ;;  %v10111_v53 = vld [vmem:[#allocation3 + $0x74] sm:$0x1]  ;;  %v10115_v10 = vld [vmem:[#allocation3 + $0x7c] sm:$0x1] }
 0x2cd   :  { %v7017_v17 = vcombine.low %v4033_v56, %v4047_v27  ;;  %v10061_v7 = vrot.slane %v4122_v54, 5  ;;  %v7036_v23 = vcombine.low %v10021_v42, %v10026_v63  ;;  %v4055_v4 = vor.u32 %v9996_v20, %v9994_v41 }
 0x2ce   :  { %7573 = vmatprep.mubr.msk.bf16.mxu1 %vm3325_vm0, %v7015_v55  ;;  %7596 = vmatmul.mubr.msk.bf16.gmra.mxu0 %vm3325_vm0, %v7034_v31  ;;  %v4058_v45 = vshll.u32 %v10036_v43, 16  ;;  %v4069_v21 = vor.u32 %v10000_v52, %v9998_v61  ;;  %v4072_v0 = vshll.u32 %v10039_v11, 16  ;;  %v4133_v38 = vshrl.u32 %v10048_v62, 16 }
 0x2cf   :  { %7574 = vmatmul.mubr.msk.bf16.vlgmr.msra.gmra.mxu1 %vm3325_vm0, %v7016_v13  ;;  %7599 = vmatprep.mubr.msk.bf16.mxu0 %vm3325_vm0, %v7035_v6  ;;  %v4056_v9 = vrot.slane %v4055_v4, 4  ;;  %v4136_v57 = vshll.u32 %v10048_v62, 16  ;;  %v4147_v31 = vshrl.u32 %v3944_v5, 16  ;;  %v4150_v41 = vshll.u32 %v3944_v5, 16  ;;  %v10092_v6 = vld [vmem:[#allocation3 + $0x64] sm:$0x1] }
 0x2d0   :  { %7608 = vmatpush3.bf16.msra.mxu1 %v9671_v24  ;;  %7577 = vmatprep.mubr.msk.bf16.mxu1 %vm3325_vm0, %v7017_v17  ;;  %v4060_v20 = vrot.slane %v4058_v45, 5  ;;  %v4070_v61 = vrot.slane %v4069_v21, 4  ;;  %v4074_v52 = vrot.slane %v4072_v0, 5  ;;  %v4135_v36 = vrot.slane %v4133_v38, 4  ;;  %v10131_v17 = vld [vmem:[#allocation3 + $0x84] sm:$0x1] }
 0x2d1   :  { %v4138_v42 = vrot.slane %v4136_v57, 5  ;;  %v4149_v26 = vrot.slane %v4147_v31, 4  ;;  %v4152_v59 = vrot.slane %v4150_v41, 5  ;;  %v7037_v12 = vcombine.low %v10048_v62, %v3944_v5  ;;  %7746 = vmatprep.subr.msk.bf16.mxu1 %vm4238_vm5, %v9665_v14 }
 0x2d2   :  { %v4061_v24 = vsel %vm8289_vm12, %v4056_v9, %v4060_v20  ;;  %v4075_v50 = vsel %vm8289_vm12, %v4070_v61, %v4074_v52  ;;  %v4097_v15 = vor.u32 %v10024_v49, %v10019_v25  ;;  %v4100_v63 = vshll.u32 %v10067_v35, 16  ;;  %v4504_v20 = vld [vmem:[#allocation3 + $0x8] sm:$0xe] }
 0x2d3   :  { %v7018_v51 = vcombine.low %v4061_v24, %v4075_v50  ;;  %v4161_v47 = vshrl.u32 %v10079_v18, 16  ;;  %v4164_v1 = vshll.u32 %v10079_v18, 16  ;;  %v4175_v14 = vshrl.u32 %v10089_v34, 16  ;;  %v7868_v52 = vld [vmem:[#allocation3 + $0x8] ss:$8 sps:$4 sm:$0xff]  }
 0x2d4   :  { %v4098_v22 = vrot.slane %v4097_v15, 4  ;;  %v4102_v13 = vrot.slane %v4100_v63, 5  ;;  %v4178_v29 = vshll.u32 %v10089_v34, 16  ;;  %v7038_v30 = vcombine.low %v10079_v18, %v10089_v34  ;;  %v4505_v18 = vld [vmem:[#allocation3 + $0x10] sm:$0xe] }
 0x2d5   :  { %v4163_v25 = vrot.slane %v4161_v47, 4  ;;  %v4166_v49 = vrot.slane %v4164_v1, 5  ;;  %v4177_v37 = vrot.slane %v4175_v14, 4  ;;  %v4111_v58 = vor.u32 %v10045_v28, %v10043_v44  ;;  %v11181_v44 = vld [vmem:[#allocation19_spill] sm:$0xff] }
 0x2d6   :  { %7600 = vmatmul.mubr.msk.bf16.gmra.mxu0 %vm3325_vm0, %v7036_v23  ;;  %v4103_v16 = vsel %vm8289_vm12, %v4098_v22, %v4102_v13  ;;  %v4180_v54 = vrot.slane %v4178_v29, 5  ;;  %v4114_v62 = vshll.u32 %v10092_v6, 16  ;;  %v4125_v40 = vor.u32 %v10061_v7, %v10059_v33  ;;  %v10133_v23 = vld [vmem:[#allocation3 + $0x8c] sm:$0x1]  ;;  %v4507_v1 = vld [vmem:[#allocation3 + $0x20] sm:$0xe] }
 0x2d7   :  { %7578 = vmatmul.mubr.msk.bf16.gmra.mxu1 %vm3325_vm0, %v7018_v51  ;;  %7603 = vmatprep.mubr.msk.bf16.mxu0 %vm3325_vm0, %v7037_v12  ;;  %v11182_v28 = vsel %vm8289_vm12, %v9658_v48, %v11181_v44  ;;  %v4112_v56 = vrot.slane %v4111_v58, 4  ;;  %v4128_v27 = vshll.u32 %v10103_v2, 16  ;;  %v4139_v5 = vor.u32 %v4138_v42, %v4135_v36  ;;  %v4510_v44 = vld [vmem:[#allocation3 + $0x38] sm:$0xe] }
 0x2d8   :  { %v7019_v55 = vcombine.low %v11182_v28, %v4103_v16  ;;  %v4116_v4 = vrot.slane %v4114_v62, 5  ;;  %v4126_v33 = vrot.slane %v4125_v40, 4  ;;  %v4142_v7 = vshll.u32 %v10111_v53, 16  ;;  %v11184_v28 = vld [vmem:[#allocation24_spill] sm:$0xff] }
 0x2d9   :  { %v4153_v45 = vor.u32 %v4152_v59, %v4149_v26  ;;  %v4130_v21 = vrot.slane %v4128_v27, 5  ;;  %v4140_v0 = vrot.slane %v4139_v5, 4  ;;  %v4156_v48 = vshll.u32 %v10115_v10, 16  ;;  %v4506_v26 = vld [vmem:[#allocation3 + $0x18] sm:$0xe] }
 0x2da   :  { %7581 = vmatprep.mubr.msk.bf16.mxu1 %vm3325_vm0, %v7019_v55  ;;  %v4167_v38 = vor.u32 %v4166_v49, %v4163_v25  ;;  %v4117_v9 = vsel %vm8289_vm12, %v4112_v56, %v4116_v4  ;;  %v4144_v57 = vrot.slane %v4142_v7, 5  ;;  %v4170_v41 = vshll.u32 %v10131_v17, 16  ;;  %v4508_v25 = vld [vmem:[#allocation3 + $0x28] sm:$0xe]  ;;  %v4509_v49 = vld [vmem:[#allocation3 + $0x30] sm:$0xe] }
 0x2db   :  { %v4154_v31 = vrot.slane %v4153_v45, 4  ;;  %v4131_v61 = vsel %vm8289_vm12, %v4126_v33, %v4130_v21  ;;  %v4158_v36 = vrot.slane %v4156_v48, 5  ;;  %v4181_v42 = vor.u32 %v4180_v54, %v4177_v37  ;;  %v11186_v56 = vld [vmem:[#allocation21_spill] sm:$0xff]  ;;  %v11188_v4 = vld [vmem:[#allocation27_spill] sm:$0xff]  ;;  %v4512_v45 = vld [vmem:[#allocation3 + $0x58] sm:$0xe] }
 0x2dc   :  { %v4168_v34 = vrot.slane %v4167_v38, 4  ;;  %v7020_v59 = vcombine.low %v4117_v9, %v4131_v61  ;;  %v4145_v12 = vsel %vm8289_vm12, %v4140_v0, %v4144_v57  ;;  %v4172_v24 = vrot.slane %v4170_v41, 5  ;;  %v7869_v21 = vld [vmem:[#allocation3 + $0x18] ss:$8 sps:$4 sm:$0xff]  }
 0x2dd   :  { %v4184_v50 = vshll.u32 %v10133_v23, 16  ;;  %v4159_v15 = vsel %vm8289_vm12, %v4154_v31, %v4158_v36  ;;  %v4182_v63 = vrot.slane %v4181_v42, 4  ;;  %v7048_v51 = vrot.slane %v4504_v20, 9  ;;  %v4513_v20 = vld [vmem:[#allocation3 + $0x60] sm:$0xe] }
 0x2de   :  { %v4557_v47 = vrot.slane %v10010_v39, 5  ;;  %7604 = vmatmul.mubr.msk.bf16.gmra.mxu0 %vm3325_vm0, %v7038_v30  ;;  %v7021_v14 = vcombine.low %v4145_v12, %v4159_v15  ;;  %v4173_v22 = vsel %vm8289_vm12, %v4168_v34, %v4172_v24  ;;  %v7049_v29 = vrot.slane %v4505_v18, 9  ;;  %v7870_v18 = vld [vmem:[#allocation3 + $0x28] ss:$8 sps:$4 sm:$0xff]  }
 0x2df   :  { %v4186_v13 = vrot.slane %v4184_v50, 5  ;;  %7582 = vmatmul.mubr.msk.bf16.gmra.mxu1 %vm3325_vm0, %v7020_v59  ;;  %7627 = vmatprep.mubr.msk.bf16.mxu0 %vm3325_vm0, %v7868_v52  ;;  %v4561_v39 = vrot.slane %v9978_v46, 5  ;;  %v7050_v16 = vrot.slane %v4506_v26, 9  ;;  %v4565_v30 = vrot.slane %v9986_v3, 5  ;;  %v4514_v36 = vld [vmem:[#allocation3 + $0x68] sm:$0xe] }
 0x2e0   :  { %v4558_v58 = vsel %vm8301_vm13, %v7048_v51, %v4557_v47  ;;  %7585 = vmatprep.mubr.msk.bf16.mxu1 %vm3325_vm0, %v7021_v14  ;;  %v7051_v62 = vrot.slane %v4507_v1, 9  ;;  %v4569_v40 = vrot.slane %v9992_v8, 5  ;;  %v11185_v55 = vrot.slane %v11184_v28, 5  ;;  %v10207_v59 = vld [vmem:[#allocation3 + $0xc] sm:$0x1] }
 0x2e1   :  { %v4187_v54 = vsel %vm8289_vm12, %v4182_v63, %v4186_v13  ;;  %v11187_v27 = vrot.slane %v11186_v56, 9  ;;  %v7064_v3 = vcombine.low %v11188_v4, %v4558_v58  ;;  %v10173_v33 = vsel %vm8301_vm13, %v7049_v29, %v4561_v39  ;;  %v5401_v63 = vld [vmem:[#allocation3 + $0x8] sm:$0xe]  ;;  %v5402_v51 = vld [vmem:[#allocation3 + $0x10] sm:$0xe] }
 0x2e2   :  { %v7022_v46 = vcombine.low %v4173_v22, %v4187_v54  ;;  %v7052_v7 = vrot.slane %v4508_v25, 9  ;;  %v10177_v8 = vsel %vm8301_vm13, %v7050_v16, %v4565_v30  ;;  %v10181_v0 = vsel %vm8301_vm13, %v7051_v62, %v4569_v40  ;;  %v4515_v13 = vld [vmem:[#allocation3 + $0x70] sm:$0xe]  ;;  %v4516_v25 = vld [vmem:[#allocation3 + $0x78] sm:$0xe] }
 0x2e3   :  { %v10168_v5 = vsel %vm8301_vm13, %v11187_v27, %v11185_v55  ;;  %v4573_v48 = vrot.slane %v10016_v60, 5  ;;  %v7053_v38 = vrot.slane %v4509_v49, 9  ;;  %v4577_v9 = vrot.slane %v10036_v43, 5  ;;  %v10195_v60 = vld [vmem:[%s11055_s4 + $0x1c] sm:$0xf] }
 0x2e4   :  { %v7054_v57 = vrot.slane %v4510_v44, 9  ;;  %v4581_v31 = vrot.slane %v10039_v11, 5  ;;  %v7056_v41 = vrot.slane %v4512_v45, 9  ;;  %v4589_v52 = vrot.slane %v10067_v35, 5  ;;  %v10243_v62 = vld [vmem:[#allocation3 + $0x1c] sm:$0x1] }
 0x2e5   :  { %v10188_v61 = vsel %vm8301_vm13, %v7052_v7, %v4573_v48  ;;  %v7057_v34 = vrot.slane %v4513_v20, 9  ;;  %v4593_v42 = vrot.slane %v10092_v6, 5  ;;  %v7065_v43 = vcombine.low %v10173_v33, %v10177_v8  ;;  %v10209_v6 = vld [vmem:[#allocation3 + $0x14] sm:$0x1]  ;;  %v10245_v40 = vld [vmem:[#allocation3 + $0x24] sm:$0x1] }
 0x2e6   :  { %v10201_v11 = vsel %vm8301_vm13, %v7053_v38, %v4577_v9  ;;  %v10205_v26 = vsel %vm8301_vm13, %v7054_v57, %v4581_v31  ;;  %v7058_v35 = vrot.slane %v4514_v36, 9  ;;  %7628 = vmatmul.mubr.msk.bf16.vlgmr.msra.gmra.mxu0 %vm3325_vm0, %v7869_v21  ;;  %v7066_v12 = vcombine.low %v10181_v0, %v10188_v61  ;;  %v5403_v28 = vld [vmem:[#allocation3 + $0x18] sm:$0xe]  ;;  %v5404_v55 = vld [vmem:[#allocation3 + $0x20] sm:$0xe] }
 0x2e7   :  { %v7067_v24 = vcombine.low %v10201_v11, %v10205_v26  ;;  %v10218_v50 = vsel %vm8301_vm13, %v7056_v41, %v4589_v52  ;;  %v4597_v15 = vrot.slane %v10103_v2, 5  ;;  %7586 = vmatmul.mubr.msk.bf16.gmra.mxu1 %vm3325_vm0, %v7022_v46  ;;  %7631 = vmatprep.mubr.msk.bf16.mxu0 %vm3325_vm0, %v7870_v18  ;;  %v10225_v47 = vsel %vm8301_vm13, %v7057_v34, %v4593_v42  ;;  %v7872_v27 = vld [vmem:[#allocation3 + $0x58] ss:$8 sps:$4 sm:$0xff]   ;;  %v4518_v21 = vld [vmem:[#allocation3 + $0x88] sm:$0xe] }
 0x2e8   :  { %v7114_v1 = vrot.slane %v5401_v63, 9  ;;  %v5451_v14 = vrot.slane %v10207_v59, 5  ;;  %v7115_v22 = vrot.slane %v5402_v51, 9  ;;  %7609 = vmatprep.mubr.msk.bf16.mxu1 %vm3325_vm0, %v7064_v3  ;;  %v5455_v29 = vrot.slane %v10209_v6, 5  ;;  %7662 = vmatpush3.bf16.msra.mxu0 %v9968_v19  ;;  %v4517_v45 = vld [vmem:[#allocation3 + $0x80] sm:$0xe] }
 0x2e9   :  { %v10231_v2 = vsel %vm8301_vm13, %v7058_v35, %v4597_v15  ;;  %v7059_v49 = vrot.slane %v4515_v13, 9  ;;  %v4601_v58 = vrot.slane %v10111_v53, 5  ;;  %v7068_v39 = vcombine.low %v10168_v5, %v10218_v50  ;;  %7749 = vmatprep.subr.msk.bf16.mxu0 %vm4238_vm5, %v10195_v60  ;;  %v7871_v53 = vld [vmem:[#allocation3 + $0x38] ss:$8 sps:$4 sm:$0xff]   ;;  %v10268_v57 = vld [vmem:[#allocation3 + $0x2c] sm:$0x1] }
 0x2ea   :  { %v10240_v16 = vsel %vm8301_vm13, %v7114_v1, %v5451_v14  ;;  %v7060_v30 = vrot.slane %v4516_v25, 9  ;;  %v4605_v54 = vrot.slane %v10115_v10, 5  ;;  %v7069_v19 = vcombine.low %v10225_v47, %v10231_v2  ;;  %v10273_v31 = vld [vmem:[%s11055_s4 + $0x18] sm:$0xf]  ;;  %v10284_v36 = vld [vmem:[#allocation3 + $0x34] sm:$0x1] }
 0x2eb   :  { %v10253_v44 = vsel %vm8301_vm13, %v7115_v22, %v5455_v29  ;;  %v5459_v56 = vrot.slane %v10243_v62, 5  ;;  %v5463_v10 = vrot.slane %v10245_v40, 5  ;;  %v10259_v46 = vsel %vm8301_vm13, %v7059_v49, %v4601_v58  ;;  %v5406_v15 = vld [vmem:[#allocation3 + $0x30] sm:$0xe]  ;;  %v4979_v1 = vld [vmem:[#allocation3 + $0x8] sm:$0xf] }
 0x2ec   :  { %v10263_v4 = vsel %vm8301_vm13, %v7060_v30, %v4605_v54  ;;  %v7116_v3 = vrot.slane %v5403_v28, 9  ;;  %v7117_v7 = vrot.slane %v5404_v55, 9  ;;  %v7131_v48 = vcombine.low %v10240_v16, %v10253_v44  ;;  %v4981_v22 = vld [vmem:[#allocation3 + $0x10] sm:$0xf]  ;;  %v11189_v25 = vld [vmem:[#allocation11_spill] sm:$0xff] }
 0x2ed   :  { %v7061_v38 = vrot.slane %v4517_v45, 9  ;;  %v4609_v18 = vrot.slane %v10131_v17, 5  ;;  %v7062_v9 = vrot.slane %v4518_v21, 9  ;;  %v4613_v52 = vrot.slane %v10133_v23, 5  ;;  %v5405_v17 = vld [vmem:[#allocation3 + $0x28] sm:$0xe] }
 0x2ee   :  { %v10277_v41 = vsel %vm8301_vm13, %v7116_v3, %v5459_v56  ;;  %v10281_v20 = vsel %vm8301_vm13, %v7117_v7, %v5463_v10  ;;  %v5467_v34 = vrot.slane %v10268_v57, 5  ;;  %7632 = vmatmul.mubr.msk.bf16.gmra.mxu0 %vm3325_vm0, %v7871_v53  ;;  %v7070_v42 = vcombine.low %v10259_v46, %v10263_v4  ;;  %v10316_v58 = vld [vmem:[#allocation3 + $0x3c] sm:$0x1]  ;;  %v10318_v30 = vld [vmem:[#allocation3 + $0x44] sm:$0x1] }
 0x2ef   :  { %v10292_v35 = vsel %vm8301_vm13, %v7061_v38, %v4609_v18  ;;  %v7118_v63 = vrot.slane %v5405_v17, 9  ;;  %v5471_v51 = vrot.slane %v10284_v36, 5  ;;  %7610 = vmatmul.mubr.msk.bf16.vlgmr.msra.gmra.mxu1 %vm3325_vm0, %v7065_v43  ;;  %7635 = vmatprep.mubr.msk.bf16.mxu0 %vm3325_vm0, %v7872_v27  ;;  %v10302_v23 = vsel %vm8301_vm13, %v7062_v9, %v4613_v52  ;;  %v5407_v53 = vld [vmem:[#allocation3 + $0x38] sm:$0xe]  ;;  %v7873_v28 = vld [vmem:[#allocation3 + $0x68] ss:$8 sps:$4 sm:$0xff]  }
 0x2f0   :  { %v7119_v14 = vrot.slane %v5406_v15, 9  ;;  %v5012_v13 = vshrl.u32 %v4979_v1, 16  ;;  %v5015_v29 = vshll.u32 %v4979_v1, 16  ;;  %7644 = vmatpush3.bf16.msra.mxu1 %v11189_v25  ;;  %7613 = vmatprep.mubr.msk.bf16.mxu1 %vm3325_vm0, %v7066_v12  ;;  %v7132_v33 = vcombine.low %v10277_v41, %v10281_v20  ;;  %v5408_v27 = vld [vmem:[#allocation3 + $0x40] sm:$0xe] }
 0x2f1   :  { %v10313_v8 = vsel %vm8301_vm13, %v7118_v63, %v5467_v34  ;;  %v5021_v43 = vshll.u32 %v10207_v59, 16  ;;  %v5026_v49 = vshrl.u32 %v4981_v22, 16  ;;  %v5029_v12 = vshll.u32 %v4981_v22, 16  ;;  %7748 = vmatprep.subr.msk.bf16.mxu1 %vm4238_vm5, %v10273_v31  ;;  %v4983_v38 = vld [vmem:[#allocation3 + $0x18] sm:$0xf] }
 0x2f2   :  { %v10322_v54 = vsel %vm8301_vm13, %v7119_v14, %v5471_v51  ;;  %v5014_v0 = vrot.slane %v5012_v13, 4  ;;  %v5017_v61 = vrot.slane %v5015_v29, 5  ;;  %v7071_v59 = vcombine.low %v10292_v35, %v10302_v23  ;;  %v4985_v17 = vld [vmem:[#allocation3 + $0x20] sm:$0xf]  ;;  %v10337_v14 = vld [vmem:[#allocation3 + $0x5c] sm:$0x1] }
 0x2f3   :  { %v7133_v55 = vcombine.low %v10313_v8, %v10322_v54  ;;  %v5028_v56 = vrot.slane %v5026_v49, 4  ;;  %v5035_v10 = vshll.u32 %v10209_v6, 16  ;;  %v5031_v7 = vrot.slane %v5029_v12, 5  ;;  %v7874_v15 = vld [vmem:[#allocation3 + $0x78] ss:$8 sps:$4 sm:$0xff]  }
 0x2f4   :  { %v5018_v3 = vor.u32 %v5017_v61, %v5014_v0  ;;  %v7120_v45 = vrot.slane %v5407_v53, 9  ;;  %v5475_v21 = vrot.slane %v10316_v58, 5  ;;  %v5023_v18 = vrot.slane %v5021_v43, 5  ;;  %v5409_v43 = vld [vmem:[#allocation3 + $0x58] sm:$0xe] }
 0x2f5   :  { %v7121_v9 = vrot.slane %v5408_v27, 9  ;;  %v5479_v52 = vrot.slane %v10318_v30, 5  ;;  %v5040_v34 = vshrl.u32 %v4983_v38, 16  ;;  %v5032_v51 = vor.u32 %v5031_v7, %v5028_v56  ;;  %v5410_v53 = vld [vmem:[#allocation3 + $0x60] sm:$0xe] }
 0x2f6   :  { %v5019_v63 = vrot.slane %v5018_v3, 4  ;;  %v10335_v1 = vsel %vm8301_vm13, %v7120_v45, %v5475_v21  ;;  %v5043_v6 = vshll.u32 %v4983_v38, 16  ;;  %7636 = vmatmul.mubr.msk.bf16.gmra.mxu0 %vm3325_vm0, %v7873_v28  ;;  %v5049_v29 = vshll.u32 %v10243_v62, 16  ;;  %v10359_v28 = vld [vmem:[#allocation3 + $0x64] sm:$0x1] }
 0x2f7   :  { %v10342_v22 = vsel %vm8301_vm13, %v7121_v9, %v5479_v52  ;;  %v5042_v13 = vrot.slane %v5040_v34, 4  ;;  %v5054_v25 = vshrl.u32 %v4985_v17, 16  ;;  %7614 = vmatmul.mubr.msk.bf16.gmra.mxu1 %vm3325_vm0, %v7067_v24  ;;  %7639 = vmatprep.mubr.msk.bf16.mxu0 %vm3325_vm0, %v7874_v15  ;;  %v5033_v0 = vrot.slane %v5032_v51, 4  ;;  %v4987_v7 = vld [vmem:[#allocation3 + $0x28] sm:$0xf] }
 0x2f8   :  { %v5024_v49 = vsel %vm8289_vm12, %v5019_v63, %v5023_v18  ;;  %v5037_v61 = vrot.slane %v5035_v10, 5  ;;  %v5045_v12 = vrot.slane %v5043_v6, 5  ;;  %7617 = vmatprep.mubr.msk.bf16.mxu1 %vm3325_vm0, %v7068_v39  ;;  %v7134_v62 = vcombine.low %v10335_v1, %v10342_v22  ;;  %v4989_v21 = vld [vmem:[#allocation3 + $0x30] sm:$0xf]  ;;  %v10372_v51 = vld [vmem:[#allocation3 + $0x6c] sm:$0x1] }
 0x2f9   :  { %v5056_v11 = vrot.slane %v5054_v25, 4  ;;  %v5057_v26 = vshll.u32 %v4985_v17, 16  ;;  %v5063_v24 = vshll.u32 %v10245_v40, 16  ;;  %v7122_v27 = vrot.slane %v5409_v43, 9  ;;  %v7875_v38 = vld [vmem:[#allocation3 + $0x88] ss:$8 sps:$4 sm:$0xff]  }
 0x2fa   :  { %v5038_v56 = vsel %vm8289_vm12, %v5033_v0, %v5037_v61  ;;  %v5046_v10 = vor.u32 %v5045_v12, %v5042_v13  ;;  %v5483_v3 = vrot.slane %v10337_v14, 5  ;;  %v5051_v50 = vrot.slane %v5049_v29, 5  ;;  %v10382_v43 = vld [vmem:[#allocation3 + $0x74] sm:$0x1]  ;;  %v4993_v44 = vld [vmem:[#allocation3 + $0x40] sm:$0xf] }
 0x2fb   :  { %v10364_v5 = vcombine.low %v5024_v49, %v5038_v56  ;;  %v5059_v39 = vrot.slane %v5057_v26, 5  ;;  %v7123_v45 = vrot.slane %v5410_v53, 9  ;;  %v5065_v9 = vrot.slane %v5063_v24, 5  ;;  %v5411_v49 = vld [vmem:[#allocation3 + $0x68] sm:$0xe] }
 0x2fc   :  { %v5047_v18 = vrot.slane %v5046_v10, 4  ;;  %v10368_v40 = vsel %vm8301_vm13, %v7122_v27, %v5483_v3  ;;  %v5487_v52 = vrot.slane %v10359_v28, 5  ;;  %v5068_v34 = vshrl.u32 %v4987_v7, 16  ;;  %v5412_v53 = vld [vmem:[#allocation3 + $0x70] sm:$0xe] }
 0x2fd   :  { %v5060_v17 = vor.u32 %v5059_v39, %v5056_v11  ;;  %v5071_v15 = vshll.u32 %v4987_v7, 16  ;;  %v5077_v63 = vshll.u32 %v10268_v57, 16  ;;  %v10380_v13 = vsel %vm4238_vm5, %v10273_v31, 0  ;;  %v4991_v56 = vld [vmem:[#allocation3 + $0x38] sm:$0xf] }
 0x2fe   :  { %v10376_v6 = vsel %vm8301_vm13, %v7123_v45, %v5487_v52  ;;  %v5082_v29 = vshrl.u32 %v4989_v21, 16  ;;  %v5085_v25 = vshll.u32 %v4989_v21, 16  ;;  %7640 = vmatmul.mubr.msk.bf16.gmra.mxu0 %vm3325_vm0, %v7875_v38  ;;  %v5052_v57 = vsel %vm8289_vm12, %v5047_v18, %v5051_v50  ;;  %v10411_v21 = vld [vmem:[#allocation3 + $0x7c] sm:$0x1] }
 0x2ff   :  { %v5061_v0 = vrot.slane %v5060_v17, 4  ;;  %v5070_v61 = vrot.slane %v5068_v34, 4  ;;  %v5073_v12 = vrot.slane %v5071_v15, 5  ;;  %7618 = vmatmul.mubr.msk.bf16.gmra.mxu1 %vm3325_vm0, %v7069_v19  ;;  %7663 = vmatprep.mubr.msk.bf16.mxu0 %vm3325_vm0, %v7131_v48  ;;  %v7135_v31 = vcombine.low %v10368_v40, %v10376_v6  ;;  %v5413_v17 = vld [vmem:[#allocation3 + $0x78] sm:$0xe] }
 0x300   :  { %v5084_v11 = vrot.slane %v5082_v29, 4  ;;  %v5087_v26 = vrot.slane %v5085_v25, 5  ;;  %v5091_v24 = vshll.u32 %v10284_v36, 16  ;;  %7621 = vmatprep.mubr.msk.bf16.mxu1 %vm3325_vm0, %v7070_v42  ;;  %v5079_v2 = vrot.slane %v5077_v63, 5  ;;  %v5414_v34 = vld [vmem:[#allocation3 + $0x80] sm:$0xe] }
 0x301   :  { %v5074_v47 = vor.u32 %v5073_v12, %v5070_v61  ;;  %v7124_v19 = vrot.slane %v5411_v49, 9  ;;  %v5491_v16 = vrot.slane %v10372_v51, 5  ;;  %v5066_v48 = vsel %vm8289_vm12, %v5061_v0, %v5065_v9  ;;  %v10423_v25 = vld [vmem:[#allocation3 + $0x84] sm:$0x1]  ;;  %v4995_v49 = vld [vmem:[#allocation3 + $0x58] sm:$0xf] }
 0x302   :  { %v5088_v10 = vor.u32 %v5087_v26, %v5084_v11  ;;  %v5093_v27 = vrot.slane %v5091_v24, 5  ;;  %v7125_v3 = vrot.slane %v5412_v53, 9  ;;  %v5495_v46 = vrot.slane %v10382_v43, 5  ;;  %v10447_v24 = vld [vmem:[#allocation3 + $0x8c] sm:$0x1] }
 0x303   :  { %v5075_v7 = vrot.slane %v5074_v47, 4  ;;  %v10407_v36 = vsel %vm8301_vm13, %v7124_v19, %v5491_v16  ;;  %v5096_v4 = vshrl.u32 %v4991_v56, 16  ;;  %v5099_v50 = vshll.u32 %v4991_v56, 16  ;;  %v5415_v19 = vld [vmem:[#allocation3 + $0x88] sm:$0xe] }
 0x304   :  { %v5089_v42 = vrot.slane %v5088_v10, 4  ;;  %v5105_v39 = vshll.u32 %v10316_v58, 16  ;;  %v5110_v45 = vshrl.u32 %v4993_v44, 16  ;;  %v7099_v38 = vcombine.low %v5052_v57, %v5066_v48  ;;  %v10483_v6 = vld [vmem:[#allocation3 + $0x14] sm:$0x1] }
 0x305   :  { %v10415_v18 = vsel %vm8301_vm13, %v7125_v3, %v5495_v46  ;;  %v5098_v9 = vrot.slane %v5096_v4, 4  ;;  %v5113_v52 = vshll.u32 %v4993_v44, 16  ;;  %v5080_v15 = vsel %vm8289_vm12, %v5075_v7, %v5079_v2 }
 0x306   :  { %v5094_v63 = vsel %vm8289_vm12, %v5089_v42, %v5093_v27  ;;  %v7136_v58 = vcombine.low %v10407_v36, %v10415_v18  ;;  %v5101_v29 = vrot.slane %v5099_v50, 5  ;;  %7664 = vmatmul.mubr.msk.bf16.vlgmr.msra.gmra.mxu0 %vm3325_vm0, %v7132_v33  ;;  %v5107_v57 = vrot.slane %v5105_v39, 5  ;;  %v4997_v33 = vld [vmem:[#allocation3 + $0x60] sm:$0xf]  ;;  %v10457_v27 = vld [vmem:[#allocation3 + $0x94] sm:$0x1] }
 0x307   :  { %v5112_v0 = vrot.slane %v5110_v45, 4  ;;  %v5115_v61 = vrot.slane %v5113_v52, 5  ;;  %v5119_v12 = vshll.u32 %v10318_v30, 16  ;;  %7622 = vmatmul.mubr.msk.bf16.gmra.mxu1 %vm3325_vm0, %v7071_v59  ;;  %7667 = vmatprep.mubr.msk.bf16.mxu0 %vm3325_vm0, %v7133_v55  ;;  %v7126_v11 = vrot.slane %v5413_v17, 9  ;;  %v4999_v42 = vld [vmem:[#allocation3 + $0x68] sm:$0xf] }
 0x308   :  { %v5102_v53 = vor.u32 %v5101_v29, %v5098_v9  ;;  %v5499_v41 = vrot.slane %v10411_v21, 5  ;;  %v7127_v20 = vrot.slane %v5414_v34, 9  ;;  %7645 = vmatprep.mubr.msk.bf16.mxu1 %vm3325_vm0, %v10364_v5  ;;  %v5503_v35 = vrot.slane %v10423_v25, 5  ;;  %v5001_v52 = vld [vmem:[#allocation3 + $0x70] sm:$0xf] }
 0x309   :  { %v5116_v30 = vor.u32 %v5115_v61, %v5112_v0  ;;  %v5121_v26 = vrot.slane %v5119_v12, 5  ;;  %v5124_v23 = vshrl.u32 %v4995_v49, 16  ;;  %v5127_v54 = vshll.u32 %v4995_v49, 16 }
 0x30a   :  { %v5103_v59 = vrot.slane %v5102_v53, 4  ;;  %v10444_v8 = vsel %vm8301_vm13, %v7126_v11, %v5499_v41  ;;  %v5133_v55 = vshll.u32 %v10337_v14, 16  ;;  %v10451_v47 = vsel %vm8301_vm13, %v7127_v20, %v5503_v35  ;;  %v5416_v14 = vld [vmem:[#allocation3 + $0x90] sm:$0xe] }
 0x30b   :  { %v5117_v56 = vrot.slane %v5116_v30, 4  ;;  %v5126_v5 = vrot.slane %v5124_v23, 4  ;;  %v5138_v2 = vshrl.u32 %v4997_v33, 16  ;;  %v7100_v16 = vcombine.low %v5080_v15, %v5094_v63 }
 0x30c   :  { %v5108_v44 = vsel %vm8289_vm12, %v5103_v59, %v5107_v57  ;;  %v7137_v48 = vcombine.low %v10444_v8, %v10451_v47  ;;  %v5129_v10 = vrot.slane %v5127_v54, 5  ;;  %v5141_v46 = vshll.u32 %v4997_v33, 16 }
 0x30d   :  { %v5122_v3 = vsel %vm8289_vm12, %v5117_v56, %v5121_v26  ;;  %v5140_v7 = vrot.slane %v5138_v2, 4  ;;  %v5147_v4 = vshll.u32 %v10359_v28, 16  ;;  %v5135_v39 = vrot.slane %v5133_v55, 5  ;;  %v10491_v26 = vld [vmem:[#allocation3 + $0x1c] sm:$0x1] }
 0x30e   :  { %v5130_v50 = vor.u32 %v5129_v10, %v5126_v5  ;;  %v7128_v45 = vrot.slane %v5415_v19, 9  ;;  %v5507_v9 = vrot.slane %v10447_v24, 5  ;;  %7668 = vmatmul.mubr.msk.bf16.gmra.mxu0 %vm3325_vm0, %v7134_v62  ;;  %v7101_v17 = vcombine.low %v5108_v44, %v5122_v3  ;;  %v5878_v62 = vld [vmem:[#allocation3 + $0x10] sm:$0xf]  ;;  %v5003_v56 = vld [vmem:[#allocation3 + $0x78] sm:$0xf] }
 0x30f   :  { %v5143_v34 = vrot.slane %v5141_v46, 5  ;;  %v7129_v15 = vrot.slane %v5416_v14, 9  ;;  %v5511_v63 = vrot.slane %v10457_v27, 5  ;;  %7646 = vmatmul.mubr.msk.bf16.vlgmr.msra.gmra.mxu1 %vm3325_vm0, %v7099_v38  ;;  %7671 = vmatprep.mubr.msk.bf16.mxu0 %vm3325_vm0, %v7135_v31  ;;  %v5152_v1 = vshrl.u32 %v4999_v42, 16  ;;  %v5880_v31 = vld [vmem:[#allocation3 + $0x18] sm:$0xf] }
 0x310   :  { %v5131_v28 = vrot.slane %v5130_v50, 4  ;;  %v10475_v29 = vsel %vm8301_vm13, %v7128_v45, %v5507_v9  ;;  %v5155_v22 = vshll.u32 %v4999_v42, 16  ;;  %7680 = vmatpush3.bf16.msra.mxu1 %v10380_v13  ;;  %7649 = vmatprep.mubr.msk.bf16.mxu1 %vm3325_vm0, %v7100_v16  ;;  %v5149_v57 = vrot.slane %v5147_v4, 5  ;;  %v5005_v44 = vld [vmem:[#allocation3 + $0x80] sm:$0xf] }
 0x311   :  { %v5144_v49 = vor.u32 %v5143_v34, %v5140_v7  ;;  %v10481_v38 = vsel %vm8301_vm13, %v7129_v15, %v5511_v63  ;;  %v5166_v40 = vshrl.u32 %v5001_v52, 16  ;;  %v5154_v61 = vrot.slane %v5152_v1, 4  ;;  %v10503_v7 = vld [vmem:[%s11055_s4 + $0x20] sm:$0xf] }
 0x312   :  { %v5136_v0 = vsel %vm8289_vm12, %v5131_v28, %v5135_v39  ;;  %v5157_v12 = vrot.slane %v5155_v22, 5  ;;  %v5161_v53 = vshll.u32 %v10372_v51, 16  ;;  %v7138_v11 = vcombine.low %v10475_v29, %v10481_v38  ;;  %7750 = vmatprep.subr.msk.bf16.mxu1 %vm4238_vm5, %v10503_v7  ;;  %v5882_v15 = vld [vmem:[#allocation3 + $0x20] sm:$0xf]  ;;  %v10519_v22 = vld [vmem:[#allocation3 + $0x24] sm:$0x1] }
 0x313   :  { %v5145_v13 = vrot.slane %v5144_v49, 4  ;;  %v5168_v41 = vrot.slane %v5166_v40, 4  ;;  %v5169_v20 = vshll.u32 %v5001_v52, 16  ;;  %v5175_v30 = vshll.u32 %v10382_v43, 16 }
 0x314   :  { %v5158_v33 = vor.u32 %v5157_v12, %v5154_v61  ;;  %v5911_v35 = vshrl.u32 %v5878_v62, 16  ;;  %v5914_v23 = vshll.u32 %v5878_v62, 16  ;;  %v5920_v55 = vshll.u32 %v10483_v6, 16  ;;  %v5884_v62 = vld [vmem:[#allocation3 + $0x28] sm:$0xf] }
 0x315   :  { %v5150_v59 = vsel %vm8289_vm12, %v5145_v13, %v5149_v57  ;;  %v5171_v54 = vrot.slane %v5169_v20, 5  ;;  %v5925_v51 = vshrl.u32 %v5880_v31, 16  ;;  %v5163_v19 = vrot.slane %v5161_v53, 5  ;;  %v10527_v13 = vld [vmem:[#allocation3 + $0x2c] sm:$0x1] }
 0x316   :  { %v7102_v5 = vcombine.low %v5136_v0, %v5150_v59  ;;  %v5159_v2 = vrot.slane %v5158_v33, 4  ;;  %v5913_v16 = vrot.slane %v5911_v35, 4  ;;  %7672 = vmatmul.mubr.msk.bf16.gmra.mxu0 %vm3325_vm0, %v7136_v58  ;;  %v5177_v10 = vrot.slane %v5175_v30, 5  ;;  %v5007_v35 = vld [vmem:[#allocation3 + $0x88] sm:$0xf] }
 0x317   :  { %v5172_v43 = vor.u32 %v5171_v54, %v5168_v41  ;;  %v5916_v14 = vrot.slane %v5914_v23, 5  ;;  %v5922_v3 = vrot.slane %v5920_v55, 5  ;;  %7650 = vmatmul.mubr.msk.bf16.gmra.mxu1 %vm3325_vm0, %v7101_v17  ;;  %7675 = vmatprep.mubr.msk.bf16.mxu0 %vm3325_vm0, %v7137_v48  ;;  %v5927_v46 = vrot.slane %v5925_v51, 4  ;;  %v5009_v23 = vld [vmem:[#allocation3 + $0x90] sm:$0xf] }
 0x318   :  { %v5928_v36 = vshll.u32 %v5880_v31, 16  ;;  %v5934_v18 = vshll.u32 %v10491_v26, 16  ;;  %v5180_v58 = vshrl.u32 %v5003_v56, 16  ;;  %7653 = vmatprep.mubr.msk.bf16.mxu1 %vm3325_vm0, %v7102_v5  ;;  %v5164_v4 = vsel %vm8289_vm12, %v5159_v2, %v5163_v19 }
 0x319   :  { %v5173_v42 = vrot.slane %v5172_v43, 4  ;;  %v5917_v50 = vor.u32 %v5916_v14, %v5913_v16  ;;  %v5183_v39 = vshll.u32 %v5003_v56, 16  ;;  %v5189_v47 = vshll.u32 %v10411_v21, 16 }
 0x31a   :  { %v5930_v45 = vrot.slane %v5928_v36, 5  ;;  %v5182_v8 = vrot.slane %v5180_v58, 4  ;;  %v5194_v48 = vshrl.u32 %v5005_v44, 16  ;;  %v5936_v17 = vrot.slane %v5934_v18, 5  ;;  %v5886_v36 = vld [vmem:[#allocation3 + $0x30] sm:$0xf] }
 0x31b   :  { %v5178_v9 = vsel %vm8289_vm12, %v5173_v42, %v5177_v10  ;;  %v5918_v52 = vrot.slane %v5917_v50, 4  ;;  %v5185_v34 = vrot.slane %v5183_v39, 5  ;;  %v5197_v1 = vshll.u32 %v5005_v44, 16  ;;  %v5888_v50 = vld [vmem:[#allocation3 + $0x38] sm:$0xf] }
 0x31c   :  { %v7103_v63 = vcombine.low %v5164_v4, %v5178_v9  ;;  %v5931_v28 = vor.u32 %v5930_v45, %v5927_v46  ;;  %v5196_v29 = vrot.slane %v5194_v48, 4  ;;  %v5203_v21 = vshll.u32 %v10423_v25, 16  ;;  %v10540_v48 = vld [vmem:[#allocation3 + $0x34] sm:$0x1] }
 0x31d   :  { %v5923_v49 = vsel %vm8289_vm12, %v5918_v52, %v5922_v3  ;;  %v5186_v57 = vor.u32 %v5185_v34, %v5182_v8  ;;  %v6185_v38 = vsel %vm4238_vm5, %v10195_v60, 0  ;;  %v5199_v31 = vrot.slane %v5197_v1, 5  ;;  %v10544_v52 = vld [vmem:[#allocation3 + $0x3c] sm:$0x1] }
 0x31e   :  { %v5932_v40 = vrot.slane %v5931_v28, 4  ;;  %7698 = vmatpush3.bf16.msra.mxu0 %v6185_v38  ;;  %v5939_v0 = vshrl.u32 %v5882_v15, 16  ;;  %v5942_v61 = vshll.u32 %v5882_v15, 16  ;;  %v5191_v53 = vrot.slane %v5189_v47, 5 }
 0x31f   :  { %7676 = vmatmul.mubr.msk.bf16.gmra.mxu0 %vm3325_vm0, %v7138_v11  ;;  %v5187_v12 = vrot.slane %v5186_v57, 4  ;;  %v5948_v41 = vshll.u32 %v10519_v22, 16  ;;  %v5953_v20 = vshrl.u32 %v5884_v62, 16  ;;  %7654 = vmatmul.mubr.msk.bf16.gmra.mxu1 %vm3325_vm0, %v7103_v63  ;;  %v5200_v60 = vor.u32 %v5199_v31, %v5196_v29 }
 0x320   :  { %v5937_v25 = vsel %vm8289_vm12, %v5932_v40, %v5936_v17  ;;  %v5941_v33 = vrot.slane %v5939_v0, 4  ;;  %v5944_v30 = vrot.slane %v5942_v61, 5  ;;  %v5205_v54 = vrot.slane %v5203_v21, 5  ;;  %v5890_v21 = vld [vmem:[#allocation3 + $0x40] sm:$0xf] }
 0x321   :  { %v7165_v59 = vcombine.low %v5923_v49, %v5937_v25  ;;  %v5192_v11 = vsel %vm8289_vm12, %v5187_v12, %v5191_v53  ;;  %v5955_v55 = vrot.slane %v5953_v20, 4  ;;  %v5201_v51 = vrot.slane %v5200_v60, 4  ;;  %v5892_v0 = vld [vmem:[#allocation3 + $0x48] sm:$0xf]  ;;  %v10553_v20 = vld [vmem:[#allocation3 + $0x44] sm:$0x1] }
 0x322   :  { %v5945_v56 = vor.u32 %v5944_v30, %v5941_v33  ;;  %v5956_v5 = vshll.u32 %v5884_v62, 16  ;;  %v5962_v2 = vshll.u32 %v10527_v13, 16  ;;  %v5208_v19 = vshrl.u32 %v5007_v35, 16 }
 0x323   :  { %7699 = vmatprep.mubr.msk.bf16.mxu0 %vm3325_vm0, %v7165_v59  ;;  %v5211_v16 = vshll.u32 %v5007_v35, 16  ;;  %v5217_v44 = vshll.u32 %v10447_v24, 16  ;;  %v5222_v43 = vshrl.u32 %v5009_v23, 16  ;;  %v5206_v10 = vsel %vm8289_vm12, %v5201_v51, %v5205_v54  ;;  %v5894_v35 = vld [vmem:[#allocation3 + $0x60] sm:$0xf] }
 0x324   :  { %v5946_v14 = vrot.slane %v5945_v56, 4  ;;  %v5950_v3 = vrot.slane %v5948_v41, 5  ;;  %v5958_v46 = vrot.slane %v5956_v5, 5  ;;  %v7104_v18 = vcombine.low %v5192_v11, %v5206_v10 }
 0x325   :  { %v5964_v58 = vrot.slane %v5962_v2, 5  ;;  %v5210_v4 = vrot.slane %v5208_v19, 4  ;;  %v5213_v42 = vrot.slane %v5211_v16, 5  ;;  %v5219_v45 = vrot.slane %v5217_v44, 5  ;;  %v5896_v16 = vld [vmem:[#allocation3 + $0x68] sm:$0xf] }
 0x326   :  { %v5959_v39 = vor.u32 %v5958_v46, %v5955_v55  ;;  %v5224_v8 = vrot.slane %v5222_v43, 4  ;;  %v5225_v47 = vshll.u32 %v5009_v23, 16  ;;  %7657 = vmatprep.mubr.msk.bf16.mxu1 %vm3325_vm0, %v7104_v18  ;;  %v5231_v9 = vshll.u32 %v10457_v27, 16  ;;  %v10556_v23 = vld [vmem:[#allocation3 + $0x64] sm:$0x1] }
 0x327   :  { %v5214_v24 = vor.u32 %v5213_v42, %v5210_v4  ;;  %v5967_v17 = vshrl.u32 %v5886_v36, 16  ;;  %v5970_v34 = vshll.u32 %v5886_v36, 16  ;;  %v5951_v15 = vsel %vm8289_vm12, %v5946_v14, %v5950_v3  ;;  %v10559_v55 = vld [vmem:[#allocation3 + $0x4c] sm:$0x1]  ;;  %v7876_v3 = vld [vmem:[#allocation3 + $0x10] ss:$8 sps:$4 sm:$0xff]  }
 0x328   :  { %v5960_v63 = vrot.slane %v5959_v39, 4  ;;  %v5227_v28 = vrot.slane %v5225_v47, 5  ;;  %v5981_v29 = vshrl.u32 %v5888_v50, 16  ;;  %v5976_v57 = vshll.u32 %v10540_v48, 16  ;;  %v10570_v47 = vld [vmem:[#allocation3 + $0x6c] sm:$0x1] }
 0x329   :  { %v5215_v1 = vrot.slane %v5214_v24, 4  ;;  %v5969_v62 = vrot.slane %v5967_v17, 4  ;;  %v5972_v49 = vrot.slane %v5970_v34, 5  ;;  %v5233_v40 = vrot.slane %v5231_v9, 5 }
 0x32a   :  { %v5965_v38 = vsel %vm8289_vm12, %v5960_v63, %v5964_v58  ;;  %v5228_v27 = vor.u32 %v5227_v28, %v5224_v8  ;;  %v5983_v31 = vrot.slane %v5981_v29, 4  ;;  %v5984_v41 = vshll.u32 %v5888_v50, 16  ;;  %v5898_v63 = vld [vmem:[#allocation3 + $0x70] sm:$0xf] }
 0x32b   :  { %v7166_v61 = vcombine.low %v5951_v15, %v5965_v38  ;;  %v5220_v12 = vsel %vm8289_vm12, %v5215_v1, %v5219_v45  ;;  %v5973_v53 = vor.u32 %v5972_v49, %v5969_v62  ;;  %v5990_v60 = vshll.u32 %v10544_v52, 16  ;;  %v5900_v49 = vld [vmem:[#allocation3 + $0x78] sm:$0xf] }
 0x32c   :  { %v5229_v25 = vrot.slane %v5228_v27, 4  ;;  %v5995_v33 = vshrl.u32 %v5890_v21, 16  ;;  %v5998_v30 = vshll.u32 %v5890_v21, 16  ;;  %v5978_v11 = vrot.slane %v5976_v57, 5  ;;  %v7877_v57 = vld [vmem:[#allocation3 + $0x20] ss:$8 sps:$4 sm:$0xff]  }
 0x32d   :  { %7700 = vmatmul.mubr.msk.bf16.vlgmr.msra.gmra.mxu0 %vm3325_vm0, %v7166_v61  ;;  %v5974_v59 = vrot.slane %v5973_v53, 4  ;;  %v5986_v54 = vrot.slane %v5984_v41, 5  ;;  %v6009_v51 = vshrl.u32 %v5892_v0, 16  ;;  %v6004_v19 = vshll.u32 %v10553_v20, 16  ;;  %v10580_v53 = vld [vmem:[#allocation3 + $0x7c] sm:$0x1] }
 0x32e   :  { %v5234_v56 = vsel %vm8289_vm12, %v5229_v25, %v5233_v40  ;;  %v5997_v5 = vrot.slane %v5995_v33, 4  ;;  %v6000_v2 = vrot.slane %v5998_v30, 5  ;;  %v5992_v14 = vrot.slane %v5990_v60, 5 }
 0x32f   :  { %v7105_v44 = vcombine.low %v5220_v12, %v5234_v56  ;;  %v5979_v43 = vsel %vm8289_vm12, %v5974_v59, %v5978_v11  ;;  %v5987_v10 = vor.u32 %v5986_v54, %v5983_v31  ;;  %v6011_v36 = vrot.slane %v6009_v51, 4  ;;  %v10575_v31 = vld [vmem:[#allocation3 + $0x74] sm:$0x1]  ;;  %v7878_v12 = vld [vmem:[#allocation3 + $0x30] ss:$8 sps:$4 sm:$0xff]  }
 0x330   :  { %v6001_v46 = vor.u32 %v6000_v2, %v5997_v5  ;;  %v6012_v18 = vshll.u32 %v5892_v0, 16  ;;  %v6018_v58 = vshll.u32 %v10559_v55, 16  ;;  %v6023_v42 = vshrl.u32 %v5894_v35, 16  ;;  %v5902_v59 = vld [vmem:[#allocation3 + $0x80] sm:$0xf] }
 0x331   :  { %7658 = vmatmul.mubr.msk.bf16.gmra.mxu1 %vm3325_vm0, %v7105_v44  ;;  %v5988_v4 = vrot.slane %v5987_v10, 4  ;;  %v6026_v50 = vshll.u32 %v5894_v35, 16  ;;  %v6032_v39 = vshll.u32 %v10556_v23, 16  ;;  %v6037_v24 = vshrl.u32 %v5896_v16, 16  ;;  %v5904_v5 = vld [vmem:[#allocation3 + $0x88] sm:$0xf] }
 0x332   :  { %7681 = vmatprep.mubr.msk.bf16.mxu1 %vm3325_vm0, %v7876_v3  ;;  %v6002_v45 = vrot.slane %v6001_v46, 4  ;;  %v6014_v8 = vrot.slane %v6012_v18, 5  ;;  %v6006_v17 = vrot.slane %v6004_v19, 5  ;;  %v6025_v34 = vrot.slane %v6023_v42, 4  ;;  %v10595_v18 = vld [vmem:[#allocation3 + $0x8c] sm:$0x1] }
 0x333   :  { %v5993_v9 = vsel %vm8289_vm12, %v5988_v4, %v5992_v14  ;;  %v6028_v15 = vrot.slane %v6026_v50, 5  ;;  %v6020_v1 = vrot.slane %v6018_v58, 5  ;;  %v6034_v62 = vrot.slane %v6032_v39, 5  ;;  %v10590_v14 = vld [vmem:[#allocation3 + $0x84] sm:$0x1] }
 0x334   :  { %v7167_v28 = vcombine.low %v5979_v43, %v5993_v9  ;;  %v6015_v29 = vor.u32 %v6014_v8, %v6011_v36  ;;  %v6039_v38 = vrot.slane %v6037_v24, 4  ;;  %v6040_v27 = vshll.u32 %v5896_v16, 16  ;;  %v5906_v8 = vld [vmem:[#allocation3 + $0x90] sm:$0xf] }
 0x335   :  { %v6029_v21 = vor.u32 %v6028_v15, %v6025_v34  ;;  %v6046_v40 = vshll.u32 %v10570_v47, 16  ;;  %v6007_v0 = vsel %vm8289_vm12, %v6002_v45, %v6006_v17  ;;  %v6051_v41 = vshrl.u32 %v5898_v63, 16  ;;  %v5908_v15 = vld [vmem:[#allocation3 + $0x98] sm:$0xf] }
 0x336   :  { %7703 = vmatprep.mubr.msk.bf16.mxu0 %vm3325_vm0, %v7167_v28  ;;  %v6016_v61 = vrot.slane %v6015_v29, 4  ;;  %v6054_v25 = vshll.u32 %v5898_v63, 16  ;;  %v6042_v33 = vrot.slane %v6040_v27, 5  ;;  %v6463_v30 = vsel %vm4238_vm5, %v10503_v7, 0 }
 0x337   :  { %v6030_v60 = vrot.slane %v6029_v21, 4  ;;  %v6065_v35 = vshrl.u32 %v5900_v49, 16  ;;  %v6053_v54 = vrot.slane %v6051_v41, 4  ;;  %v6060_v56 = vshll.u32 %v10575_v31, 16  ;;  %v10602_v21 = vld [vmem:[#allocation3 + $0x94] sm:$0x1] }
 0x338   :  { %v6021_v11 = vsel %vm8289_vm12, %v6016_v61, %v6020_v1  ;;  %v6056_v51 = vrot.slane %v6054_v25, 5  ;;  %v6043_v19 = vor.u32 %v6042_v33, %v6039_v38  ;;  %v6048_v16 = vrot.slane %v6046_v40, 5 }
 0x339   :  { %v7168_v2 = vcombine.low %v6007_v0, %v6021_v11  ;;  %7682 = vmatmul.mubr.msk.bf16.vlgmr.msra.gmra.mxu1 %vm3325_vm0, %v7877_v57  ;;  %v6067_v44 = vrot.slane %v6065_v35, 4  ;;  %v6068_v43 = vshll.u32 %v5900_v49, 16  ;;  %v6074_v10 = vshll.u32 %v10580_v53, 16  ;;  %v7879_v49 = vld [vmem:[#allocation3 + $0x40] ss:$8 sps:$4 sm:$0xff]  }
 0x33a   :  { %7716 = vmatpush3.bf16.msra.mxu1 %v6463_v30  ;;  %7685 = vmatprep.mubr.msk.bf16.mxu1 %vm3325_vm0, %v7878_v12  ;;  %v6057_v7 = vor.u32 %v6056_v51, %v6053_v54  ;;  %v6079_v3 = vshrl.u32 %v5902_v59, 16  ;;  %v6035_v46 = vsel %vm8289_vm12, %v6030_v60, %v6034_v62  ;;  %v6044_v36 = vrot.slane %v6043_v19, 4  ;;  %v7880_v12 = vld [vmem:[#allocation3 + $0x60] ss:$8 sps:$4 sm:$0xff]   ;;  %v10611_v51 = vld [vmem:[#allocation3 + $0x9c] sm:$0x1] }
 0x33b   :  { %7704 = vmatmul.mubr.msk.bf16.gmra.mxu0 %vm3325_vm0, %v7168_v2  ;;  %v6082_v58 = vshll.u32 %v5902_v59, 16  ;;  %v6093_v4 = vshrl.u32 %v5904_v5, 16  ;;  %v6062_v50 = vrot.slane %v6060_v56, 5  ;;  %v6070_v39 = vrot.slane %v6068_v43, 5 }
 0x33c   :  { %v6058_v42 = vrot.slane %v6057_v7, 4  ;;  %v6081_v45 = vrot.slane %v6079_v3, 4  ;;  %v6049_v24 = vsel %vm8289_vm12, %v6044_v36, %v6048_v16  ;;  %v6076_v9 = vrot.slane %v6074_v10, 5  ;;  %v6300_v3 = vld [vmem:[#allocation3 + $0x10] sm:$0xe] }
 0x33d   :  { %v6084_v17 = vrot.slane %v6082_v58, 5  ;;  %v6088_v34 = vshll.u32 %v10590_v14, 16  ;;  %v7169_v63 = vcombine.low %v6035_v46, %v6049_v24  ;;  %v6071_v28 = vor.u32 %v6070_v39, %v6067_v44  ;;  %v6301_v36 = vld [vmem:[#allocation3 + $0x18] sm:$0xe] }
 0x33e   :  { %v6095_v29 = vrot.slane %v6093_v4, 4  ;;  %v6096_v1 = vshll.u32 %v5904_v5, 16  ;;  %v6063_v62 = vsel %vm8289_vm12, %v6058_v42, %v6062_v50  ;;  %v6107_v38 = vshrl.u32 %v5906_v8, 16  ;;  %v7881_v39 = vld [vmem:[#allocation3 + $0x70] ss:$8 sps:$4 sm:$0xff]  }
 0x33f   :  { %v6085_v57 = vor.u32 %v6084_v17, %v6081_v45  ;;  %v6110_v27 = vshll.u32 %v5906_v8, 16  ;;  %7707 = vmatprep.mubr.msk.bf16.mxu0 %vm3325_vm0, %v7169_v63  ;;  %v6072_v40 = vrot.slane %v6071_v28, 4  ;;  %v6102_v61 = vshll.u32 %v10595_v18, 16  ;;  %v7882_v45 = vld [vmem:[#allocation3 + $0x80] ss:$8 sps:$4 sm:$0xff]  }
 0x340   :  { %v6098_v0 = vrot.slane %v6096_v1, 5  ;;  %v6121_v41 = vshrl.u32 %v5908_v15, 16  ;;  %v6109_v60 = vrot.slane %v6107_v38, 4  ;;  %v6090_v35 = vrot.slane %v6088_v34, 5  ;;  %v7883_v38 = vld [vmem:[#allocation3 + $0x90] ss:$8 sps:$4 sm:$0xff]  }
 0x341   :  { %7686 = vmatmul.mubr.msk.bf16.gmra.mxu1 %vm3325_vm0, %v7879_v49  ;;  %v6086_v25 = vrot.slane %v6085_v57, 4  ;;  %v6112_v33 = vrot.slane %v6110_v27, 5  ;;  %v6077_v30 = vsel %vm8289_vm12, %v6072_v40, %v6076_v9  ;;  %v6116_v11 = vshll.u32 %v10602_v21, 16  ;;  %v6304_v49 = vld [vmem:[#allocation3 + $0x30] sm:$0xe] }
 0x342   :  { %v6099_v59 = vor.u32 %v6098_v0, %v6095_v29  ;;  %7689 = vmatprep.mubr.msk.bf16.mxu1 %vm3325_vm0, %v7880_v12  ;;  %v7170_v54 = vcombine.low %v6063_v62, %v6077_v30  ;;  %v6123_v5 = vrot.slane %v6121_v41, 4  ;;  %v6124_v2 = vshll.u32 %v5908_v15, 16  ;;  %v6302_v29 = vld [vmem:[#allocation3 + $0x20] sm:$0xe]  ;;  %v6303_v62 = vld [vmem:[#allocation3 + $0x28] sm:$0xe] }
 0x343   :  { %v6113_v56 = vor.u32 %v6112_v33, %v6109_v60  ;;  %v6091_v19 = vsel %vm8289_vm12, %v6086_v25, %v6090_v35  ;;  %v6104_v44 = vrot.slane %v6102_v61, 5  ;;  %v6130_v7 = vshll.u32 %v10611_v51, 16  ;;  %v6305_v57 = vld [vmem:[#allocation3 + $0x38] sm:$0xe]  ;;  %v6307_v35 = vld [vmem:[#allocation3 + $0x48] sm:$0xe] }
 0x344   :  { %v6100_v16 = vrot.slane %v6099_v59, 4  ;;  %7708 = vmatmul.mubr.msk.bf16.gmra.mxu0 %vm3325_vm0, %v7170_v54  ;;  %v6126_v10 = vrot.slane %v6124_v2, 5  ;;  %v6118_v4 = vrot.slane %v6116_v11, 5  ;;  %v7181_v8 = vrot.slane %v6300_v3, 9  ;;  %v6309_v59 = vld [vmem:[#allocation3 + $0x68] sm:$0xe] }
 0x345   :  { %v6114_v43 = vrot.slane %v6113_v56, 4  ;;  %v6132_v50 = vrot.slane %v6130_v7, 5  ;;  %v6350_v24 = vrot.slane %v10483_v6, 5  ;;  %v7182_v34 = vrot.slane %v6301_v36, 9  ;;  %v6313_v36 = vld [vmem:[#allocation3 + $0x88] sm:$0xe] }
 0x346   :  { %v6105_v46 = vsel %vm8289_vm12, %v6100_v16, %v6104_v44  ;;  %v6127_v42 = vor.u32 %v6126_v10, %v6123_v5  ;;  %v6354_v15 = vrot.slane %v10491_v26, 5  ;;  %v7183_v26 = vrot.slane %v6302_v29, 9 }
 0x347   :  { %v7171_v58 = vcombine.low %v6091_v19, %v6105_v46  ;;  %v6119_v9 = vsel %vm8289_vm12, %v6114_v43, %v6118_v4  ;;  %v6351_v6 = vsel %vm8301_vm13, %v7181_v8, %v6350_v24  ;;  %v6358_v40 = vrot.slane %v10519_v22, 5  ;;  %v6306_v22 = vld [vmem:[#allocation3 + $0x40] sm:$0xe]  ;;  %v6311_v46 = vld [vmem:[#allocation3 + $0x78] sm:$0xe] }
 0x348   :  { %v6128_v17 = vrot.slane %v6127_v42, 4  ;;  %v6355_v1 = vsel %vm8301_vm13, %v7182_v34, %v6354_v15  ;;  %v7184_v32 = vrot.slane %v6303_v62, 9  ;;  %v6362_v0 = vrot.slane %v10527_v13, 5 }
 0x349   :  { %7711 = vmatprep.mubr.msk.bf16.mxu0 %vm3325_vm0, %v7171_v58  ;;  %7690 = vmatmul.mubr.msk.bf16.gmra.mxu1 %vm3325_vm0, %v7881_v39  ;;  %v7198_v27 = vcombine.low %v6351_v6, %v6355_v1  ;;  %v7185_v61 = vrot.slane %v6304_v49, 9  ;;  %v6366_v12 = vrot.slane %v10540_v48, 5  ;;  %v7186_v41 = vrot.slane %v6305_v57, 9  ;;  %v6308_v48 = vld [vmem:[#allocation3 + $0x60] sm:$0xe] }
 0x34a   :  { %7693 = vmatprep.mubr.msk.bf16.mxu1 %vm3325_vm0, %v7882_v45  ;;  %v6133_v63 = vsel %vm8289_vm12, %v6128_v17, %v6132_v50  ;;  %v6370_v25 = vrot.slane %v10544_v52, 5  ;;  %v6359_v60 = vsel %vm8301_vm13, %v7183_v26, %v6358_v40  ;;  %v6363_v33 = vsel %vm8301_vm13, %v7184_v32, %v6362_v0 }
 0x34b   :  { %v7172_v28 = vcombine.low %v6119_v9, %v6133_v63  ;;  %v6367_v13 = vsel %vm8301_vm13, %v7185_v61, %v6366_v12  ;;  %v7199_v11 = vcombine.low %v6359_v60, %v6363_v33  ;;  %v7187_v52 = vrot.slane %v6306_v22, 9  ;;  %v6315_v63 = vld [vmem:[#allocation3 + $0x98] sm:$0xe] }
 0x34c   :  { %v6371_v30 = vsel %vm8301_vm13, %v7186_v41, %v6370_v25  ;;  %v6374_v56 = vrot.slane %v10553_v20, 5  ;;  %v7188_v5 = vrot.slane %v6307_v35, 9  ;;  %v6378_v2 = vrot.slane %v10559_v55, 5  ;;  %v6310_v20 = vld [vmem:[#allocation3 + $0x70] sm:$0xe] }
 0x34d   :  { %7712 = vmatmul.mubr.msk.bf16.gmra.mxu0 %vm3325_vm0, %v7172_v28  ;;  %v7200_v54 = vcombine.low %v6367_v13, %v6371_v30  ;;  %v7189_v19 = vrot.slane %v6308_v48, 9  ;;  %v6382_v16 = vrot.slane %v10556_v23, 5  ;;  %v7190_v44 = vrot.slane %v6309_v59, 9  ;;  %v6312_v23 = vld [vmem:[#allocation3 + $0x80] sm:$0xe] }
 0x34e   :  { %v6386_v7 = vrot.slane %v10570_v47, 5  ;;  %v6375_v43 = vsel %vm8301_vm13, %v7187_v52, %v6374_v56  ;;  %v6379_v10 = vsel %vm8301_vm13, %v7188_v5, %v6378_v2  ;;  %v7191_v47 = vrot.slane %v6310_v20, 9 }
 0x34f   :  { %v6383_v55 = vsel %vm8301_vm13, %v7189_v19, %v6382_v16  ;;  %v7201_v58 = vcombine.low %v6375_v43, %v6379_v10  ;;  %v6390_v42 = vrot.slane %v10575_v31, 5  ;;  %v7192_v50 = vrot.slane %v6311_v46, 9  ;;  %v6314_v31 = vld [vmem:[#allocation3 + $0x90] sm:$0xe] }
 0x350   :  { %v6387_v3 = vsel %vm8301_vm13, %v7190_v44, %v6386_v7  ;;  %v6394_v39 = vrot.slane %v10580_v53, 5  ;;  %v7193_v45 = vrot.slane %v6312_v23, 9  ;;  %v6398_v8 = vrot.slane %v10590_v14, 5 }
 0x351   :  { %7694 = vmatmul.mubr.msk.bf16.gmra.mxu1 %vm3325_vm0, %v7883_v38  ;;  %v7202_v4 = vcombine.low %v6383_v55, %v6387_v3  ;;  %v7194_v24 = vrot.slane %v6313_v36, 9  ;;  %v6402_v9 = vrot.slane %v10595_v18, 5  ;;  %v6391_v17 = vsel %vm8301_vm13, %v7191_v47, %v6390_v42 }
 0x352   :  { %7717 = vmatprep.mubr.msk.bf16.mxu1 %vm3325_vm0, %v7198_v27  ;;  %v6395_v34 = vsel %vm8301_vm13, %v7192_v50, %v6394_v39  ;;  %v6399_v53 = vsel %vm8301_vm13, %v7193_v45, %v6398_v8  ;;  %v7195_v28 = vrot.slane %v6314_v31, 9  ;;  %v6406_v18 = vrot.slane %v10602_v21, 5 }
 0x353   :  { %v6403_v15 = vsel %vm8301_vm13, %v7194_v24, %v6402_v9  ;;  %v7203_v14 = vcombine.low %v6391_v17, %v6395_v34  ;;  %v7196_v6 = vrot.slane %v6315_v63, 9  ;;  %v6410_v1 = vrot.slane %v10611_v51, 5 }
 0x354   :  { %v7204_v29 = vcombine.low %v6399_v53, %v6403_v15  ;;  %v6407_v62 = vsel %vm8301_vm13, %v7195_v28, %v6406_v18 }
 0x355   :  { %v6411_v49 = vsel %vm8301_vm13, %v7196_v6, %v6410_v1 }
 0x356   :  { %v7205_v57 = vcombine.low %v6407_v62, %v6411_v49 }
 0x359   :  { %7718 = vmatmul.mubr.msk.bf16.vlgmr.msra.gmra.mxu1 %vm3325_vm0, %v7199_v11 }
 0x35a   :  { %7721 = vmatprep.mubr.msk.bf16.mxu1 %vm3325_vm0, %v7200_v54 }
 0x361   :  { %7722 = vmatmul.mubr.msk.bf16.gmra.mxu1 %vm3325_vm0, %v7201_v58 }
 0x362   :  { %7725 = vmatprep.mubr.msk.bf16.mxu1 %vm3325_vm0, %v7202_v4 }
 0x369   :  { %7726 = vmatmul.mubr.msk.bf16.gmra.mxu1 %vm3325_vm0, %v7203_v14 }
 0x36a   :  { %7729 = vmatprep.mubr.msk.bf16.mxu1 %vm3325_vm0, %v7204_v29 }
 0x371   :  { %7730 = vmatmul.mubr.msk.bf16.gmra.mxu1 %vm3325_vm0, %v7205_v57 }
 0x386   :  { %v7593_v38 = vpop.f32.mrf.mxu0 }
 0x388   :  { %v4440_v26 = vpop.f32.mrf.mxu0 }
 0x38a   :  { %v7594_v27 = vpop.f32.mrf.mxu0 }
 0x38c   :  { %v4443_v21 = vpop.f32.mrf.mxu0 }
 0x38e   :  { %v7597_v40 = vpop.f32.mrf.mxu0 }
 0x38f   :  { %v7575_v32 = vpop.f32.mrf.mxu1 }
 0x390   :  { %v4449_v51 = vadd.f32 %v7593_v38, %v7575_v32  ;;  %v4456_v0 = vpop.f32.mrf.mxu0 }
 0x391   :  { %v4276_v61 = vpop.f32.mrf.mxu1 }
 0x392   :  { %v4441_v12 = vadd.f32 %v4440_v26, %v4276_v61  ;;  %v7598_v41 = vpop.f32.mrf.mxu0 }
 0x393   :  { %v7576_v25 = vpop.f32.mrf.mxu1 }
 0x394   :  { %v4452_v60 = vadd.f32 %v7594_v27, %v7576_v25  ;;  %v4459_v33 = vpop.f32.mrf.mxu0 }
 0x395   :  { %v4279_v22 = vpop.f32.mrf.mxu1 }
 0x396   :  { %v4444_v37 = vadd.f32 %v4443_v21, %v4279_v22  ;;  %v7601_v13 = vpop.f32.mrf.mxu0 }
 0x397   :  { %v7579_v30 = vpop.f32.mrf.mxu1 }
 0x398   :  { %v4465_v35 = vadd.f32 %v7597_v40, %v7579_v30  ;;  %v4472_v48 = vpop.f32.mrf.mxu0 }
 0x399   :  { %v4292_v59 = vpop.f32.mrf.mxu1 }
 0x39a   :  { %v4457_v11 = vadd.f32 %v4456_v0, %v4292_v59  ;;  %v7602_v52 = vpop.f32.mrf.mxu0 }
 0x39b   :  { %v7580_v54 = vpop.f32.mrf.mxu1 }
 0x39c   :  { %v4468_v56 = vadd.f32 %v7598_v41, %v7580_v54  ;;  %v4475_v5 = vpop.f32.mrf.mxu0 }
 0x39d   :  { %v4295_v2 = vpop.f32.mrf.mxu1 }
 0x39e   :  { %v4460_v19 = vadd.f32 %v4459_v33, %v4295_v2  ;;  %v7605_v16 = vpop.f32.mrf.mxu0 }
 0x39f   :  { %v7583_v44 = vpop.f32.mrf.mxu1 }
 0x3a0   :  { %v4481_v7 = vadd.f32 %v7601_v13, %v7583_v44  ;;  %v4488_v43 = vpop.f32.mrf.mxu0 }
 0x3a1   :  { %v4308_v10 = vpop.f32.mrf.mxu1 }
 0x3a2   :  { %v4473_v20 = vadd.f32 %v4472_v48, %v4308_v10  ;;  %v7606_v55 = vpop.f32.mrf.mxu0 }
 0x3a3   :  { %v7584_v3 = vpop.f32.mrf.mxu1 }
 0x3a4   :  { %v4484_v46 = vadd.f32 %v7602_v52, %v7584_v3  ;;  %v4491_v23 = vpop.f32.mrf.mxu0 }
 0x3a5   :  { %v4311_v36 = vpop.f32.mrf.mxu1 }
 0x3a6   :  { %v4476_v58 = vadd.f32 %v4475_v5, %v4311_v36  ;;  %v7629_v47 = vpop.f32.mrf.mxu0 }
 0x3a7   :  { %v7587_v4 = vpop.f32.mrf.mxu1 }
 0x3a8   :  { %v4497_v42 = vadd.f32 %v7605_v16, %v7587_v4  ;;  %v10684_v50 = vpop.f32.mrf.mxu0 }
 0x3a9   :  { %v4324_v39 = vpop.f32.mrf.mxu1 }
 0x3aa   :  { %v4489_v45 = vadd.f32 %v4488_v43, %v4324_v39  ;;  %v10686_v8 = vpop.f32.mrf.mxu0 }
 0x3ab   :  { %v7588_v24 = vpop.f32.mrf.mxu1 }
 0x3ac   :  { %v4500_v9 = vadd.f32 %v7606_v55, %v7588_v24  ;;  %v10688_v17 = vpop.f32.mrf.mxu0 }
 0x3ad   :  { %v4327_v34 = vpop.f32.mrf.mxu1 }
 0x3ae   :  { %v4492_v31 = vadd.f32 %v4491_v23, %v4327_v34  ;;  %v7633_v53 = vpop.f32.mrf.mxu0 }
 0x3af   :  { %v7611_v15 = vpop.f32.mrf.mxu1 }
 0x3b0   :  { %v4767_v63 = vadd.f32 %v7611_v15, %v4449_v51  ;;  %v10690_v14 = vpop.f32.mrf.mxu0 }
 0x3b1   :  { %v4702_v28 = vpop.f32.mrf.mxu1 }
 0x3b2   :  { %v10692_v29 = vadd.f32 %v4702_v28, %v4441_v12  ;;  %v10694_v18 = vpop.f32.mrf.mxu0  ;;  %v4965_v6 = vadd.f32 %v7629_v47, %v4767_v63 }
 0x3b3   :  { %v7612_v1 = vpop.f32.mrf.mxu1 }
 0x3b4   :  { %v10696_v62 = vadd.f32 %v7612_v1, %v4452_v60  ;;  %v10698_v49 = vpop.f32.mrf.mxu0 }
 0x3b5   :  { %v4705_v57 = vpop.f32.mrf.mxu1 }
 0x3b6   :  { %v10700_v38 = vadd.f32 %v4705_v57, %v4444_v37  ;;  %v7637_v26 = vpop.f32.mrf.mxu0 }
 0x3b7   :  { %v7615_v27 = vpop.f32.mrf.mxu1 }
 0x3b8   :  { %v4771_v21 = vadd.f32 %v7615_v27, %v4465_v35  ;;  %v10702_v40 = vpop.f32.mrf.mxu0 }
 0x3b9   :  { %v4718_v32 = vpop.f32.mrf.mxu1 }
 0x3ba   :  { %v10704_v51 = vadd.f32 %v4718_v32, %v4457_v11  ;;  %v10706_v0 = vpop.f32.mrf.mxu0  ;;  %v4969_v61 = vadd.f32 %v7633_v53, %v4771_v21 }
 0x3bb   :  { %v7616_v12 = vpop.f32.mrf.mxu1 }
 0x3bc   :  { %v10708_v41 = vadd.f32 %v7616_v12, %v4468_v56  ;;  %v10710_v25 = vpop.f32.mrf.mxu0 }
 0x3bd   :  { %v4721_v60 = vpop.f32.mrf.mxu1 }
 0x3be   :  { %v10712_v33 = vadd.f32 %v4721_v60, %v4460_v19  ;;  %v7641_v22 = vpop.f32.mrf.mxu0 }
 0x3bf   :  { %v7619_v37 = vpop.f32.mrf.mxu1 }
 0x3c0   :  { %v4775_v13 = vadd.f32 %v7619_v37, %v4481_v7  ;;  %v10714_v30 = vpop.f32.mrf.mxu0 }
 0x3c1   :  { %v4734_v35 = vpop.f32.mrf.mxu1 }
 0x3c2   :  { %v10716_v48 = vadd.f32 %v4734_v35, %v4473_v20  ;;  %v10718_v59 = vpop.f32.mrf.mxu0  ;;  %v4973_v11 = vadd.f32 %v7637_v26, %v4775_v13 }
 0x3c3   :  { %11190 = vst [vmem:[#allocation10_spill] sm:$0xff] %v10718_v59  ;;  %v7620_v52 = vpop.f32.mrf.mxu1 }
 0x3c4   :  { %v10720_v54 = vadd.f32 %v7620_v52, %v4484_v46  ;;  %v10722_v56 = vpop.f32.mrf.mxu0 }
 0x3c5   :  { %11191 = vst [vmem:[#allocation13_spill] sm:$0xff] %v10722_v56  ;;  %v4737_v5 = vpop.f32.mrf.mxu1  ;;  %v4963_v56 = vadd.f32 %v10684_v50, %v10692_v29 }
 0x3c6   :  { %v10724_v2 = vadd.f32 %v4737_v5, %v4476_v58  ;;  %v10726_v19 = vpop.f32.mrf.mxu0 }
 0x3c7   :  { %v7623_v16 = vpop.f32.mrf.mxu1 }
 0x3c8   :  { %v4779_v44 = vadd.f32 %v7623_v16, %v4497_v42  ;;  %v10728_v7 = vpop.f32.mrf.mxu0 }
 0x3c9   :  { %v4750_v43 = vpop.f32.mrf.mxu1 }
 0x3ca   :  { %v10730_v10 = vadd.f32 %v4750_v43, %v4489_v45  ;;  %v10732_v20 = vpop.f32.mrf.mxu0  ;;  %v4977_v55 = vadd.f32 %v7641_v22, %v4779_v44 }
 0x3cb   :  { %v7624_v3 = vpop.f32.mrf.mxu1 }
 0x3cc   :  { %v10734_v46 = vadd.f32 %v7624_v3, %v4500_v9  ;;  %v10736_v23 = vpop.f32.mrf.mxu0 }
 0x3cd   :  { %v4753_v36 = vpop.f32.mrf.mxu1 }
 0x3ce   :  { %11192 = vst [vmem:[#allocation23_spill] sm:$0xff] %v10734_v46  ;;  %v10738_v58 = vadd.f32 %v4753_v36, %v4492_v31  ;;  %v10740_v47 = vpop.f32.mrf.mxu0 }
 0x3cf   :  { %v7647_v4 = vpop.f32.mrf.mxu1 }
 0x3d0   :  { %11193 = vst [vmem:[#allocation28_spill] sm:$0xff] %v10738_v58  ;;  %v10742_v42 = vadd.f32 %v7647_v4, %v4965_v6  ;;  %v10744_v39 = vpop.f32.mrf.mxu0 }
 0x3d1   :  { %v5322_v45 = vpop.f32.mrf.mxu1 }
 0x3d2   :  { %v10746_v24 = vpop.f32.mrf.mxu0 }
 0x3d3   :  { %v7648_v34 = vpop.f32.mrf.mxu1 }
 0x3d4   :  { %v10748_v53 = vpop.f32.mrf.mxu0 }
 0x3d5   :  { %v5325_v9 = vpop.f32.mrf.mxu1 }
 0x3d6   :  { %v10750_v63 = vpop.f32.mrf.mxu0 }
 0x3d7   :  { %v7651_v15 = vpop.f32.mrf.mxu1  ;;  %11194 = vst [vmem:[#allocation26_spill] sm:$0xff] %v10750_v63  ;;  %v5385_v63 = vadd.f32 %v5322_v45, %v4963_v56 }
 0x3d8   :  { %v10752_v28 = vadd.f32 %v7651_v15, %v4969_v61  ;;  %v10756_v57 = vpop.f32.mrf.mxu0 }
 0x3d9   :  { %v5338_v31 = vpop.f32.mrf.mxu1  ;;  %v5663_v29 = vadd.f32 %v10728_v7, %v5385_v63  ;;  %v4970_v7 = vadd.f32 %v10694_v18, %v10708_v41 }
 0x3da   :  { %v10758_v27 = vpop.f32.mrf.mxu0  ;;  %v5669_v18 = vadd.f32 %v10740_v47, %v10752_v28 }
 0x3db   :  { %v10754_v1 = vpop.f32.mrf.mxu1  ;;  %11195 = vst [vmem:[#allocation12_spill] sm:$0xff] %v10758_v27 }
 0x3dc   :  { %v10762_v32 = vpop.f32.mrf.mxu0 }
 0x3dd   :  { %v5341_v6 = vpop.f32.mrf.mxu1  ;;  %11197 = vst [vmem:[#allocation18_spill] sm:$0xff] %v10762_v32 }
 0x3df   :  { %v7655_v26 = vpop.f32.mrf.mxu1  ;;  %v10766_v60 = vpop.f32.mrf.mxu0 }
 0x3e0   :  { %v10760_v21 = vadd.f32 %v7655_v26, %v4973_v11  ;;  %11198 = vst [vmem:[#allocation15_spill] sm:$0xff] %v10766_v60 }
 0x3e1   :  { %v10764_v12 = vpop.f32.mrf.mxu1  ;;  %v10770_v61 = vpop.f32.mrf.mxu0 }
 0x3e2   :  { %11196 = vst [vmem:[#allocation14_spill] sm:$0xff] %v10760_v21  ;;  %11199 = vst [vmem:[#allocation25_spill] sm:$0xff] %v10770_v61  ;;  %v4964_v21 = vadd.f32 %v10688_v17, %v10700_v38  ;;  %v5665_v17 = vadd.f32 %v10726_v19, %v10742_v42 }
 0x3e3   :  { %v10768_v22 = vpop.f32.mrf.mxu1  ;;  %v10774_v13 = vpop.f32.mrf.mxu0 }
 0x3e4   :  { %11200 = vst [vmem:[#allocation22_spill] sm:$0xff] %v10774_v13 }
 0x3e5   :  { %v10772_v37 = vpop.f32.mrf.mxu1  ;;  %v10780_v11 = vpop.f32.mrf.mxu0 }
 0x3e6   :  { %11203 = vst [vmem:[#allocation33_spill] sm:$0xff] %v10780_v11 }
 0x3ed   :  { %v7701_v43 = vpop.f32.mrf.mxu0 }
 0x3ef   :  { %v6221_v4 = vpop.f32.mrf.mxu0 }
 0x3f1   :  { %v7659_v35 = vpop.f32.mrf.mxu1  ;;  %v7702_v60 = vpop.f32.mrf.mxu0 }
 0x3f2   :  { %v10776_v52 = vadd.f32 %v7659_v35, %v4977_v55 }
 0x3f3   :  { %v10778_v5 = vpop.f32.mrf.mxu1  ;;  %v6224_v59 = vpop.f32.mrf.mxu0 }
 0x3f4   :  { %11201 = vst [vmem:[#allocation16_spill] sm:$0xff] %v10776_v52  ;;  %11202 = vst [vmem:[#allocation17_spill] sm:$0xff] %v10778_v5 }
 0x3f5   :  { %v10782_v16 = vpop.f32.mrf.mxu1 }
 0x3f6   :  { %11204 = vst [vmem:[#allocation29_spill] sm:$0xff] %v10782_v16 }
 0x3f7   :  { %v10784_v44 = vpop.f32.mrf.mxu1 }
 0x3f8   :  { %11205 = vst [vmem:[#allocation30_spill] sm:$0xff] %v10784_v44 }
 0x3f9   :  { %v7683_v3 = vpop.f32.mrf.mxu1 }
 0x3fb   :  { %v5799_v36 = vpop.f32.mrf.mxu1  ;;  %v10788_v52 = vpop.f32.mrf.mxu0 }
 0x3fc   :  { %11206 = vst [vmem:[#allocation31_spill] sm:$0xff] %v10788_v52  ;;  %v5386_v52 = vadd.f32 %v5325_v9, %v4964_v21  ;;  %v5862_v38 = vadd.f32 %v5799_v36, %v5663_v29 }
 0x3fd   :  { %v7684_v15 = vpop.f32.mrf.mxu1  ;;  %v6237_v44 = vpop.f32.mrf.mxu0 }
 0x3fe   :  { %v5664_v45 = vadd.f32 %v10736_v23, %v5386_v52  ;;  %v5392_v23 = vadd.f32 %v10754_v1, %v4970_v7  ;;  %v4971_v52 = vadd.f32 %v10702_v40, %v10716_v48  ;;  %v4972_v40 = vadd.f32 %v10710_v25, %v10724_v2 }
 0x3ff   :  { %v5802_v26 = vpop.f32.mrf.mxu1  ;;  %v10800_v58 = vpop.f32.mrf.mxu0 }
 0x400   :  { %v5863_v9 = vadd.f32 %v5802_v26, %v5664_v45  ;;  %v5394_v25 = vadd.f32 %v10772_v37, %v4972_v40 }
 0x401   :  { %v7687_v61 = vpop.f32.mrf.mxu1 }
 0x402   :  { %v5868_v48 = vadd.f32 %v7687_v61, %v5669_v18 }
 0x403   :  { %v5815_v13 = vpop.f32.mrf.mxu1 }
 0x405   :  { %v10786_v55 = vpop.f32.mrf.mxu1 }
 0x407   :  { %v5818_v35 = vpop.f32.mrf.mxu1 }
 0x409   :  { %v10790_v11 = vpop.f32.mrf.mxu1 }
 0x40a   :  { %11207 = vst [vmem:[#allocation32_spill] sm:$0xff] %v10790_v11  ;;  %v4966_v11 = vadd.f32 %v10686_v8, %v10696_v62  ;;  %v4968_v8 = vadd.f32 %v10698_v49, %v10712_v33 }
 0x40b   :  { %v10792_v16 = vpop.f32.mrf.mxu1 }
 0x40c   :  { %11208 = vst [vmem:[#allocation34_spill] sm:$0xff] %v10792_v16  ;;  %v5388_v50 = vadd.f32 %v7648_v34, %v4966_v11 }
 0x40d   :  { %v10794_v46 = vpop.f32.mrf.mxu1 }
 0x40e   :  { %11209 = vst [vmem:[#allocation20_spill] sm:$0xff] %v10794_v46  ;;  %v4967_v46 = vadd.f32 %v10690_v14, %v10704_v51  ;;  %v5864_v51 = vadd.f32 %v7683_v3, %v5665_v17  ;;  %v5666_v34 = vadd.f32 %v10732_v20, %v5388_v50  ;;  %v6285_v3 = vadd.f32 %v6224_v59, %v5863_v9 }
 0x40f   :  { %v10796_v27 = vpop.f32.mrf.mxu1  ;;  %v5670_v59 = vadd.f32 %v10746_v24, %v5392_v23  ;;  %v4975_v50 = vadd.f32 %v10714_v30, %v10730_v10 }
 0x410   :  { %11210 = vst [vmem:[#allocation7_spill] sm:$0xff] %v10796_v27  ;;  %v6240_v27 = vpop.f32.mrf.mxu0  ;;  %v5865_v42 = vadd.f32 %v7684_v15, %v5666_v34  ;;  %v6286_v11 = vadd.f32 %v7701_v43, %v5864_v51  ;;  %v11215_v51 = vld [vmem:[#allocation14_spill] sm:$0xff] }
 0x411   :  { %v10802_v32 = vpop.f32.mrf.mxu1  ;;  %v5869_v24 = vadd.f32 %v10786_v55, %v5670_v59  ;;  %v11216_v34 = vld [vmem:[#allocation26_spill] sm:$0xff] }
 0x412   :  { %11211 = vst [vmem:[#allocation19_spill] sm:$0xff] %v10802_v32  ;;  %v5389_v32 = vadd.f32 %v5338_v31, %v4967_v46  ;;  %v10822_v62 = vpop.f32.mrf.mxu0  ;;  %v5390_v46 = vadd.f32 %v5341_v6, %v4968_v8  ;;  %v6284_v31 = vadd.f32 %v6221_v4, %v5862_v38  ;;  %v5393_v6 = vadd.f32 %v10764_v12, %v4971_v52  ;;  %v11213_v38 = vld [vmem:[#allocation31_spill] sm:$0xff]  ;;  %v11214_v8 = vld [vmem:[#allocation17_spill] sm:$0xff]  ;;  %v11224_v59 = vld [vmem:[#allocation10_spill] sm:$0xff] }
 0x413   :  { %v10806_v5 = vpop.f32.mrf.mxu1  ;;  %v6287_v1 = vadd.f32 %v7702_v60, %v5865_v42  ;;  %v4974_v4 = vadd.f32 %v10706_v0, %v10720_v54  ;;  %v11212_v37 = vld [vmem:[#allocation34_spill] sm:$0xff]  ;;  %v5673_v9 = vadd.f32 %v11216_v34, %v11215_v51 }
 0x414   :  { %v5667_v63 = vadd.f32 %v10744_v39, %v5389_v32  ;;  %v6253_v21 = vpop.f32.mrf.mxu0  ;;  %v5668_v41 = vadd.f32 %v10748_v53, %v5390_v46 }
 0x415   :  { %v10812_v16 = vpop.f32.mrf.mxu1 }
 0x416   :  { %v5866_v49 = vadd.f32 %v5815_v13, %v5667_v63  ;;  %v10843_v43 = vpop.f32.mrf.mxu0  ;;  %v5867_v28 = vadd.f32 %v5818_v35, %v5668_v41  ;;  %v5396_v35 = vadd.f32 %v10768_v22, %v4974_v4  ;;  %v11217_v22 = vld [vmem:[#allocation18_spill] sm:$0xff]  ;;  %v11226_v4 = vld [vmem:[#allocation20_spill] sm:$0xff] }
 0x417   :  { %v10815_v56 = vpop.f32.mrf.mxu1  ;;  %v5672_v7 = vadd.f32 %v11217_v22, %v5394_v25 }
 0x418   :  { %v6288_v47 = vadd.f32 %v6237_v44, %v5866_v49  ;;  %v5671_v44 = vadd.f32 %v10756_v57, %v5393_v6  ;;  %v6256_v29 = vpop.f32.mrf.mxu0  ;;  %v6290_v57 = vadd.f32 %v11213_v38, %v5868_v48  ;;  %v6289_v45 = vadd.f32 %v6240_v27, %v5867_v28  ;;  %v11219_v27 = vld [vmem:[#allocation13_spill] sm:$0xff]  ;;  %v11223_v48 = vld [vmem:[#allocation23_spill] sm:$0xff]  ;;  %v11229_v38 = vld [vmem:[#allocation16_spill] sm:$0xff] }
 0x419   :  { %v7719_v14 = vpop.f32.mrf.mxu1 }
 0x41a   :  { %v10837_v32 = vadd.f32 %v7719_v14, %v6286_v11  ;;  %v5870_v17 = vadd.f32 %v11212_v37, %v5671_v44  ;;  %v5397_v14 = vadd.f32 %v11214_v8, %v4975_v50  ;;  %v7713_v49 = vpop.f32.mrf.mxu0  ;;  %v11221_v11 = vld [vmem:[#allocation12_spill] sm:$0xff]  ;;  %v11231_v8 = vld [vmem:[#allocation33_spill] sm:$0xff] }
 0x41b   :  { %v6499_v19 = vpop.f32.mrf.mxu1 }
 0x41c   :  { %v10831_v20 = vadd.f32 %v6499_v19, %v6284_v31  ;;  %v6581_v15 = vsel %vm3325_vm0, %v10837_v32, 0.0  ;;  %v6291_v19 = vadd.f32 %v10800_v58, %v5869_v24  ;;  %v11218_v31 = vld [vmem:[#allocation28_spill] sm:$0xff]  ;;  %v6292_v58 = vadd.f32 %v6253_v21, %v5870_v17  ;;  %v6269_v50 = vpop.f32.mrf.mxu0 }
 0x41d   :  { %v7720_v33 = vpop.f32.mrf.mxu1  ;;  %v4976_v23 = vadd.f32 %v11219_v27, %v11218_v31 }
 0x41e   :  { %v6578_v53 = vsel %vm3325_vm0, %v10831_v20, 0.0  ;;  %v10848_v12 = vadd.f32 %v7720_v33, %v6287_v1  ;;  %v11220_v33 = vld [vmem:[#allocation32_spill] sm:$0xff] }
 0x41f   :  { %v6502_v39 = vpop.f32.mrf.mxu1  ;;  %v5872_v52 = vadd.f32 %v11220_v33, %v5673_v9 }
 0x420   :  { %v10839_v13 = vadd.f32 %v6502_v39, %v6285_v3  ;;  %v6583_v55 = vsel %vm3325_vm0, %v10848_v12, 0.0  ;;  %v5674_v3 = vadd.f32 %v11221_v11, %v5396_v35  ;;  %v11222_v39 = vld [vmem:[#allocation7_spill] sm:$0xff] }
 0x421   :  { %v7723_v36 = vpop.f32.mrf.mxu1  ;;  %v5871_v6 = vadd.f32 %v11222_v39, %v5672_v7  ;;  %v6294_v17 = vadd.f32 %v10822_v62, %v5872_v52 }
 0x422   :  { %v6579_v60 = vsel %vm3325_vm0, %v10839_v13, 0.0  ;;  %v10872_v10 = vadd.f32 %v7723_v36, %v6290_v57  ;;  %v4978_v36 = vadd.f32 %v11224_v59, %v11223_v48  ;;  %v5873_v25 = vadd.f32 %v11226_v4, %v5674_v3  ;;  %v11230_v57 = vld [vmem:[#allocation15_spill] sm:$0xff] }
 0x423   :  { %v6580_v2 = vadd.f32 %v6579_v60, %v6578_v53  ;;  %v6515_v61 = vpop.f32.mrf.mxu1 }
 0x424   :  { %v10859_v26 = vadd.f32 %v6515_v61, %v6288_v47  ;;  %v11225_v47 = vld [vmem:[#allocation30_spill] sm:$0xff]  ;;  %v6589_v24 = vsel %vm3325_vm0, %v10872_v10, 0.0  ;;  %v6295_v7 = vadd.f32 %v10843_v43, %v5873_v25 }
 0x425   :  { %v6582_v0 = vadd.f32 %v6581_v15, %v6580_v2  ;;  %v7724_v54 = vpop.f32.mrf.mxu1  ;;  %v5398_v28 = vadd.f32 %v11225_v47, %v4976_v23  ;;  %v11227_v2 = vld [vmem:[#allocation25_spill] sm:$0xff] }
 0x426   :  { %v6585_v63 = vsel %vm3325_vm0, %v10859_v26, 0.0  ;;  %v10884_v1 = vadd.f32 %v7724_v54, %v6291_v19  ;;  %v5675_v61 = vadd.f32 %v11227_v2, %v5397_v14  ;;  %v11228_v15 = vld [vmem:[#allocation29_spill] sm:$0xff]  ;;  %v11233_v19 = vld [vmem:[#allocation22_spill] sm:$0xff] }
 0x427   :  { %v6584_v46 = vadd.f32 %v6583_v55, %v6582_v0  ;;  %v6518_v30 = vpop.f32.mrf.mxu1  ;;  %v5400_v35 = vadd.f32 %v11228_v15, %v4978_v36  ;;  %v6293_v55 = vadd.f32 %v6256_v29, %v5871_v6  ;;  %v5676_v14 = vadd.f32 %v11231_v8, %v5398_v28 }
 0x428   :  { %v10877_v42 = vadd.f32 %v6518_v30, %v6289_v45  ;;  %v5874_v54 = vadd.f32 %v10806_v5, %v5675_v61  ;;  %v6591_v37 = vsel %vm3325_vm0, %v10884_v1, 0.0  ;;  %v5677_v45 = vadd.f32 %v11230_v57, %v11229_v38  ;;  %v11232_v30 = vld [vmem:[#allocation19_spill] sm:$0xff] }
 0x429   :  { %v6586_v18 = vadd.f32 %v6585_v63, %v6584_v46  ;;  %v7727_v41 = vpop.f32.mrf.mxu1  ;;  %v7714_v46 = vpop.f32.mrf.mxu0  ;;  %v5678_v62 = vadd.f32 %v11233_v19, %v5400_v35  ;;  %v5875_v27 = vadd.f32 %v10815_v56, %v5676_v14 }
 0x42a   :  { %v6587_v40 = vsel %vm3325_vm0, %v10877_v42, 0.0  ;;  %v6572_v9 = vadd.f32 %v7727_v41, %v6294_v17  ;;  %v5876_v63 = vadd.f32 %v11232_v30, %v5677_v45  ;;  %v6296_v52 = vadd.f32 %v6269_v50, %v5874_v54 }
 0x42b   :  { %v6588_v53 = vadd.f32 %v6587_v40, %v6586_v18  ;;  %v6531_v60 = vpop.f32.mrf.mxu1  ;;  %v5877_v18 = vadd.f32 %v10812_v16, %v5678_v62  ;;  %v6272_v39 = vpop.f32.mrf.mxu0 }
 0x42c   :  { %v10895_v44 = vadd.f32 %v6531_v60, %v6292_v58  ;;  %v6597_v43 = vsel %vm3325_vm0, %v6572_v9, 0.0  ;;  %v6298_v48 = vadd.f32 %v7713_v49, %v5876_v63  ;;  %v6297_v59 = vadd.f32 %v6272_v39, %v5875_v27 }
 0x42d   :  { %v6590_v21 = vadd.f32 %v6589_v24, %v6588_v53  ;;  %v7728_v0 = vpop.f32.mrf.mxu1  ;;  %v6299_v53 = vadd.f32 %v7714_v46, %v5877_v18 }
 0x42e   :  { %v6593_v22 = vsel %vm3325_vm0, %v10895_v44, 0.0  ;;  %v6573_v23 = vadd.f32 %v7728_v0, %v6295_v7 }
 0x42f   :  { %v6592_v51 = vadd.f32 %v6591_v37, %v6590_v21  ;;  %v6534_v34 = vpop.f32.mrf.mxu1 }
 0x430   :  { %v6571_v5 = vadd.f32 %v6534_v34, %v6293_v55  ;;  %v6599_v58 = vsel %vm3325_vm0, %v6573_v23, 0.0 }
 0x431   :  { %v6594_v29 = vadd.f32 %v6593_v22, %v6592_v51  ;;  %v7731_v31 = vpop.f32.mrf.mxu1 }
 0x432   :  { %v6595_v33 = vsel %vm3325_vm0, %v6571_v5, 0.0  ;;  %v6576_v47 = vadd.f32 %v7731_v31, %v6298_v48 }
 0x433   :  { %v6596_v11 = vadd.f32 %v6595_v33, %v6594_v29  ;;  %v6547_v3 = vpop.f32.mrf.mxu1 }
 0x434   :  { %v6574_v41 = vadd.f32 %v6547_v3, %v6296_v52  ;;  %v6605_v61 = vsel %vm3325_vm0, %v6576_v47, 0.0 }
 0x435   :  { %v6598_v6 = vadd.f32 %v6597_v43, %v6596_v11  ;;  %v7732_v40 = vpop.f32.mrf.mxu1 }
 0x436   :  { %v6601_v28 = vsel %vm3325_vm0, %v6574_v41, 0.0  ;;  %v6577_v25 = vadd.f32 %v7732_v40, %v6299_v53 }
 0x437   :  { %v6600_v36 = vadd.f32 %v6599_v58, %v6598_v6  ;;  %v6550_v56 = vpop.f32.mrf.mxu1 }
 0x438   :  { %v6575_v60 = vadd.f32 %v6550_v56, %v6297_v59  ;;  %v6607_v15 = vsel %vm3325_vm0, %v6577_v25, 0.0 }
 0x439   :  { %v6602_v4 = vadd.f32 %v6601_v28, %v6600_v36 }
 0x43a   :  { %v6603_v16 = vsel %vm3325_vm0, %v6575_v60, 0.0 }
 0x43b   :  { %v6604_v2 = vadd.f32 %v6603_v16, %v6602_v4 }
 0x43d   :  { %v6606_v24 = vadd.f32 %v6605_v61, %v6604_v2 }
 0x43f   :  { %v6608_v35 = vadd.f32 %v6607_v15, %v6606_v24 }
 0x441   :  { %v6609_v49 = vrot.slane %v6608_v35, 4 }
 0x443   :  { %v6610_v50 = vadd.f32 %v6609_v49, %v6608_v35 }
 0x445   :  { %v6611_v21 = vrot.slane %v6610_v50, 2 }
 0x447   :  { %v6612_v0 = vadd.f32 %v6611_v21, %v6610_v50 }
 0x449   :  { %v6613_v54 = vrot.slane %v6612_v0, 1 }
 0x44b   :  { %v6614_v37 = vadd.f32 %v6613_v54, %v6612_v0 }
 0x44d   :  { %v6615_v17 = vmul.f32 0.0078125, %v6614_v37 }
 0x44f   :  { %v10920_v55 = vsub.f32 %v10831_v20, %v6615_v17  ;;  %v10923_v38 = vsub.f32 %v10839_v13, %v6615_v17  ;;  %v10926_v57 = vsub.f32 %v10837_v32, %v6615_v17  ;;  %v10929_v45 = vsub.f32 %v10848_v12, %v6615_v17 }
 0x450   :  { %v10932_v8 = vsub.f32 %v10859_v26, %v6615_v17  ;;  %v10935_v14 = vsub.f32 %v10877_v42, %v6615_v17  ;;  %v10938_v51 = vsub.f32 %v10872_v10, %v6615_v17  ;;  %v10941_v20 = vsub.f32 %v10884_v1, %v6615_v17 }
 0x451   :  { %v10944_v13 = vsub.f32 %v10895_v44, %v6615_v17  ;;  %v10946_v32 = vsub.f32 %v6571_v5, %v6615_v17  ;;  %v10948_v34 = vsub.f32 %v6572_v9, %v6615_v17  ;;  %v10950_v12 = vsub.f32 %v6573_v23, %v6615_v17 }
 0x452   :  { %v10952_v26 = vsub.f32 %v6574_v41, %v6615_v17  ;;  %v10954_v22 = vsub.f32 %v6575_v60, %v6615_v17  ;;  %v10956_v42 = vsub.f32 %v6576_v47, %v6615_v17  ;;  %v10958_v10 = vsub.f32 %v6577_v25, %v6615_v17 }
 0x453   :  { %v6632_v1 = vmul.f32 %v10920_v55, %v10920_v55  ;;  %v6633_v44 = vmul.f32 %v10923_v38, %v10923_v38  ;;  %v6634_v9 = vmul.f32 %v10926_v57, %v10926_v57  ;;  %v6635_v7 = vmul.f32 %v10929_v45, %v10929_v45 }
 0x454   :  { %v6636_v63 = vmul.f32 %v10932_v8, %v10932_v8  ;;  %v6637_v29 = vmul.f32 %v10935_v14, %v10935_v14  ;;  %v6638_v23 = vmul.f32 %v10938_v51, %v10938_v51  ;;  %v6639_v11 = vmul.f32 %v10941_v20, %v10941_v20 }
 0x455   :  { %v6648_v5 = vsel %vm3325_vm0, %v6632_v1, 0.0  ;;  %v6649_v46 = vsel %vm3325_vm0, %v6633_v44, 0.0  ;;  %v6651_v19 = vsel %vm3325_vm0, %v6634_v9, 0.0  ;;  %v6653_v31 = vsel %vm3325_vm0, %v6635_v7, 0.0 }
 0x456   :  { %v6650_v30 = vadd.f32 %v6649_v46, %v6648_v5  ;;  %v6655_v33 = vsel %vm3325_vm0, %v6636_v63, 0.0  ;;  %v6657_v3 = vsel %vm3325_vm0, %v6637_v29, 0.0  ;;  %v6640_v43 = vmul.f32 %v10944_v13, %v10944_v13  ;;  %v6688_v63 = vld [vmem:[%s11056_s5] sm:$0x1]  ;;  %v11234_v29 = vld [vmem:[#allocation8_spill] sm:$0xff] }
 0x457   :  { %v6659_v41 = vsel %vm3325_vm0, %v6638_v23, 0.0  ;;  %v6641_v6 = vmul.f32 %v10946_v32, %v10946_v32  ;;  %v6661_v40 = vsel %vm3325_vm0, %v6639_v11, 0.0  ;;  %v6642_v48 = vmul.f32 %v10948_v34, %v10948_v34 }
 0x458   :  { %v6652_v62 = vadd.f32 %v6651_v19, %v6650_v30  ;;  %v6663_v59 = vsel %vm3325_vm0, %v6640_v43, 0.0  ;;  %v6643_v56 = vmul.f32 %v10950_v12, %v10950_v12  ;;  %v6644_v53 = vmul.f32 %v10952_v26, %v10952_v26 }
 0x459   :  { %v6665_v47 = vsel %vm3325_vm0, %v6641_v6, 0.0  ;;  %v6667_v60 = vsel %vm3325_vm0, %v6642_v48, 0.0  ;;  %v6645_v25 = vmul.f32 %v10954_v22, %v10954_v22  ;;  %v6646_v61 = vmul.f32 %v10956_v42, %v10956_v42 }
 0x45a   :  { %v6654_v27 = vadd.f32 %v6653_v31, %v6652_v62  ;;  %v6669_v16 = vsel %vm3325_vm0, %v6643_v56, 0.0  ;;  %v6671_v24 = vsel %vm3325_vm0, %v6644_v53, 0.0  ;;  %v6647_v35 = vmul.f32 %v10958_v10, %v10958_v10 }
 0x45b   :  { %v6673_v49 = vsel %vm3325_vm0, %v6645_v25, 0.0  ;;  %v6675_v21 = vsel %vm3325_vm0, %v6646_v61, 0.0  ;;  %v11235_v31 = vsub.s32 0, %v11234_v29 }
 0x45c   :  { %v6656_v52 = vadd.f32 %v6655_v33, %v6654_v27  ;;  %v6677_v54 = vsel %vm3325_vm0, %v6647_v35, 0.0 }
 0x45e   :  { %v6658_v18 = vadd.f32 %v6657_v3, %v6656_v52 }
 0x460   :  { %v6660_v39 = vadd.f32 %v6659_v41, %v6658_v18 }
 0x462   :  { %v6662_v58 = vadd.f32 %v6661_v40, %v6660_v39  ;;  %v7214_v39 = vld [vmem:[%s11057_s6] ss:$0 sm:$0xff]  ;;  %s7912_s6 = smov [#allocation4]  }
 0x463   :  { %s6770_s12 = sshll.u32 %s7912_s6, 4  ;;  %s6771_s12 = int_to_ptr.vmem [resolvable:$true] %s6770_s12 }
 0x464   :  { %v6664_v36 = vadd.f32 %v6663_v59, %v6662_v58  ;;  %s7888_s13 = scalar_lea.vmem %s6771_s12, 2048  ;;  %p7893_p1 = scmp.lt.s32.totalorder %s6771_s12, %s6771_s12 }
 0x465   :  { %p7889_p0 = scmp.ne.s32.totalorder %s6771_s12, %s7888_s13  ;;  %p7894_p2 = scmp.lt.s32.totalorder %s7888_s13, %s7888_s13 }
 0x466   :  { %v6666_v28 = vadd.f32 %v6665_v47, %v6664_v36 }
 0x467   :  { %p7895_p3 = por %p7894_p2, %p7893_p1 }
 0x468   :  { %v6668_v4 = vadd.f32 %v6667_v60, %v6666_v28 }
 0x469   :  { %p7896_p4 = pnand %p7895_p3, %p7889_p0 }
 0x46a   :  { %v6670_v2 = vadd.f32 %v6669_v16, %v6668_v4 }
 0x46c   :  { %v6672_v15 = vadd.f32 %v6671_v24, %v6670_v2 }
 0x46e   :  { %v6674_v50 = vadd.f32 %v6673_v49, %v6672_v15 }
 0x470   :  { %v6676_v0 = vadd.f32 %v6675_v21, %v6674_v50 }
 0x472   :  { %v6678_v37 = vadd.f32 %v6677_v54, %v6676_v0 }
 0x474   :  { %v6679_v17 = vrot.slane %v6678_v37, 4 }
 0x476   :  { %v6680_v1 = vadd.f32 %v6679_v17, %v6678_v37 }
 0x478   :  { %v6681_v44 = vrot.slane %v6680_v1, 2 }
 0x47a   :  { %v6682_v9 = vadd.f32 %v6681_v44, %v6680_v1 }
 0x47c   :  { %v6683_v7 = vrot.slane %v6682_v9, 1 }
 0x47e   :  { %v6684_v5 = vadd.f32 %v6683_v7, %v6682_v9 }
 0x480   :  { %v6685_v46 = vmul.f32 0.0078125, %v6684_v5 }
 0x482   :  { %v6686_v30 = vadd.f32 1e-05, %v6685_v46 }
 0x484   :  { %7886 = vrsqrt.f32 %v6686_v30 }
 0x491   :  { %v7887_v19 = vpop.eup %7886 }
 0x492   :  { %v6689_v62 = vmul.f32 %v7887_v19, %v6688_v63 }
 0x494   :  { %v6693_v27 = vrot.slane %v6689_v62, %v11235_v31 }
 0x496   :  { %v6694_v23 = vmul.f32 %v6693_v27, %v10920_v55  ;;  %v6695_v33 = vmul.f32 %v6693_v27, %v10923_v38  ;;  %v6696_v52 = vmul.f32 %v6693_v27, %v10926_v57  ;;  %v6697_v11 = vmul.f32 %v6693_v27, %v10929_v45 }
 0x497   :  { %v6698_v3 = vmul.f32 %v6693_v27, %v10932_v8  ;;  %v6699_v18 = vmul.f32 %v6693_v27, %v10935_v14  ;;  %v6700_v43 = vmul.f32 %v6693_v27, %v10938_v51  ;;  %v6701_v41 = vmul.f32 %v6693_v27, %v10941_v20 }
 0x498   :  { %v6702_v55 = vmul.f32 %v6693_v27, %v10944_v13  ;;  %v6703_v38 = vmul.f32 %v6693_v27, %v10946_v32  ;;  %v6704_v57 = vmul.f32 %v6693_v27, %v10948_v34  ;;  %v6705_v45 = vmul.f32 %v6693_v27, %v10950_v12 }
 0x499   :  { %v6706_v8 = vmul.f32 %v6693_v27, %v10952_v26  ;;  %v6707_v14 = vmul.f32 %v6693_v27, %v10954_v22  ;;  %v6708_v51 = vmul.f32 %v6693_v27, %v10956_v42  ;;  %v6709_v20 = vmul.f32 %v6693_v27, %v10958_v10 }
 0x49a   :  { %v6717_v6 = vadd.f32 %v7214_v39, %v6694_v23  ;;  %v6718_v40 = vadd.f32 %v7214_v39, %v6695_v33  ;;  %v6719_v58 = vadd.f32 %v7214_v39, %v6696_v52  ;;  %v6720_v48 = vadd.f32 %v7214_v39, %v6697_v11 }
 0x49b   :  { %v6721_v59 = vadd.f32 %v7214_v39, %v6698_v3  ;;  %v6722_v13 = vadd.f32 %v7214_v39, %v6699_v18  ;;  %v6723_v36 = vadd.f32 %v7214_v39, %v6700_v43  ;;  %v6724_v32 = vadd.f32 %v7214_v39, %v6701_v41 }
 0x49c   :  { %v6725_v56 = vadd.f32 %v7214_v39, %v6702_v55  ;;  %v6726_v34 = vadd.f32 %v7214_v39, %v6703_v38  ;;  %v6727_v47 = vadd.f32 %v7214_v39, %v6704_v57  ;;  %v6728_v12 = vadd.f32 %v7214_v39, %v6705_v45 }
 0x49d   :  { %v6729_v28 = vadd.f32 %v7214_v39, %v6706_v8  ;;  %v6730_v26 = vadd.f32 %v7214_v39, %v6707_v14  ;;  %v6731_v53 = vadd.f32 %v7214_v39, %v6708_v51  ;;  %v6732_v22 = vadd.f32 %v7214_v39, %v6709_v20 }
 0x49e   :  { %v6733_v60 = vmax.f32 %v6717_v6, 0.0  ;;  %v6734_v42 = vmax.f32 %v6718_v40, 0.0  ;;  %v6735_v4 = vmax.f32 %v6719_v58, 0.0  ;;  %v6736_v10 = vmax.f32 %v6720_v48, 0.0 }
 0x49f   :  { %v6737_v25 = vmax.f32 %v6721_v59, 0.0  ;;  %v6738_v16 = vmax.f32 %v6722_v13, 0.0  ;;  %v6739_v2 = vmax.f32 %v6723_v36, 0.0  ;;  %v6740_v61 = vmax.f32 %v6724_v32, 0.0 }
 0x4a0   :  { %v6741_v24 = vmax.f32 %v6725_v56, 0.0  ;;  %v6742_v15 = vmax.f32 %v6726_v34, 0.0  ;;  %v6743_v35 = vmax.f32 %v6727_v47, 0.0  ;;  %v6744_v49 = vmax.f32 %v6728_v12, 0.0  ;;  %6749 = vst.msk [vmem:[#allocation4] sm:$0xff] %vm3325_vm0, %v6733_v60  ;;  %6750 = vst.msk [vmem:[#allocation4 + $0x8] sm:$0xff] %vm3325_vm0, %v6734_v42 }
 0x4a1   :  { %6751 = vst.msk [vmem:[#allocation4 + $0x10] sm:$0xff] %vm3325_vm0, %v6735_v4  ;;  %6752 = vst.msk [vmem:[#allocation4 + $0x18] sm:$0xff] %vm3325_vm0, %v6736_v10  ;;  %v6745_v50 = vmax.f32 %v6729_v28, 0.0  ;;  %v6746_v21 = vmax.f32 %v6730_v26, 0.0  ;;  %v6747_v0 = vmax.f32 %v6731_v53, 0.0  ;;  %v6748_v54 = vmax.f32 %v6732_v22, 0.0 }
 0x4a2   :  { %6753 = vst.msk [vmem:[#allocation4 + $0x20] sm:$0xff] %vm3325_vm0, %v6737_v25  ;;  %6754 = vst.msk [vmem:[#allocation4 + $0x28] sm:$0xff] %vm3325_vm0, %v6738_v16 }
 0x4a3   :  { %6755 = vst.msk [vmem:[#allocation4 + $0x30] sm:$0xff] %vm3325_vm0, %v6739_v2  ;;  %6756 = vst.msk [vmem:[#allocation4 + $0x38] sm:$0xff] %vm3325_vm0, %v6740_v61 }
 0x4a4   :  { %6757 = vst.msk [vmem:[#allocation4 + $0x40] sm:$0xff] %vm3325_vm0, %v6741_v24  ;;  %6758 = vst.msk [vmem:[#allocation4 + $0x48] sm:$0xff] %vm3325_vm0, %v6742_v15 }
 0x4a5   :  { %6759 = vst.msk [vmem:[#allocation4 + $0x50] sm:$0xff] %vm3325_vm0, %v6743_v35  ;;  %6760 = vst.msk [vmem:[#allocation4 + $0x58] sm:$0xff] %vm3325_vm0, %v6744_v49 }
 0x4a6   :  { %6761 = vst.msk [vmem:[#allocation4 + $0x60] sm:$0xff] %vm3325_vm0, %v6745_v50  ;;  %6762 = vst.msk [vmem:[#allocation4 + $0x68] sm:$0xff] %vm3325_vm0, %v6746_v21 }
 0x4a7   :  { %6763 = vst.msk [vmem:[#allocation4 + $0x70] sm:$0xff] %vm3325_vm0, %v6747_v0  ;;  %6764 = vst.msk [vmem:[#allocation4 + $0x78] sm:$0xff] %vm3325_vm0, %v6748_v54 }
 0x4a8   :  { %7899 = shalt.err (!%p7896_p4)
}
 0x4a9   :  { %s7913_s14 = smov 128   ;;  %s7914_s1 = smov 8  }
 0x4aa   :  { %6776 = dma.vmem_to_hbm [thread:$0]  %s6771_s12, 2048, %s11058_s7, [#allocation5], %s7913_s14, %s7913_s14, %s7914_s1  }
 0x4ab   :  { %7908 = dma.done.wait [#allocation5], 2048  }
 0x4ac   :  { %7909 = vsyncadd [#allocation5], 4294965248 }
 0x4ad   :  { %6780 = vsyncpa [#allocation5], 1 }

</bundles_post_ra>
